<compile_context>
chip_gen: v5e
topology: v5e:2x2
jax: 0.10.0
libtpu: 0.0.40
codegen_flags: <defaults>
</compile_context>

<pallas_src>
import math

import numpy as np
import jax
import jax.numpy as jnp
from jax.experimental import pallas as pl
from jax.experimental.pallas import tpu as pltpu

# ----------------------------- configuration --------------------------------
B = 2                 # batch
N_NODES = 8           # nodes per graph (incl. context node 0)
SENT_DIM = 64         # sentence vector dim
CONCEPT_DIM = 32      # concept / GNN hidden dim
N_NTYPE = 4
N_ETYPE = 5
N_CONCEPT = 20
K_LAYERS = 2          # number of GNN layers
HEAD_COUNT = 4        # GAT heads (concept_dim % head_count == 0)
N_ATT_HEAD = 2        # pooler heads (concept_dim % n_att_head == 0)
FC_DIM = 32
PRE_DIM = 1
N_EDGES = 24

SLAB_W = 128          # lane width of the packed input/output slabs


# ------------------------------ small helpers -------------------------------
def gelu(x):
    # QAGNN's GELU (tanh approximation)
    return 0.5 * x * (1.0 + jnp.tanh(math.sqrt(2.0 / math.pi) * (x + 0.044715 * x ** 3)))


def _ceil8(n):
    return ((n + 7) // 8) * 8


class _SlabBuilder:
    """Packs many small 2-D f32 arrays into one (rows, SLAB_W) slab.

    Each entry is padded to SLAB_W lanes and to a multiple of 8 rows so every
    entry starts sublane-aligned; offsets are static Python ints usable for
    zero-cost ref-window slicing inside the kernel."""

    def __init__(self, width=SLAB_W):
        self.width = width
        self.blocks = []
        self.entries = {}   # name -> (row_off, rows, cols)
        self.rows = 0

    def add(self, name, arr):
        arr = jnp.asarray(arr, jnp.float32)
        if arr.ndim == 1:
            arr = arr.reshape(1, -1)
        r, c = arr.shape
        assert c <= self.width, (name, arr.shape)
        block = arr
        if c < self.width:
            block = jnp.concatenate(
                [block, jnp.zeros((r, self.width - c), jnp.float32)], axis=1)
        rp = _ceil8(r)
        if rp > r:
            block = jnp.concatenate(
                [block, jnp.zeros((rp - r, self.width), jnp.float32)], axis=0)
        self.entries[name] = (self.rows, r, c)
        self.blocks.append(block)
        self.rows += rp

    def finish(self):
        return jnp.concatenate(self.blocks, axis=0), self.entries


# ------------------------------ parameter init -------------------------------
def init_params(key):
    keys = iter(jax.random.split(key, 64))

    def lin(fan_in, fan_out):
        k1, k2 = jax.random.split(next(keys))
        bound = 1.0 / np.sqrt(fan_in)
        w = jax.random.uniform(k1, (fan_in, fan_out), jnp.float32, -bound, bound)
        b = jax.random.uniform(k2, (fan_out,), jnp.float32, -bound, bound)
        return w, b

    def bn(dim):
        return dict(gamma=jnp.ones((dim,), jnp.float32), beta=jnp.zeros((dim,), jnp.float32),
                    mean=jnp.zeros((dim,), jnp.float32), var=jnp.ones((dim,), jnp.float32))

    half = CONCEPT_DIM // 2
    p = {}
    p["concept_emb"] = 0.02 * jax.random.normal(next(keys), (N_CONCEPT + 2, CONCEPT_DIM), jnp.float32)
    p["svec2nvec"] = lin(SENT_DIM, CONCEPT_DIM)
    p["emb_node_type"] = lin(N_NTYPE, half)
    p["emb_score"] = lin(half, half)
    p["edge_enc1"] = lin(N_ETYPE + 1 + 2 * N_NTYPE, CONCEPT_DIM)
    p["edge_bn"] = bn(CONCEPT_DIM)
    p["edge_enc2"] = lin(CONCEPT_DIM, CONCEPT_DIM)
    p["gnn_layers"] = []
    for _ in range(K_LAYERS):
        lp = {}
        lp["Wk"], lp["bk"] = lin(3 * CONCEPT_DIM, CONCEPT_DIM)
        lp["Wm"], lp["bm"] = lin(3 * CONCEPT_DIM, CONCEPT_DIM)
        lp["Wq"], lp["bq"] = lin(2 * CONCEPT_DIM, CONCEPT_DIM)
        lp["Wmlp1"], lp["bmlp1"] = lin(CONCEPT_DIM, CONCEPT_DIM)
        lp["bn"] = bn(CONCEPT_DIM)
        lp["Wmlp2"], lp["bmlp2"] = lin(CONCEPT_DIM, CONCEPT_DIM)
        p["gnn_layers"].append(lp)
    p["Vh"] = lin(CONCEPT_DIM, CONCEPT_DIM)
    p["Vx"] = lin(CONCEPT_DIM, CONCEPT_DIM)
    dk = CONCEPT_DIM // N_ATT_HEAD
    p["w_qs"] = lin(SENT_DIM, N_ATT_HEAD * dk)
    p["w_ks"] = lin(CONCEPT_DIM, N_ATT_HEAD * dk)
    p["w_vs"] = lin(CONCEPT_DIM, N_ATT_HEAD * dk)
    p["fc0"] = lin(2 * CONCEPT_DIM + SENT_DIM, FC_DIM)
    p["fc_ln"] = (jnp.ones((FC_DIM,), jnp.float32), jnp.zeros((FC_DIM,), jnp.float32))
    p["fc1"] = lin(FC_DIM, PRE_DIM)
    return p


def pack_params(p):
    """Fold eval-mode BatchNorms into the preceding Linears and split weights
    by input block so the kernel never lane-slices packed matmul outputs."""
    cd = CONCEPT_DIM
    half = cd // 2

    def fold_bn(w, b, bnp, eps=1e-5):
        scale = bnp["gamma"] / jnp.sqrt(bnp["var"] + eps)
        return w * scale[None, :], (b - bnp["mean"]) * scale + bnp["beta"]

    pk = {"concept_emb": p["concept_emb"]}
    pk["w_svec"], pk["b_svec"] = p["svec2nvec"]

    # block-diagonal [emb_node_type | emb_score] -> node_feature_extra in one matmul
    w_nt, b_nt = p["emb_node_type"]
    w_sc, b_sc = p["emb_score"]
    w_ext = jnp.zeros((N_NTYPE + half, cd), jnp.float32)
    w_ext = w_ext.at[0:N_NTYPE, 0:half].set(w_nt).at[N_NTYPE:, half:].set(w_sc)
    pk["w_ext"] = w_ext
    pk["b_ext"] = jnp.concatenate([b_nt, b_sc])

    w1, b1 = p["edge_enc1"]
    pk["w_e1"], pk["b_e1"] = fold_bn(w1, b1, p["edge_bn"])
    pk["w_e2"], pk["b_e2"] = p["edge_enc2"]

    for l, lp in enumerate(p["gnn_layers"]):
        Wk, bk = lp["Wk"], lp["bk"]          # rows: [X | node_feature_extra | edge]
        Wm, bm = lp["Wm"], lp["bm"]
        Wq, bq = lp["Wq"], lp["bq"]          # rows: [X | node_feature_extra]
        pk[f"wk_x{l}"], pk[f"wk_f{l}"], pk[f"wk_e{l}"] = Wk[:cd], Wk[cd:2 * cd], Wk[2 * cd:]
        pk[f"bk{l}"] = bk
        pk[f"wm_x{l}"], pk[f"wm_f{l}"], pk[f"wm_e{l}"] = Wm[:cd], Wm[cd:2 * cd], Wm[2 * cd:]
        pk[f"bm{l}"] = bm
        pk[f"wq_x{l}"], pk[f"wq_f{l}"] = Wq[:cd], Wq[cd:2 * cd]
        pk[f"bq{l}"] = bq
        wm1, bm1 = fold_bn(lp["Wmlp1"], lp["bmlp1"], lp["bn"])
        pk[f"wm1_{l}"], pk[f"bm1_{l}"] = wm1, bm1
        pk[f"wm2_{l}"], pk[f"bm2_{l}"] = lp["Wmlp2"], lp["bmlp2"]

    pk["w_vh"], bvh = p["Vh"]
    pk["w_vx"], bvx = p["Vx"]
    pk["b_vhx"] = bvh + bvx

    pk["w_qs"], pk["b_qs"] = p["w_qs"]
    pk["w_ks"], pk["b_ks"] = p["w_ks"]
    pk["w_vs"], pk["b_vs"] = p["w_vs"]

    w_fc0, b_fc0 = p["fc0"]                  # input = [graph_vecs | sent | Z]
    pk["w_fc0_g"] = w_fc0[0:cd]
    pk["w_fc0_s"] = w_fc0[cd:cd + SENT_DIM]
    pk["w_fc0_z"] = w_fc0[cd + SENT_DIM:]
    pk["b_fc0"] = b_fc0
    pk["ln_g"], pk["ln_b"] = p["fc_ln"]
    pk["w_fc1"], pk["b_fc1"] = p["fc1"]

    # 0/1 head-sum matrices (sum a head's dims / broadcast a head's alpha)
    d = cd // HEAD_COUNT
    dk = cd // N_ATT_HEAD
    pk["hsum"] = (jnp.arange(cd)[:, None] // d == jnp.arange(HEAD_COUNT)[None, :]).astype(jnp.float32)
    pk["hsum_pool"] = (jnp.arange(cd)[:, None] // dk == jnp.arange(N_ATT_HEAD)[None, :]).astype(jnp.float32)
    return pk


# ------------------------------ model forward --------------------------------
def qagnn_forward(pk, sent_vecs, dl_vec, concept_ids, node_type_ids, node_scores,
                  adj_lengths, adj):
    del dl_vec  # unused in the reference forward
    edge_index, edge_type = adj
    Bb, Nn = node_type_ids.shape
    Nt = Bb * Nn
    cd = pk["w_vh"].shape[0]
    half = cd // 2
    head_count = pk["hsum"].shape[1]
    n_att_head = pk["hsum_pool"].shape[1]
    k_layers = sum(1 for k in pk if k.startswith("wk_x"))
    pre_dim = pk["w_fc1"].shape[1]
    e_full = edge_index.shape[1] + Nt

    dph = cd // head_count
    dk = cd // n_att_head
    inv_sqrt_d = 1.0 / math.sqrt(dph)
    inv_sqrt_dk = 1.0 / math.sqrt(dk)
    NEG = -1e30

    # ---- host-side (XLA) prep: gathers, one-hots, score normalisation -------
    g1 = pk["concept_emb"][concept_ids[:, 1:] - 1]                                 # (B,Nn-1,cd)
    gnn_in_pad = jnp.concatenate([jnp.zeros((Bb, 1, cd), jnp.float32), g1], axis=1).reshape(Nt, cd)

    _mask = (jnp.arange(Nn)[None, :] < adj_lengths[:, None]).astype(jnp.float32)
    ns = -node_scores
    ns = ns - ns[:, 0:1, :]
    ns = ns[:, :, 0] * _mask
    mean_norm = jnp.sum(jnp.abs(ns), axis=1) / adj_lengths.astype(jnp.float32)
    ns = ns / (mean_norm[:, None] + 1e-5)
    js = jnp.power(1.1, jnp.arange(half, dtype=jnp.float32))[None, None, :]
    bfeat = jnp.sin(js * ns[:, :, None]).reshape(Nt, half)
    node_type_flat = node_type_ids.reshape(-1)
    t_onehot = jax.nn.one_hot(node_type_flat, N_NTYPE, dtype=jnp.float32)
    ext_feat = jnp.concatenate([t_onehot, bfeat], axis=1)                          # (Nt, 4+half)

    loop_index = jnp.arange(Nt, dtype=edge_index.dtype)
    edge_index_full = jnp.concatenate(
        [edge_index, jnp.stack([loop_index, loop_index], axis=0)], axis=1)         # (2, E_full)

    edge_vec = jax.nn.one_hot(edge_type, N_ETYPE + 1, dtype=jnp.float32)
    self_edge_vec = jnp.zeros((Nt, N_ETYPE + 1), jnp.float32).at[:, N_ETYPE].set(1.0)
    head_vec = jax.nn.one_hot(node_type_flat[edge_index[0]], N_NTYPE, dtype=jnp.float32)
    tail_vec = jax.nn.one_hot(node_type_flat[edge_index[1]], N_NTYPE, dtype=jnp.float32)
    self_head = jax.nn.one_hot(node_type_flat, N_NTYPE, dtype=jnp.float32)
    edge_feat = jnp.concatenate(
        [jnp.concatenate([edge_vec, self_edge_vec], axis=0),
         jnp.concatenate([jnp.concatenate([head_vec, tail_vec], axis=1),
                          jnp.concatenate([self_head, self_head], axis=1)], axis=0)],
        axis=1)                                                                     # (E_full, 14)

    src_oh = jax.nn.one_hot(edge_index_full[0], Nt, dtype=jnp.float32)             # (E_full, Nt)
    tgt_oh = jax.nn.one_hot(edge_index_full[1], Nt, dtype=jnp.float32)

    rows = jnp.arange(Nt)
    ctx_sel = (rows[:, None] == (jnp.arange(Bb) * Nn)[None, :]).astype(jnp.float32)      # (Nt, B)
    batch_sel = ((rows[:, None] // Nn) == jnp.arange(Bb)[None, :]).astype(jnp.float32)   # (Nt, B)

    mask = (jnp.arange(Nn)[None, :] >= adj_lengths[:, None]) | (node_type_ids == 3)
    all_masked = jnp.all(mask, axis=1)
    mask = mask.at[:, 0].set(jnp.where(all_masked, False, mask[:, 0]))
    node_mask = mask.astype(jnp.float32).reshape(Nt, 1)                            # 1.0 == masked

    # hoisted graph-structure constants
    deg = jnp.sum(src_oh, axis=0)                                                  # (Nt,)
    edge_count = jnp.take(deg, edge_index_full[0]).reshape(-1, 1)                  # (E_full, 1)
    neg_pad = (src_oh - 1.0) * 1e30                                                # (E_full, Nt)
    neg_pad_p = (batch_sel - 1.0) * 1e30                                           # (Nt, B)

    # ---- pack everything into ONE (rows, 128) slab ---------------------------
    sb = _SlabBuilder()
    sb.add("sent", sent_vecs)
    sb.add("gnn_in", gnn_in_pad)
    sb.add("ctx_sel", ctx_sel)
    sb.add("ctx_sel_t", ctx_sel.T)
    sb.add("batch_sel", batch_sel)
    sb.add("batch_sel_t", batch_sel.T)
    sb.add("ext_feat", ext_feat)
    sb.add("edge_feat", edge_feat)
    sb.add("src_oh", src_oh)
    sb.add("src_oh_t", src_oh.T)
    sb.add("tgt_oh", tgt_oh)
    sb.add("tgt_oh_t", tgt_oh.T)
    sb.add("node_mask", node_mask)
    sb.add("edge_count", edge_count)
    sb.add("neg_pad", neg_pad)
    sb.add("neg_pad_p", neg_pad_p)
    for name, arr in pk.items():
        if name == "concept_emb":
            continue                      # consumed host-side (embedding gather)
        sb.add(name, arr)
    slab, ent = sb.finish()

    # ---- output slab layout (lane-dense, single store) ------------------------
    rows_logits = _ceil8(Bb)
    rows_attn = _ceil8(Nt)
    rows_alpha = _ceil8(e_full)
    ROW_ATTN = rows_logits
    ROW_ALPHA = rows_logits + rows_attn
    out_rows = ROW_ALPHA + k_layers * rows_alpha

    # ------------------------------ fused kernel -------------------------------
    def kernel(slab_ref, out_ref):
        f32 = jnp.float32

        def rd(name):
            off, r, c = ent[name]
            return slab_ref[off:off + r, 0:c]

        def nn(a, b):      # a @ b
            return jax.lax.dot_general(a, b, (((1,), (0,)), ((), ())),
                                       preferred_element_type=f32)

        def nt(a, b):      # a @ b.T
            return jax.lax.dot_general(a, b, (((1,), (1,)), ((), ())),
                                       preferred_element_type=f32)

        def pad_block(x, n_rows):
            r, c = x.shape
            if c < SLAB_W:
                x = jnp.concatenate([x, jnp.zeros((r, SLAB_W - c), f32)], axis=1)
            if n_rows > r:
                x = jnp.concatenate([x, jnp.zeros((n_rows - r, SLAB_W), f32)], axis=0)
            return x

        sent = rd("sent")
        src_oh_k = rd("src_oh")
        src_oh_t_k = rd("src_oh_t")
        tgt_oh_k = rd("tgt_oh")
        tgt_oh_t_k = rd("tgt_oh_t")
        hsum = rd("hsum")
        edge_cnt = rd("edge_count")
        npad = rd("neg_pad")

        # --- node features -----------------------------------------------------
        gnn_input0 = gelu(nn(sent, rd("w_svec")) + rd("b_svec"))                  # (B, cd)
        gnn_input = nn(rd("ctx_sel"), gnn_input0) + rd("gnn_in")                  # (Nt, cd)
        extra = gelu(nn(rd("ext_feat"), rd("w_ext")) + rd("b_ext"))               # (Nt, cd)

        # --- shared edge encoder (BatchNorm folded into w_e1/b_e1) --------------
        eh = jnp.maximum(nn(rd("edge_feat"), rd("w_e1")) + rd("b_e1"), 0.0)
        edge_emb = nn(eh, rd("w_e2")) + rd("b_e2")                                # (E, cd)

        X = gnn_input
        alphas = []
        for l in range(k_layers):
            # separate key / msg / query matmuls (no lane-slicing of packed results)
            keyn = nn(X, rd(f"wk_x{l}")) + nn(extra, rd(f"wk_f{l}"))              # (Nt, cd)
            key = nn(tgt_oh_k, keyn) + nn(edge_emb, rd(f"wk_e{l}")) + rd(f"bk{l}")
            msgn = nn(X, rd(f"wm_x{l}")) + nn(extra, rd(f"wm_f{l}"))
            msg = nn(src_oh_k, msgn) + nn(edge_emb, rd(f"wm_e{l}")) + rd(f"bm{l}")
            qn = nn(X, rd(f"wq_x{l}")) + nn(extra, rd(f"wq_f{l}"))
            query = (nn(src_oh_k, qn) + rd(f"bq{l}")) * inv_sqrt_d
            s = nn(query * key, hsum)                                             # (E, H)

            # segment softmax over source nodes: per-head masked max stacked,
            # broadcast back with ONE matmul
            seg_max = jnp.concatenate(
                [jnp.max(s[:, h:h + 1] + npad, axis=0, keepdims=True)
                 for h in range(head_count)], axis=0)                             # (H, Nt)
            edge_max = nt(src_oh_k, seg_max)                                      # (E, H)
            e = jnp.exp(s - edge_max)
            seg_sum = nn(src_oh_t_k, e)                                           # (Nt, H)
            edge_sum = nn(src_oh_k, seg_sum)                                      # (E, H)
            alpha = e * pl.reciprocal(edge_sum, approx=True)
            alphas.append(alpha)

            # edge-count rescale, message weighting, scatter-add to target nodes
            alpha_full = nt(alpha, hsum)                                          # (E, cd)
            aggr = nn(tgt_oh_t_k, msg * (alpha_full * edge_cnt))                  # (Nt, cd)

            # node MLP (BatchNorm folded into wm1/bm1), then GELU between layers
            h1 = jnp.maximum(nn(aggr, rd(f"wm1_{l}")) + rd(f"bm1_{l}"), 0.0)
            X = gelu(nn(h1, rd(f"wm2_{l}")) + rd(f"bm2_{l}"))

        # --- gnn output: gelu(Vh(H) + Vx(X)) -------------------------------------
        gnn_out = gelu(nn(gnn_input, rd("w_vh")) + nn(X, rd("w_vx")) + rd("b_vhx"))

        # --- multi-head attention pooler ----------------------------------------
        batch_sel_k = rd("batch_sel")
        batch_sel_t_k = rd("batch_sel_t")
        hsum_p = rd("hsum_pool")
        qs = nn(sent, rd("w_qs")) + rd("b_qs")                                    # (B, cd)
        ks = nn(gnn_out, rd("w_ks")) + rd("b_ks")                                 # (Nt, cd)
        vs = nn(gnn_out, rd("w_vs")) + rd("b_vs")                                 # (Nt, cd)
        q_pernode = nn(batch_sel_k, qs)                                           # (Nt, cd)
        sc = nn(q_pernode * ks, hsum_p) * inv_sqrt_dk                             # (Nt, nh)
        sc = jnp.where(rd("node_mask") > 0.0, NEG, sc)
        npad_p = rd("neg_pad_p")
        pmax = jnp.concatenate(
            [jnp.max(sc[:, h:h + 1] + npad_p, axis=0, keepdims=True)
             for h in range(n_att_head)], axis=0)                                 # (nh, B)
        pe = jnp.exp(sc - nt(batch_sel_k, pmax))
        pden = nn(batch_sel_k, nn(batch_sel_t_k, pe))
        attn = pe * pl.reciprocal(pden, approx=True)                              # (Nt, nh)
        attn_full = nt(attn, hsum_p)                                              # (Nt, cd)
        graph_vecs = nn(batch_sel_t_k, attn_full * vs)                            # (B, cd)

        # --- classifier head -----------------------------------------------------
        z_vecs = nn(rd("ctx_sel_t"), gnn_out)                                     # (B, cd)
        hfc = (nn(graph_vecs, rd("w_fc0_g")) + nn(sent, rd("w_fc0_s"))
               + nn(z_vecs, rd("w_fc0_z")) + rd("b_fc0"))                         # (B, fc)
        mu = jnp.mean(hfc, axis=-1, keepdims=True)
        var = jnp.mean((hfc - mu) ** 2, axis=-1, keepdims=True)
        hfc = (hfc - mu) * jax.lax.rsqrt(var + 1e-5) * rd("ln_g") + rd("ln_b")
        hfc = gelu(hfc)
        y = nn(hfc, rd("w_fc1")) + rd("b_fc1")
        logits = pl.reciprocal(1.0 + jnp.exp(-y), approx=True)                    # Sigmoid (activateOut)

        # --- single lane-dense output store --------------------------------------
        blocks = [pad_block(logits, rows_logits), pad_block(attn, rows_attn)]
        for a in alphas:
            blocks.append(pad_block(a, rows_alpha))
        out_ref[...] = jnp.concatenate(blocks, axis=0)

    out = pl.pallas_call(
        kernel,
        out_shape=jax.ShapeDtypeStruct((out_rows, SLAB_W), jnp.float32),
        grid=(1,),
        in_specs=[pl.BlockSpec(slab.shape, lambda i: (0, 0))],
        out_specs=pl.BlockSpec((out_rows, SLAB_W), lambda i: (0, 0)),
        compiler_params=pltpu.CompilerParams(dimension_semantics=("arbitrary",)),
    )(slab)

    # tiny output unpacking on host (layout plumbing only)
    logits = out[0:Bb, 0:pre_dim]
    attn_nodes = out[ROW_ATTN:ROW_ATTN + Nt, 0:n_att_head]
    pool_attn = attn_nodes.reshape(Bb, Nn, n_att_head).transpose(2, 0, 1).reshape(n_att_head * Bb, Nn)
    all_gnn_attn = []
    all_edge_map = []
    for l in range(k_layers):
        r0 = ROW_ALPHA + l * rows_alpha
        alpha_l = out[r0:r0 + e_full, 0:head_count]
        all_gnn_attn.append(alpha_l[0:500, -1])        # matches reference truncation (<=500 kept)
        all_edge_map.append(edge_index_full[:, 0:500])
    # (name-swap in the original mp_helper/forward cancels out)
    return logits, pool_attn, (all_edge_map, all_gnn_attn)


# ----------------------------------- main ------------------------------------
if __name__ == "__main__":
    root = jax.random.PRNGKey(0)
    kp, k1, k2, k3, k4, k5, k6, k7, k8 = jax.random.split(root, 9)

    params = init_params(kp)
    packed = pack_params(params)

    sent_vecs = jax.random.normal(k1, (B, SENT_DIM), jnp.float32)
    dl_vec = jax.random.normal(k2, (B, 768), jnp.float32)                 # unused (as in reference)
    concept_ids = jax.random.randint(k3, (B, N_NODES), 1, N_CONCEPT + 1, jnp.int32)
    node_type_ids = jax.random.randint(k4, (B, N_NODES), 0, N_NTYPE, jnp.int32)
    node_scores = jax.random.normal(k5, (B, N_NODES, 1), jnp.float32)
    adj_lengths = jax.random.randint(k6, (B,), 2, N_NODES + 1, jnp.int32)
    edge_index = jax.random.randint(k7, (2, N_EDGES), 0, B * N_NODES, jnp.int32)
    edge_type = jax.random.randint(k8, (N_EDGES,), 0, N_ETYPE, jnp.int32)
    adj = (edge_index, edge_type)

    fwd = jax.jit(qagnn_forward)
    logits, pool_attn, (edge_idx, edge_weight) = fwd(
        packed, sent_vecs, dl_vec, concept_ids, node_type_ids, node_scores, adj_lengths, adj)

    jax.block_until_ready((logits, pool_attn, edge_idx, edge_weight))
    assert logits.shape == (B, PRE_DIM)
    assert pool_attn.shape == (N_ATT_HEAD * B, N_NODES)
    assert len(edge_idx) == K_LAYERS and len(edge_weight) == K_LAYERS
    assert bool(jnp.all(jnp.isfinite(logits)))
    assert bool(jnp.all(jnp.isfinite(pool_attn)))
    print("KERNEL_OK")
</pallas_src>

<mosaic_0001>
module attributes {stable_mosaic.version = 11 : i64} {
  func.func @kernel(%arg0: i32, %arg1: memref<1720x128xf32, #tpu.memory_space<vmem>>, %arg2: memref<104x128xf32, #tpu.memory_space<vmem>>) attributes {dimension_semantics = [#tpu.dimension_semantics<arbitrary>], iteration_bounds = array<i64: 1>, scalar_prefetch = 0 : i64, scratch_operands = 0 : i64, tpu.core_type = #tpu.core_type<tc>, window_params = [{pipeline_mode = #tpu.pipeline_mode<synchronous>, transform_indices = @transform_0, window_bounds = array<i64: 1720, 128>}, {pipeline_mode = #tpu.pipeline_mode<synchronous>, transform_indices = @transform_1, window_bounds = array<i64: 104, 128>}]} {
    %c0 = arith.constant 0 : index
    %c0_0 = arith.constant 0 : index
    %0 = vector.load %arg1[%c0, %c0_0] : memref<1720x128xf32, #tpu.memory_space<vmem>>, vector<2x64xf32>
    %c128 = arith.constant 128 : index
    %c0_1 = arith.constant 0 : index
    %1 = vector.load %arg1[%c128, %c0_1] : memref<1720x128xf32, #tpu.memory_space<vmem>>, vector<40x16xf32>
    %c168 = arith.constant 168 : index
    %c0_2 = arith.constant 0 : index
    %2 = vector.load %arg1[%c168, %c0_2] : memref<1720x128xf32, #tpu.memory_space<vmem>>, vector<16x40xf32>
    %c184 = arith.constant 184 : index
    %c0_3 = arith.constant 0 : index
    %3 = vector.load %arg1[%c184, %c0_3] : memref<1720x128xf32, #tpu.memory_space<vmem>>, vector<40x16xf32>
    %c224 = arith.constant 224 : index
    %c0_4 = arith.constant 0 : index
    %4 = vector.load %arg1[%c224, %c0_4] : memref<1720x128xf32, #tpu.memory_space<vmem>>, vector<16x40xf32>
    %c512 = arith.constant 512 : index
    %c0_5 = arith.constant 0 : index
    %5 = vector.load %arg1[%c512, %c0_5] : memref<1720x128xf32, #tpu.memory_space<vmem>>, vector<32x4xf32>
    %c256 = arith.constant 256 : index
    %c0_6 = arith.constant 0 : index
    %6 = vector.load %arg1[%c256, %c0_6] : memref<1720x128xf32, #tpu.memory_space<vmem>>, vector<40x1xf32>
    %c296 = arith.constant 296 : index
    %c0_7 = arith.constant 0 : index
    %7 = vector.load %arg1[%c296, %c0_7] : memref<1720x128xf32, #tpu.memory_space<vmem>>, vector<40x16xf32>
    %c920 = arith.constant 920 : index
    %c0_8 = arith.constant 0 : index
    %8 = vector.load %arg1[%c920, %c0_8] : memref<1720x128xf32, #tpu.memory_space<vmem>>, vector<64x32xf32>
    %cst = arith.constant dense<0.000000e+00> : vector<2x32xf32>
    %9 = tpu.matmul %0, %8, %cst {dimension_numbers = #tpu.dot_dimension_numbers<[1], [0], [0], [1], [0, 0, 1, 1], [], []>} : vector<2x64xf32>, vector<64x32xf32>, vector<2x32xf32> -> vector<2x32xf32>
    %c408 = arith.constant 408 : index
    %c0_9 = arith.constant 0 : index
    %10 = vector.load %arg1[%c408, %c0_9] : memref<1720x128xf32, #tpu.memory_space<vmem>>, vector<1x32xf32>
    %11 = vector.broadcast %10 : vector<1x32xf32> to vector<2x32xf32>
    %12 = arith.addf %9, %11 : vector<2x32xf32>
    %cst_10 = arith.constant 5.000000e-01 : f32
    %13 = vector.broadcast %cst_10 : f32 to vector<2x32xf32>
    %14 = arith.mulf %13, %12 : vector<2x32xf32>
    %15 = arith.mulf %12, %12 : vector<2x32xf32>
    %16 = arith.mulf %12, %15 : vector<2x32xf32>
    %cst_11 = arith.constant 4.471500e-02 : f32
    %17 = vector.broadcast %cst_11 : f32 to vector<2x32xf32>
    %18 = arith.mulf %17, %16 : vector<2x32xf32>
    %19 = arith.addf %12, %18 : vector<2x32xf32>
    %cst_12 = arith.constant 0.797884583 : f32
    %20 = vector.broadcast %cst_12 : f32 to vector<2x32xf32>
    %21 = arith.mulf %20, %19 : vector<2x32xf32>
    %22 = math.tanh %21 : vector<2x32xf32>
    %cst_13 = arith.constant 1.000000e+00 : f32
    %23 = vector.broadcast %cst_13 : f32 to vector<2x32xf32>
    %24 = arith.addf %23, %22 : vector<2x32xf32>
    %25 = arith.mulf %14, %24 : vector<2x32xf32>
    %c24 = arith.constant 24 : index
    %c0_14 = arith.constant 0 : index
    %26 = vector.load %arg1[%c24, %c0_14] : memref<1720x128xf32, #tpu.memory_space<vmem>>, vector<16x2xf32>
    %cst_15 = arith.constant dense<0.000000e+00> : vector<16x32xf32>
    %27 = tpu.matmul %26, %25, %cst_15 {dimension_numbers = #tpu.dot_dimension_numbers<[1], [0], [0], [1], [0, 0, 1, 1], [], []>} : vector<16x2xf32>, vector<2x32xf32>, vector<16x32xf32> -> vector<16x32xf32>
    %c8 = arith.constant 8 : index
    %c0_16 = arith.constant 0 : index
    %28 = vector.load %arg1[%c8, %c0_16] : memref<1720x128xf32, #tpu.memory_space<vmem>>, vector<16x32xf32>
    %29 = arith.addf %27, %28 : vector<16x32xf32>
    %c72 = arith.constant 72 : index
    %c0_17 = arith.constant 0 : index
    %30 = vector.load %arg1[%c72, %c0_17] : memref<1720x128xf32, #tpu.memory_space<vmem>>, vector<16x20xf32>
    %c640 = arith.constant 640 : index
    %c0_18 = arith.constant 0 : index
    %31 = vector.load %arg1[%c640, %c0_18] : memref<1720x128xf32, #tpu.memory_space<vmem>>, vector<20x32xf32>
    %cst_19 = arith.constant dense<0.000000e+00> : vector<16x32xf32>
    %32 = tpu.matmul %30, %31, %cst_19 {dimension_numbers = #tpu.dot_dimension_numbers<[1], [0], [0], [1], [0, 0, 1, 1], [], []>} : vector<16x20xf32>, vector<20x32xf32>, vector<16x32xf32> -> vector<16x32xf32>
    %c368 = arith.constant 368 : index
    %c0_20 = arith.constant 0 : index
    %33 = vector.load %arg1[%c368, %c0_20] : memref<1720x128xf32, #tpu.memory_space<vmem>>, vector<1x32xf32>
    %34 = vector.broadcast %33 : vector<1x32xf32> to vector<16x32xf32>
    %35 = arith.addf %32, %34 : vector<16x32xf32>
    %cst_21 = arith.constant 5.000000e-01 : f32
    %36 = vector.broadcast %cst_21 : f32 to vector<16x32xf32>
    %37 = arith.mulf %36, %35 : vector<16x32xf32>
    %38 = arith.mulf %35, %35 : vector<16x32xf32>
    %39 = arith.mulf %35, %38 : vector<16x32xf32>
    %cst_22 = arith.constant 4.471500e-02 : f32
    %40 = vector.broadcast %cst_22 : f32 to vector<16x32xf32>
    %41 = arith.mulf %40, %39 : vector<16x32xf32>
    %42 = arith.addf %35, %41 : vector<16x32xf32>
    %cst_23 = arith.constant 0.797884583 : f32
    %43 = vector.broadcast %cst_23 : f32 to vector<16x32xf32>
    %44 = arith.mulf %43, %42 : vector<16x32xf32>
    %45 = math.tanh %44 : vector<16x32xf32>
    %cst_24 = arith.constant 1.000000e+00 : f32
    %46 = vector.broadcast %cst_24 : f32 to vector<16x32xf32>
    %47 = arith.addf %46, %45 : vector<16x32xf32>
    %48 = arith.mulf %37, %47 : vector<16x32xf32>
    %c88 = arith.constant 88 : index
    %c0_25 = arith.constant 0 : index
    %49 = vector.load %arg1[%c88, %c0_25] : memref<1720x128xf32, #tpu.memory_space<vmem>>, vector<40x14xf32>
    %c592 = arith.constant 592 : index
    %c0_26 = arith.constant 0 : index
    %50 = vector.load %arg1[%c592, %c0_26] : memref<1720x128xf32, #tpu.memory_space<vmem>>, vector<14x32xf32>
    %cst_27 = arith.constant dense<0.000000e+00> : vector<40x32xf32>
    %51 = tpu.matmul %49, %50, %cst_27 {dimension_numbers = #tpu.dot_dimension_numbers<[1], [0], [0], [1], [0, 0, 1, 1], [], []>} : vector<40x14xf32>, vector<14x32xf32>, vector<40x32xf32> -> vector<40x32xf32>
    %c352 = arith.constant 352 : index
    %c0_28 = arith.constant 0 : index
    %52 = vector.load %arg1[%c352, %c0_28] : memref<1720x128xf32, #tpu.memory_space<vmem>>, vector<1x32xf32>
    %53 = vector.broadcast %52 : vector<1x32xf32> to vector<40x32xf32>
    %54 = arith.addf %51, %53 : vector<40x32xf32>
    %cst_29 = arith.constant 0.000000e+00 : f32
    %55 = vector.broadcast %cst_29 : f32 to vector<40x32xf32>
    %56 = arith.maximumf %54, %55 : vector<40x32xf32>
    %c608 = arith.constant 608 : index
    %c0_30 = arith.constant 0 : index
    %57 = vector.load %arg1[%c608, %c0_30] : memref<1720x128xf32, #tpu.memory_space<vmem>>, vector<32x32xf32>
    %cst_31 = arith.constant dense<0.000000e+00> : vector<40x32xf32>
    %58 = tpu.matmul %56, %57, %cst_31 {dimension_numbers = #tpu.dot_dimension_numbers<[1], [0], [0], [1], [0, 0, 1, 1], [], []>} : vector<40x32xf32>, vector<32x32xf32>, vector<40x32xf32> -> vector<40x32xf32>
    %c360 = arith.constant 360 : index
    %c0_32 = arith.constant 0 : index
    %59 = vector.load %arg1[%c360, %c0_32] : memref<1720x128xf32, #tpu.memory_space<vmem>>, vector<1x32xf32>
    %60 = vector.broadcast %59 : vector<1x32xf32> to vector<40x32xf32>
    %61 = arith.addf %58, %60 : vector<40x32xf32>
    %c1208 = arith.constant 1208 : index
    %c0_33 = arith.constant 0 : index
    %62 = vector.load %arg1[%c1208, %c0_33] : memref<1720x128xf32, #tpu.memory_space<vmem>>, vector<32x32xf32>
    %cst_34 = arith.constant dense<0.000000e+00> : vector<16x32xf32>
    %63 = tpu.matmul %29, %62, %cst_34 {dimension_numbers = #tpu.dot_dimension_numbers<[1], [0], [0], [1], [0, 0, 1, 1], [], []>} : vector<16x32xf32>, vector<32x32xf32>, vector<16x32xf32> -> vector<16x32xf32>
    %c1144 = arith.constant 1144 : index
    %c0_35 = arith.constant 0 : index
    %64 = vector.load %arg1[%c1144, %c0_35] : memref<1720x128xf32, #tpu.memory_space<vmem>>, vector<32x32xf32>
    %cst_36 = arith.constant dense<0.000000e+00> : vector<16x32xf32>
    %65 = tpu.matmul %48, %64, %cst_36 {dimension_numbers = #tpu.dot_dimension_numbers<[1], [0], [0], [1], [0, 0, 1, 1], [], []>} : vector<16x32xf32>, vector<32x32xf32>, vector<16x32xf32> -> vector<16x32xf32>
    %66 = arith.addf %63, %65 : vector<16x32xf32>
    %cst_37 = arith.constant dense<0.000000e+00> : vector<40x32xf32>
    %67 = tpu.matmul %3, %66, %cst_37 {dimension_numbers = #tpu.dot_dimension_numbers<[1], [0], [0], [1], [0, 0, 1, 1], [], []>} : vector<40x16xf32>, vector<16x32xf32>, vector<40x32xf32> -> vector<40x32xf32>
    %c1080 = arith.constant 1080 : index
    %c0_38 = arith.constant 0 : index
    %68 = vector.load %arg1[%c1080, %c0_38] : memref<1720x128xf32, #tpu.memory_space<vmem>>, vector<32x32xf32>
    %cst_39 = arith.constant dense<0.000000e+00> : vector<40x32xf32>
    %69 = tpu.matmul %61, %68, %cst_39 {dimension_numbers = #tpu.dot_dimension_numbers<[1], [0], [0], [1], [0, 0, 1, 1], [], []>} : vector<40x32xf32>, vector<32x32xf32>, vector<40x32xf32> -> vector<40x32xf32>
    %70 = arith.addf %67, %69 : vector<40x32xf32>
    %c432 = arith.constant 432 : index
    %c0_40 = arith.constant 0 : index
    %71 = vector.load %arg1[%c432, %c0_40] : memref<1720x128xf32, #tpu.memory_space<vmem>>, vector<1x32xf32>
    %72 = vector.broadcast %71 : vector<1x32xf32> to vector<40x32xf32>
    %73 = arith.addf %70, %72 : vector<40x32xf32>
    %c1528 = arith.constant 1528 : index
    %c0_41 = arith.constant 0 : index
    %74 = vector.load %arg1[%c1528, %c0_41] : memref<1720x128xf32, #tpu.memory_space<vmem>>, vector<32x32xf32>
    %cst_42 = arith.constant dense<0.000000e+00> : vector<16x32xf32>
    %75 = tpu.matmul %29, %74, %cst_42 {dimension_numbers = #tpu.dot_dimension_numbers<[1], [0], [0], [1], [0, 0, 1, 1], [], []>} : vector<16x32xf32>, vector<32x32xf32>, vector<16x32xf32> -> vector<16x32xf32>
    %c1464 = arith.constant 1464 : index
    %c0_43 = arith.constant 0 : index
    %76 = vector.load %arg1[%c1464, %c0_43] : memref<1720x128xf32, #tpu.memory_space<vmem>>, vector<32x32xf32>
    %cst_44 = arith.constant dense<0.000000e+00> : vector<16x32xf32>
    %77 = tpu.matmul %48, %76, %cst_44 {dimension_numbers = #tpu.dot_dimension_numbers<[1], [0], [0], [1], [0, 0, 1, 1], [], []>} : vector<16x32xf32>, vector<32x32xf32>, vector<16x32xf32> -> vector<16x32xf32>
    %78 = arith.addf %75, %77 : vector<16x32xf32>
    %cst_45 = arith.constant dense<0.000000e+00> : vector<40x32xf32>
    %79 = tpu.matmul %1, %78, %cst_45 {dimension_numbers = #tpu.dot_dimension_numbers<[1], [0], [0], [1], [0, 0, 1, 1], [], []>} : vector<40x16xf32>, vector<16x32xf32>, vector<40x32xf32> -> vector<40x32xf32>
    %c1400 = arith.constant 1400 : index
    %c0_46 = arith.constant 0 : index
    %80 = vector.load %arg1[%c1400, %c0_46] : memref<1720x128xf32, #tpu.memory_space<vmem>>, vector<32x32xf32>
    %cst_47 = arith.constant dense<0.000000e+00> : vector<40x32xf32>
    %81 = tpu.matmul %61, %80, %cst_47 {dimension_numbers = #tpu.dot_dimension_numbers<[1], [0], [0], [1], [0, 0, 1, 1], [], []>} : vector<40x32xf32>, vector<32x32xf32>, vector<40x32xf32> -> vector<40x32xf32>
    %82 = arith.addf %79, %81 : vector<40x32xf32>
    %c448 = arith.constant 448 : index
    %c0_48 = arith.constant 0 : index
    %83 = vector.load %arg1[%c448, %c0_48] : memref<1720x128xf32, #tpu.memory_space<vmem>>, vector<1x32xf32>
    %84 = vector.broadcast %83 : vector<1x32xf32> to vector<40x32xf32>
    %85 = arith.addf %82, %84 : vector<40x32xf32>
    %c1656 = arith.constant 1656 : index
    %c0_49 = arith.constant 0 : index
    %86 = vector.load %arg1[%c1656, %c0_49] : memref<1720x128xf32, #tpu.memory_space<vmem>>, vector<32x32xf32>
    %cst_50 = arith.constant dense<0.000000e+00> : vector<16x32xf32>
    %87 = tpu.matmul %29, %86, %cst_50 {dimension_numbers = #tpu.dot_dimension_numbers<[1], [0], [0], [1], [0, 0, 1, 1], [], []>} : vector<16x32xf32>, vector<32x32xf32>, vector<16x32xf32> -> vector<16x32xf32>
    %c1592 = arith.constant 1592 : index
    %c0_51 = arith.constant 0 : index
    %88 = vector.load %arg1[%c1592, %c0_51] : memref<1720x128xf32, #tpu.memory_space<vmem>>, vector<32x32xf32>
    %cst_52 = arith.constant dense<0.000000e+00> : vector<16x32xf32>
    %89 = tpu.matmul %48, %88, %cst_52 {dimension_numbers = #tpu.dot_dimension_numbers<[1], [0], [0], [1], [0, 0, 1, 1], [], []>} : vector<16x32xf32>, vector<32x32xf32>, vector<16x32xf32> -> vector<16x32xf32>
    %90 = arith.addf %87, %89 : vector<16x32xf32>
    %cst_53 = arith.constant dense<0.000000e+00> : vector<40x32xf32>
    %91 = tpu.matmul %1, %90, %cst_53 {dimension_numbers = #tpu.dot_dimension_numbers<[1], [0], [0], [1], [0, 0, 1, 1], [], []>} : vector<40x16xf32>, vector<16x32xf32>, vector<40x32xf32> -> vector<40x32xf32>
    %c496 = arith.constant 496 : index
    %c0_54 = arith.constant 0 : index
    %92 = vector.load %arg1[%c496, %c0_54] : memref<1720x128xf32, #tpu.memory_space<vmem>>, vector<1x32xf32>
    %93 = vector.broadcast %92 : vector<1x32xf32> to vector<40x32xf32>
    %94 = arith.addf %91, %93 : vector<40x32xf32>
    %cst_55 = arith.constant 0.353553385 : f32
    %95 = vector.broadcast %cst_55 : f32 to vector<40x32xf32>
    %96 = arith.mulf %94, %95 : vector<40x32xf32>
    %97 = arith.mulf %96, %73 : vector<40x32xf32>
    %cst_56 = arith.constant dense<0.000000e+00> : vector<40x4xf32>
    %98 = tpu.matmul %97, %5, %cst_56 {dimension_numbers = #tpu.dot_dimension_numbers<[1], [0], [0], [1], [0, 0, 1, 1], [], []>} : vector<40x32xf32>, vector<32x4xf32>, vector<40x4xf32> -> vector<40x4xf32>
    %99 = vector.extract_strided_slice %98 {offsets = [0, 0], sizes = [40, 1], strides = [1, 1]} : vector<40x4xf32> to vector<40x1xf32>
    %100 = vector.broadcast %99 : vector<40x1xf32> to vector<40x16xf32>
    %101 = arith.addf %100, %7 : vector<40x16xf32>
    %cst_57 = arith.constant dense<0xFF800000> : vector<16xf32>
    %102 = vector.multi_reduction <maximumf>, %101, %cst_57 [0] : vector<40x16xf32> to vector<16xf32>
    %103 = vector.shape_cast %102 : vector<16xf32> to vector<1x16xf32>
    %104 = vector.extract_strided_slice %98 {offsets = [0, 1], sizes = [40, 1], strides = [1, 1]} : vector<40x4xf32> to vector<40x1xf32>
    %105 = vector.broadcast %104 : vector<40x1xf32> to vector<40x16xf32>
    %106 = arith.addf %105, %7 : vector<40x16xf32>
    %cst_58 = arith.constant dense<0xFF800000> : vector<16xf32>
    %107 = vector.multi_reduction <maximumf>, %106, %cst_58 [0] : vector<40x16xf32> to vector<16xf32>
    %108 = vector.shape_cast %107 : vector<16xf32> to vector<1x16xf32>
    %109 = vector.extract_strided_slice %98 {offsets = [0, 2], sizes = [40, 1], strides = [1, 1]} : vector<40x4xf32> to vector<40x1xf32>
    %110 = vector.broadcast %109 : vector<40x1xf32> to vector<40x16xf32>
    %111 = arith.addf %110, %7 : vector<40x16xf32>
    %cst_59 = arith.constant dense<0xFF800000> : vector<16xf32>
    %112 = vector.multi_reduction <maximumf>, %111, %cst_59 [0] : vector<40x16xf32> to vector<16xf32>
    %113 = vector.shape_cast %112 : vector<16xf32> to vector<1x16xf32>
    %114 = vector.extract_strided_slice %98 {offsets = [0, 3], sizes = [40, 1], strides = [1, 1]} : vector<40x4xf32> to vector<40x1xf32>
    %115 = vector.broadcast %114 : vector<40x1xf32> to vector<40x16xf32>
    %116 = arith.addf %115, %7 : vector<40x16xf32>
    %cst_60 = arith.constant dense<0xFF800000> : vector<16xf32>
    %117 = vector.multi_reduction <maximumf>, %116, %cst_60 [0] : vector<40x16xf32> to vector<16xf32>
    %118 = vector.shape_cast %117 : vector<16xf32> to vector<1x16xf32>
    %119 = tpu.concatenate %103, %108, %113, %118 in 0 : vector<1x16xf32>, vector<1x16xf32>, vector<1x16xf32>, vector<1x16xf32> -> vector<4x16xf32>
    %cst_61 = arith.constant dense<0.000000e+00> : vector<40x4xf32>
    %120 = tpu.matmul %1, %119, %cst_61 {dimension_numbers = #tpu.dot_dimension_numbers<[1], [1], [0], [0], [0, 0, 1, 0], [], []>} : vector<40x16xf32>, vector<4x16xf32>, vector<40x4xf32> -> vector<40x4xf32>
    %121 = arith.subf %98, %120 : vector<40x4xf32>
    %122 = math.exp %121 : vector<40x4xf32>
    %cst_62 = arith.constant dense<0.000000e+00> : vector<16x4xf32>
    %123 = tpu.matmul %2, %122, %cst_62 {dimension_numbers = #tpu.dot_dimension_numbers<[1], [0], [0], [1], [0, 0, 1, 1], [], []>} : vector<16x40xf32>, vector<40x4xf32>, vector<16x4xf32> -> vector<16x4xf32>
    %cst_63 = arith.constant dense<0.000000e+00> : vector<40x4xf32>
    %124 = tpu.matmul %1, %123, %cst_63 {dimension_numbers = #tpu.dot_dimension_numbers<[1], [0], [0], [1], [0, 0, 1, 1], [], []>} : vector<40x16xf32>, vector<16x4xf32>, vector<40x4xf32> -> vector<40x4xf32>
    %125 = tpu.reciprocal %124 {approx = true} : vector<40x4xf32> -> vector<40x4xf32>
    %126 = arith.mulf %122, %125 : vector<40x4xf32>
    %cst_64 = arith.constant dense<0.000000e+00> : vector<40x32xf32>
    %127 = tpu.matmul %126, %5, %cst_64 {dimension_numbers = #tpu.dot_dimension_numbers<[1], [1], [0], [0], [0, 0, 1, 0], [], []>} : vector<40x4xf32>, vector<32x4xf32>, vector<40x32xf32> -> vector<40x32xf32>
    %128 = vector.broadcast %6 : vector<40x1xf32> to vector<40x32xf32>
    %129 = arith.mulf %127, %128 : vector<40x32xf32>
    %130 = arith.mulf %85, %129 : vector<40x32xf32>
    %cst_65 = arith.constant dense<0.000000e+00> : vector<16x32xf32>
    %131 = tpu.matmul %4, %130, %cst_65 {dimension_numbers = #tpu.dot_dimension_numbers<[1], [0], [0], [1], [0, 0, 1, 1], [], []>} : vector<16x40xf32>, vector<40x32xf32>, vector<16x32xf32> -> vector<16x32xf32>
    %c1272 = arith.constant 1272 : index
    %c0_66 = arith.constant 0 : index
    %132 = vector.load %arg1[%c1272, %c0_66] : memref<1720x128xf32, #tpu.memory_space<vmem>>, vector<32x32xf32>
    %cst_67 = arith.constant dense<0.000000e+00> : vector<16x32xf32>
    %133 = tpu.matmul %131, %132, %cst_67 {dimension_numbers = #tpu.dot_dimension_numbers<[1], [0], [0], [1], [0, 0, 1, 1], [], []>} : vector<16x32xf32>, vector<32x32xf32>, vector<16x32xf32> -> vector<16x32xf32>
    %c464 = arith.constant 464 : index
    %c0_68 = arith.constant 0 : index
    %134 = vector.load %arg1[%c464, %c0_68] : memref<1720x128xf32, #tpu.memory_space<vmem>>, vector<1x32xf32>
    %135 = vector.broadcast %134 : vector<1x32xf32> to vector<16x32xf32>
    %136 = arith.addf %133, %135 : vector<16x32xf32>
    %cst_69 = arith.constant 0.000000e+00 : f32
    %137 = vector.broadcast %cst_69 : f32 to vector<16x32xf32>
    %138 = arith.maximumf %136, %137 : vector<16x32xf32>
    %c1336 = arith.constant 1336 : index
    %c0_70 = arith.constant 0 : index
    %139 = vector.load %arg1[%c1336, %c0_70] : memref<1720x128xf32, #tpu.memory_space<vmem>>, vector<32x32xf32>
    %cst_71 = arith.constant dense<0.000000e+00> : vector<16x32xf32>
    %140 = tpu.matmul %138, %139, %cst_71 {dimension_numbers = #tpu.dot_dimension_numbers<[1], [0], [0], [1], [0, 0, 1, 1], [], []>} : vector<16x32xf32>, vector<32x32xf32>, vector<16x32xf32> -> vector<16x32xf32>
    %c480 = arith.constant 480 : index
    %c0_72 = arith.constant 0 : index
    %141 = vector.load %arg1[%c480, %c0_72] : memref<1720x128xf32, #tpu.memory_space<vmem>>, vector<1x32xf32>
    %142 = vector.broadcast %141 : vector<1x32xf32> to vector<16x32xf32>
    %143 = arith.addf %140, %142 : vector<16x32xf32>
    %cst_73 = arith.constant 5.000000e-01 : f32
    %144 = vector.broadcast %cst_73 : f32 to vector<16x32xf32>
    %145 = arith.mulf %144, %143 : vector<16x32xf32>
    %146 = arith.mulf %143, %143 : vector<16x32xf32>
    %147 = arith.mulf %143, %146 : vector<16x32xf32>
    %cst_74 = arith.constant 4.471500e-02 : f32
    %148 = vector.broadcast %cst_74 : f32 to vector<16x32xf32>
    %149 = arith.mulf %148, %147 : vector<16x32xf32>
    %150 = arith.addf %143, %149 : vector<16x32xf32>
    %cst_75 = arith.constant 0.797884583 : f32
    %151 = vector.broadcast %cst_75 : f32 to vector<16x32xf32>
    %152 = arith.mulf %151, %150 : vector<16x32xf32>
    %153 = math.tanh %152 : vector<16x32xf32>
    %cst_76 = arith.constant 1.000000e+00 : f32
    %154 = vector.broadcast %cst_76 : f32 to vector<16x32xf32>
    %155 = arith.addf %154, %153 : vector<16x32xf32>
    %156 = arith.mulf %145, %155 : vector<16x32xf32>
    %c1240 = arith.constant 1240 : index
    %c0_77 = arith.constant 0 : index
    %157 = vector.load %arg1[%c1240, %c0_77] : memref<1720x128xf32, #tpu.memory_space<vmem>>, vector<32x32xf32>
    %cst_78 = arith.constant dense<0.000000e+00> : vector<16x32xf32>
    %158 = tpu.matmul %156, %157, %cst_78 {dimension_numbers = #tpu.dot_dimension_numbers<[1], [0], [0], [1], [0, 0, 1, 1], [], []>} : vector<16x32xf32>, vector<32x32xf32>, vector<16x32xf32> -> vector<16x32xf32>
    %c1176 = arith.constant 1176 : index
    %c0_79 = arith.constant 0 : index
    %159 = vector.load %arg1[%c1176, %c0_79] : memref<1720x128xf32, #tpu.memory_space<vmem>>, vector<32x32xf32>
    %cst_80 = arith.constant dense<0.000000e+00> : vector<16x32xf32>
    %160 = tpu.matmul %48, %159, %cst_80 {dimension_numbers = #tpu.dot_dimension_numbers<[1], [0], [0], [1], [0, 0, 1, 1], [], []>} : vector<16x32xf32>, vector<32x32xf32>, vector<16x32xf32> -> vector<16x32xf32>
    %161 = arith.addf %158, %160 : vector<16x32xf32>
    %cst_81 = arith.constant dense<0.000000e+00> : vector<40x32xf32>
    %162 = tpu.matmul %3, %161, %cst_81 {dimension_numbers = #tpu.dot_dimension_numbers<[1], [0], [0], [1], [0, 0, 1, 1], [], []>} : vector<40x16xf32>, vector<16x32xf32>, vector<40x32xf32> -> vector<40x32xf32>
    %c1112 = arith.constant 1112 : index
    %c0_82 = arith.constant 0 : index
    %163 = vector.load %arg1[%c1112, %c0_82] : memref<1720x128xf32, #tpu.memory_space<vmem>>, vector<32x32xf32>
    %cst_83 = arith.constant dense<0.000000e+00> : vector<40x32xf32>
    %164 = tpu.matmul %61, %163, %cst_83 {dimension_numbers = #tpu.dot_dimension_numbers<[1], [0], [0], [1], [0, 0, 1, 1], [], []>} : vector<40x32xf32>, vector<32x32xf32>, vector<40x32xf32> -> vector<40x32xf32>
    %165 = arith.addf %162, %164 : vector<40x32xf32>
    %c440 = arith.constant 440 : index
    %c0_84 = arith.constant 0 : index
    %166 = vector.load %arg1[%c440, %c0_84] : memref<1720x128xf32, #tpu.memory_space<vmem>>, vector<1x32xf32>
    %167 = vector.broadcast %166 : vector<1x32xf32> to vector<40x32xf32>
    %168 = arith.addf %165, %167 : vector<40x32xf32>
    %c1560 = arith.constant 1560 : index
    %c0_85 = arith.constant 0 : index
    %169 = vector.load %arg1[%c1560, %c0_85] : memref<1720x128xf32, #tpu.memory_space<vmem>>, vector<32x32xf32>
    %cst_86 = arith.constant dense<0.000000e+00> : vector<16x32xf32>
    %170 = tpu.matmul %156, %169, %cst_86 {dimension_numbers = #tpu.dot_dimension_numbers<[1], [0], [0], [1], [0, 0, 1, 1], [], []>} : vector<16x32xf32>, vector<32x32xf32>, vector<16x32xf32> -> vector<16x32xf32>
    %c1496 = arith.constant 1496 : index
    %c0_87 = arith.constant 0 : index
    %171 = vector.load %arg1[%c1496, %c0_87] : memref<1720x128xf32, #tpu.memory_space<vmem>>, vector<32x32xf32>
    %cst_88 = arith.constant dense<0.000000e+00> : vector<16x32xf32>
    %172 = tpu.matmul %48, %171, %cst_88 {dimension_numbers = #tpu.dot_dimension_numbers<[1], [0], [0], [1], [0, 0, 1, 1], [], []>} : vector<16x32xf32>, vector<32x32xf32>, vector<16x32xf32> -> vector<16x32xf32>
    %173 = arith.addf %170, %172 : vector<16x32xf32>
    %cst_89 = arith.constant dense<0.000000e+00> : vector<40x32xf32>
    %174 = tpu.matmul %1, %173, %cst_89 {dimension_numbers = #tpu.dot_dimension_numbers<[1], [0], [0], [1], [0, 0, 1, 1], [], []>} : vector<40x16xf32>, vector<16x32xf32>, vector<40x32xf32> -> vector<40x32xf32>
    %c1432 = arith.constant 1432 : index
    %c0_90 = arith.constant 0 : index
    %175 = vector.load %arg1[%c1432, %c0_90] : memref<1720x128xf32, #tpu.memory_space<vmem>>, vector<32x32xf32>
    %cst_91 = arith.constant dense<0.000000e+00> : vector<40x32xf32>
    %176 = tpu.matmul %61, %175, %cst_91 {dimension_numbers = #tpu.dot_dimension_numbers<[1], [0], [0], [1], [0, 0, 1, 1], [], []>} : vector<40x32xf32>, vector<32x32xf32>, vector<40x32xf32> -> vector<40x32xf32>
    %177 = arith.addf %174, %176 : vector<40x32xf32>
    %c456 = arith.constant 456 : index
    %c0_92 = arith.constant 0 : index
    %178 = vector.load %arg1[%c456, %c0_92] : memref<1720x128xf32, #tpu.memory_space<vmem>>, vector<1x32xf32>
    %179 = vector.broadcast %178 : vector<1x32xf32> to vector<40x32xf32>
    %180 = arith.addf %177, %179 : vector<40x32xf32>
    %c1688 = arith.constant 1688 : index
    %c0_93 = arith.constant 0 : index
    %181 = vector.load %arg1[%c1688, %c0_93] : memref<1720x128xf32, #tpu.memory_space<vmem>>, vector<32x32xf32>
    %cst_94 = arith.constant dense<0.000000e+00> : vector<16x32xf32>
    %182 = tpu.matmul %156, %181, %cst_94 {dimension_numbers = #tpu.dot_dimension_numbers<[1], [0], [0], [1], [0, 0, 1, 1], [], []>} : vector<16x32xf32>, vector<32x32xf32>, vector<16x32xf32> -> vector<16x32xf32>
    %c1624 = arith.constant 1624 : index
    %c0_95 = arith.constant 0 : index
    %183 = vector.load %arg1[%c1624, %c0_95] : memref<1720x128xf32, #tpu.memory_space<vmem>>, vector<32x32xf32>
    %cst_96 = arith.constant dense<0.000000e+00> : vector<16x32xf32>
    %184 = tpu.matmul %48, %183, %cst_96 {dimension_numbers = #tpu.dot_dimension_numbers<[1], [0], [0], [1], [0, 0, 1, 1], [], []>} : vector<16x32xf32>, vector<32x32xf32>, vector<16x32xf32> -> vector<16x32xf32>
    %185 = arith.addf %182, %184 : vector<16x32xf32>
    %cst_97 = arith.constant dense<0.000000e+00> : vector<40x32xf32>
    %186 = tpu.matmul %1, %185, %cst_97 {dimension_numbers = #tpu.dot_dimension_numbers<[1], [0], [0], [1], [0, 0, 1, 1], [], []>} : vector<40x16xf32>, vector<16x32xf32>, vector<40x32xf32> -> vector<40x32xf32>
    %c504 = arith.constant 504 : index
    %c0_98 = arith.constant 0 : index
    %187 = vector.load %arg1[%c504, %c0_98] : memref<1720x128xf32, #tpu.memory_space<vmem>>, vector<1x32xf32>
    %188 = vector.broadcast %187 : vector<1x32xf32> to vector<40x32xf32>
    %189 = arith.addf %186, %188 : vector<40x32xf32>
    %cst_99 = arith.constant 0.353553385 : f32
    %190 = vector.broadcast %cst_99 : f32 to vector<40x32xf32>
    %191 = arith.mulf %189, %190 : vector<40x32xf32>
    %192 = arith.mulf %191, %168 : vector<40x32xf32>
    %cst_100 = arith.constant dense<0.000000e+00> : vector<40x4xf32>
    %193 = tpu.matmul %192, %5, %cst_100 {dimension_numbers = #tpu.dot_dimension_numbers<[1], [0], [0], [1], [0, 0, 1, 1], [], []>} : vector<40x32xf32>, vector<32x4xf32>, vector<40x4xf32> -> vector<40x4xf32>
    %194 = vector.extract_strided_slice %193 {offsets = [0, 0], sizes = [40, 1], strides = [1, 1]} : vector<40x4xf32> to vector<40x1xf32>
    %195 = vector.broadcast %194 : vector<40x1xf32> to vector<40x16xf32>
    %196 = arith.addf %195, %7 : vector<40x16xf32>
    %cst_101 = arith.constant dense<0xFF800000> : vector<16xf32>
    %197 = vector.multi_reduction <maximumf>, %196, %cst_101 [0] : vector<40x16xf32> to vector<16xf32>
    %198 = vector.shape_cast %197 : vector<16xf32> to vector<1x16xf32>
    %199 = vector.extract_strided_slice %193 {offsets = [0, 1], sizes = [40, 1], strides = [1, 1]} : vector<40x4xf32> to vector<40x1xf32>
    %200 = vector.broadcast %199 : vector<40x1xf32> to vector<40x16xf32>
    %201 = arith.addf %200, %7 : vector<40x16xf32>
    %cst_102 = arith.constant dense<0xFF800000> : vector<16xf32>
    %202 = vector.multi_reduction <maximumf>, %201, %cst_102 [0] : vector<40x16xf32> to vector<16xf32>
    %203 = vector.shape_cast %202 : vector<16xf32> to vector<1x16xf32>
    %204 = vector.extract_strided_slice %193 {offsets = [0, 2], sizes = [40, 1], strides = [1, 1]} : vector<40x4xf32> to vector<40x1xf32>
    %205 = vector.broadcast %204 : vector<40x1xf32> to vector<40x16xf32>
    %206 = arith.addf %205, %7 : vector<40x16xf32>
    %cst_103 = arith.constant dense<0xFF800000> : vector<16xf32>
    %207 = vector.multi_reduction <maximumf>, %206, %cst_103 [0] : vector<40x16xf32> to vector<16xf32>
    %208 = vector.shape_cast %207 : vector<16xf32> to vector<1x16xf32>
    %209 = vector.extract_strided_slice %193 {offsets = [0, 3], sizes = [40, 1], strides = [1, 1]} : vector<40x4xf32> to vector<40x1xf32>
    %210 = vector.broadcast %209 : vector<40x1xf32> to vector<40x16xf32>
    %211 = arith.addf %210, %7 : vector<40x16xf32>
    %cst_104 = arith.constant dense<0xFF800000> : vector<16xf32>
    %212 = vector.multi_reduction <maximumf>, %211, %cst_104 [0] : vector<40x16xf32> to vector<16xf32>
    %213 = vector.shape_cast %212 : vector<16xf32> to vector<1x16xf32>
    %214 = tpu.concatenate %198, %203, %208, %213 in 0 : vector<1x16xf32>, vector<1x16xf32>, vector<1x16xf32>, vector<1x16xf32> -> vector<4x16xf32>
    %cst_105 = arith.constant dense<0.000000e+00> : vector<40x4xf32>
    %215 = tpu.matmul %1, %214, %cst_105 {dimension_numbers = #tpu.dot_dimension_numbers<[1], [1], [0], [0], [0, 0, 1, 0], [], []>} : vector<40x16xf32>, vector<4x16xf32>, vector<40x4xf32> -> vector<40x4xf32>
    %216 = arith.subf %193, %215 : vector<40x4xf32>
    %217 = math.exp %216 : vector<40x4xf32>
    %cst_106 = arith.constant dense<0.000000e+00> : vector<16x4xf32>
    %218 = tpu.matmul %2, %217, %cst_106 {dimension_numbers = #tpu.dot_dimension_numbers<[1], [0], [0], [1], [0, 0, 1, 1], [], []>} : vector<16x40xf32>, vector<40x4xf32>, vector<16x4xf32> -> vector<16x4xf32>
    %cst_107 = arith.constant dense<0.000000e+00> : vector<40x4xf32>
    %219 = tpu.matmul %1, %218, %cst_107 {dimension_numbers = #tpu.dot_dimension_numbers<[1], [0], [0], [1], [0, 0, 1, 1], [], []>} : vector<40x16xf32>, vector<16x4xf32>, vector<40x4xf32> -> vector<40x4xf32>
    %220 = tpu.reciprocal %219 {approx = true} : vector<40x4xf32> -> vector<40x4xf32>
    %221 = arith.mulf %217, %220 : vector<40x4xf32>
    %cst_108 = arith.constant dense<0.000000e+00> : vector<40x32xf32>
    %222 = tpu.matmul %221, %5, %cst_108 {dimension_numbers = #tpu.dot_dimension_numbers<[1], [1], [0], [0], [0, 0, 1, 0], [], []>} : vector<40x4xf32>, vector<32x4xf32>, vector<40x32xf32> -> vector<40x32xf32>
    %223 = vector.broadcast %6 : vector<40x1xf32> to vector<40x32xf32>
    %224 = arith.mulf %222, %223 : vector<40x32xf32>
    %225 = arith.mulf %180, %224 : vector<40x32xf32>
    %cst_109 = arith.constant dense<0.000000e+00> : vector<16x32xf32>
    %226 = tpu.matmul %4, %225, %cst_109 {dimension_numbers = #tpu.dot_dimension_numbers<[1], [0], [0], [1], [0, 0, 1, 1], [], []>} : vector<16x40xf32>, vector<40x32xf32>, vector<16x32xf32> -> vector<16x32xf32>
    %c1304 = arith.constant 1304 : index
    %c0_110 = arith.constant 0 : index
    %227 = vector.load %arg1[%c1304, %c0_110] : memref<1720x128xf32, #tpu.memory_space<vmem>>, vector<32x32xf32>
    %cst_111 = arith.constant dense<0.000000e+00> : vector<16x32xf32>
    %228 = tpu.matmul %226, %227, %cst_111 {dimension_numbers = #tpu.dot_dimension_numbers<[1], [0], [0], [1], [0, 0, 1, 1], [], []>} : vector<16x32xf32>, vector<32x32xf32>, vector<16x32xf32> -> vector<16x32xf32>
    %c472 = arith.constant 472 : index
    %c0_112 = arith.constant 0 : index
    %229 = vector.load %arg1[%c472, %c0_112] : memref<1720x128xf32, #tpu.memory_space<vmem>>, vector<1x32xf32>
    %230 = vector.broadcast %229 : vector<1x32xf32> to vector<16x32xf32>
    %231 = arith.addf %228, %230 : vector<16x32xf32>
    %cst_113 = arith.constant 0.000000e+00 : f32
    %232 = vector.broadcast %cst_113 : f32 to vector<16x32xf32>
    %233 = arith.maximumf %231, %232 : vector<16x32xf32>
    %c1368 = arith.constant 1368 : index
    %c0_114 = arith.constant 0 : index
    %234 = vector.load %arg1[%c1368, %c0_114] : memref<1720x128xf32, #tpu.memory_space<vmem>>, vector<32x32xf32>
    %cst_115 = arith.constant dense<0.000000e+00> : vector<16x32xf32>
    %235 = tpu.matmul %233, %234, %cst_115 {dimension_numbers = #tpu.dot_dimension_numbers<[1], [0], [0], [1], [0, 0, 1, 1], [], []>} : vector<16x32xf32>, vector<32x32xf32>, vector<16x32xf32> -> vector<16x32xf32>
    %c488 = arith.constant 488 : index
    %c0_116 = arith.constant 0 : index
    %236 = vector.load %arg1[%c488, %c0_116] : memref<1720x128xf32, #tpu.memory_space<vmem>>, vector<1x32xf32>
    %237 = vector.broadcast %236 : vector<1x32xf32> to vector<16x32xf32>
    %238 = arith.addf %235, %237 : vector<16x32xf32>
    %cst_117 = arith.constant 5.000000e-01 : f32
    %239 = vector.broadcast %cst_117 : f32 to vector<16x32xf32>
    %240 = arith.mulf %239, %238 : vector<16x32xf32>
    %241 = arith.mulf %238, %238 : vector<16x32xf32>
    %242 = arith.mulf %238, %241 : vector<16x32xf32>
    %cst_118 = arith.constant 4.471500e-02 : f32
    %243 = vector.broadcast %cst_118 : f32 to vector<16x32xf32>
    %244 = arith.mulf %243, %242 : vector<16x32xf32>
    %245 = arith.addf %238, %244 : vector<16x32xf32>
    %cst_119 = arith.constant 0.797884583 : f32
    %246 = vector.broadcast %cst_119 : f32 to vector<16x32xf32>
    %247 = arith.mulf %246, %245 : vector<16x32xf32>
    %248 = math.tanh %247 : vector<16x32xf32>
    %cst_120 = arith.constant 1.000000e+00 : f32
    %249 = vector.broadcast %cst_120 : f32 to vector<16x32xf32>
    %250 = arith.addf %249, %248 : vector<16x32xf32>
    %251 = arith.mulf %240, %250 : vector<16x32xf32>
    %c984 = arith.constant 984 : index
    %c0_121 = arith.constant 0 : index
    %252 = vector.load %arg1[%c984, %c0_121] : memref<1720x128xf32, #tpu.memory_space<vmem>>, vector<32x32xf32>
    %cst_122 = arith.constant dense<0.000000e+00> : vector<16x32xf32>
    %253 = tpu.matmul %29, %252, %cst_122 {dimension_numbers = #tpu.dot_dimension_numbers<[1], [0], [0], [1], [0, 0, 1, 1], [], []>} : vector<16x32xf32>, vector<32x32xf32>, vector<16x32xf32> -> vector<16x32xf32>
    %c1048 = arith.constant 1048 : index
    %c0_123 = arith.constant 0 : index
    %254 = vector.load %arg1[%c1048, %c0_123] : memref<1720x128xf32, #tpu.memory_space<vmem>>, vector<32x32xf32>
    %cst_124 = arith.constant dense<0.000000e+00> : vector<16x32xf32>
    %255 = tpu.matmul %251, %254, %cst_124 {dimension_numbers = #tpu.dot_dimension_numbers<[1], [0], [0], [1], [0, 0, 1, 1], [], []>} : vector<16x32xf32>, vector<32x32xf32>, vector<16x32xf32> -> vector<16x32xf32>
    %256 = arith.addf %253, %255 : vector<16x32xf32>
    %c416 = arith.constant 416 : index
    %c0_125 = arith.constant 0 : index
    %257 = vector.load %arg1[%c416, %c0_125] : memref<1720x128xf32, #tpu.memory_space<vmem>>, vector<1x32xf32>
    %258 = vector.broadcast %257 : vector<1x32xf32> to vector<16x32xf32>
    %259 = arith.addf %256, %258 : vector<16x32xf32>
    %cst_126 = arith.constant 5.000000e-01 : f32
    %260 = vector.broadcast %cst_126 : f32 to vector<16x32xf32>
    %261 = arith.mulf %260, %259 : vector<16x32xf32>
    %262 = arith.mulf %259, %259 : vector<16x32xf32>
    %263 = arith.mulf %259, %262 : vector<16x32xf32>
    %cst_127 = arith.constant 4.471500e-02 : f32
    %264 = vector.broadcast %cst_127 : f32 to vector<16x32xf32>
    %265 = arith.mulf %264, %263 : vector<16x32xf32>
    %266 = arith.addf %259, %265 : vector<16x32xf32>
    %cst_128 = arith.constant 0.797884583 : f32
    %267 = vector.broadcast %cst_128 : f32 to vector<16x32xf32>
    %268 = arith.mulf %267, %266 : vector<16x32xf32>
    %269 = math.tanh %268 : vector<16x32xf32>
    %cst_129 = arith.constant 1.000000e+00 : f32
    %270 = vector.broadcast %cst_129 : f32 to vector<16x32xf32>
    %271 = arith.addf %270, %269 : vector<16x32xf32>
    %272 = arith.mulf %261, %271 : vector<16x32xf32>
    %c48 = arith.constant 48 : index
    %c0_130 = arith.constant 0 : index
    %273 = vector.load %arg1[%c48, %c0_130] : memref<1720x128xf32, #tpu.memory_space<vmem>>, vector<16x2xf32>
    %c64 = arith.constant 64 : index
    %c0_131 = arith.constant 0 : index
    %274 = vector.load %arg1[%c64, %c0_131] : memref<1720x128xf32, #tpu.memory_space<vmem>>, vector<2x16xf32>
    %c544 = arith.constant 544 : index
    %c0_132 = arith.constant 0 : index
    %275 = vector.load %arg1[%c544, %c0_132] : memref<1720x128xf32, #tpu.memory_space<vmem>>, vector<32x2xf32>
    %c856 = arith.constant 856 : index
    %c0_133 = arith.constant 0 : index
    %276 = vector.load %arg1[%c856, %c0_133] : memref<1720x128xf32, #tpu.memory_space<vmem>>, vector<64x32xf32>
    %cst_134 = arith.constant dense<0.000000e+00> : vector<2x32xf32>
    %277 = tpu.matmul %0, %276, %cst_134 {dimension_numbers = #tpu.dot_dimension_numbers<[1], [0], [0], [1], [0, 0, 1, 1], [], []>} : vector<2x64xf32>, vector<64x32xf32>, vector<2x32xf32> -> vector<2x32xf32>
    %c400 = arith.constant 400 : index
    %c0_135 = arith.constant 0 : index
    %278 = vector.load %arg1[%c400, %c0_135] : memref<1720x128xf32, #tpu.memory_space<vmem>>, vector<1x32xf32>
    %279 = vector.broadcast %278 : vector<1x32xf32> to vector<2x32xf32>
    %280 = arith.addf %277, %279 : vector<2x32xf32>
    %c824 = arith.constant 824 : index
    %c0_136 = arith.constant 0 : index
    %281 = vector.load %arg1[%c824, %c0_136] : memref<1720x128xf32, #tpu.memory_space<vmem>>, vector<32x32xf32>
    %cst_137 = arith.constant dense<0.000000e+00> : vector<16x32xf32>
    %282 = tpu.matmul %272, %281, %cst_137 {dimension_numbers = #tpu.dot_dimension_numbers<[1], [0], [0], [1], [0, 0, 1, 1], [], []>} : vector<16x32xf32>, vector<32x32xf32>, vector<16x32xf32> -> vector<16x32xf32>
    %c392 = arith.constant 392 : index
    %c0_138 = arith.constant 0 : index
    %283 = vector.load %arg1[%c392, %c0_138] : memref<1720x128xf32, #tpu.memory_space<vmem>>, vector<1x32xf32>
    %284 = vector.broadcast %283 : vector<1x32xf32> to vector<16x32xf32>
    %285 = arith.addf %282, %284 : vector<16x32xf32>
    %c1016 = arith.constant 1016 : index
    %c0_139 = arith.constant 0 : index
    %286 = vector.load %arg1[%c1016, %c0_139] : memref<1720x128xf32, #tpu.memory_space<vmem>>, vector<32x32xf32>
    %cst_140 = arith.constant dense<0.000000e+00> : vector<16x32xf32>
    %287 = tpu.matmul %272, %286, %cst_140 {dimension_numbers = #tpu.dot_dimension_numbers<[1], [0], [0], [1], [0, 0, 1, 1], [], []>} : vector<16x32xf32>, vector<32x32xf32>, vector<16x32xf32> -> vector<16x32xf32>
    %c424 = arith.constant 424 : index
    %c0_141 = arith.constant 0 : index
    %288 = vector.load %arg1[%c424, %c0_141] : memref<1720x128xf32, #tpu.memory_space<vmem>>, vector<1x32xf32>
    %289 = vector.broadcast %288 : vector<1x32xf32> to vector<16x32xf32>
    %290 = arith.addf %287, %289 : vector<16x32xf32>
    %cst_142 = arith.constant dense<0.000000e+00> : vector<16x32xf32>
    %291 = tpu.matmul %273, %280, %cst_142 {dimension_numbers = #tpu.dot_dimension_numbers<[1], [0], [0], [1], [0, 0, 1, 1], [], []>} : vector<16x2xf32>, vector<2x32xf32>, vector<16x32xf32> -> vector<16x32xf32>
    %292 = arith.mulf %291, %285 : vector<16x32xf32>
    %cst_143 = arith.constant dense<0.000000e+00> : vector<16x2xf32>
    %293 = tpu.matmul %292, %275, %cst_143 {dimension_numbers = #tpu.dot_dimension_numbers<[1], [0], [0], [1], [0, 0, 1, 1], [], []>} : vector<16x32xf32>, vector<32x2xf32>, vector<16x2xf32> -> vector<16x2xf32>
    %cst_144 = arith.constant 2.500000e-01 : f32
    %294 = vector.broadcast %cst_144 : f32 to vector<16x2xf32>
    %295 = arith.mulf %293, %294 : vector<16x2xf32>
    %c240 = arith.constant 240 : index
    %c0_145 = arith.constant 0 : index
    %296 = vector.load %arg1[%c240, %c0_145] : memref<1720x128xf32, #tpu.memory_space<vmem>>, vector<16x1xf32>
    %cst_146 = arith.constant 0.000000e+00 : f32
    %297 = vector.broadcast %cst_146 : f32 to vector<16x1xf32>
    %298 = arith.cmpf ogt, %296, %297 : vector<16x1xf32>
    %cst_147 = arith.constant -1.000000e+30 : f32
    %299 = vector.shape_cast %298 : vector<16x1xi1> to vector<16x1xi1>
    %300 = vector.broadcast %299 : vector<16x1xi1> to vector<16x2xi1>
    %301 = vector.broadcast %cst_147 : f32 to vector<16x2xf32>
    %302 = arith.select %300, %301, %295 : vector<16x2xi1>, vector<16x2xf32>
    %c336 = arith.constant 336 : index
    %c0_148 = arith.constant 0 : index
    %303 = vector.load %arg1[%c336, %c0_148] : memref<1720x128xf32, #tpu.memory_space<vmem>>, vector<16x2xf32>
    %304 = vector.extract_strided_slice %302 {offsets = [0, 0], sizes = [16, 1], strides = [1, 1]} : vector<16x2xf32> to vector<16x1xf32>
    %305 = vector.broadcast %304 : vector<16x1xf32> to vector<16x2xf32>
    %306 = arith.addf %305, %303 : vector<16x2xf32>
    %cst_149 = arith.constant dense<0xFF800000> : vector<2xf32>
    %307 = vector.multi_reduction <maximumf>, %306, %cst_149 [0] : vector<16x2xf32> to vector<2xf32>
    %308 = vector.shape_cast %307 : vector<2xf32> to vector<1x2xf32>
    %309 = vector.extract_strided_slice %302 {offsets = [0, 1], sizes = [16, 1], strides = [1, 1]} : vector<16x2xf32> to vector<16x1xf32>
    %310 = vector.broadcast %309 : vector<16x1xf32> to vector<16x2xf32>
    %311 = arith.addf %310, %303 : vector<16x2xf32>
    %cst_150 = arith.constant dense<0xFF800000> : vector<2xf32>
    %312 = vector.multi_reduction <maximumf>, %311, %cst_150 [0] : vector<16x2xf32> to vector<2xf32>
    %313 = vector.shape_cast %312 : vector<2xf32> to vector<1x2xf32>
    %314 = tpu.concatenate %308, %313 in 0 : vector<1x2xf32>, vector<1x2xf32> -> vector<2x2xf32>
    %cst_151 = arith.constant dense<0.000000e+00> : vector<16x2xf32>
    %315 = tpu.matmul %273, %314, %cst_151 {dimension_numbers = #tpu.dot_dimension_numbers<[1], [1], [0], [0], [0, 0, 1, 0], [], []>} : vector<16x2xf32>, vector<2x2xf32>, vector<16x2xf32> -> vector<16x2xf32>
    %316 = arith.subf %302, %315 : vector<16x2xf32>
    %317 = math.exp %316 : vector<16x2xf32>
    %cst_152 = arith.constant dense<0.000000e+00> : vector<2x2xf32>
    %318 = tpu.matmul %274, %317, %cst_152 {dimension_numbers = #tpu.dot_dimension_numbers<[1], [0], [0], [1], [0, 0, 1, 1], [], []>} : vector<2x16xf32>, vector<16x2xf32>, vector<2x2xf32> -> vector<2x2xf32>
    %cst_153 = arith.constant dense<0.000000e+00> : vector<16x2xf32>
    %319 = tpu.matmul %273, %318, %cst_153 {dimension_numbers = #tpu.dot_dimension_numbers<[1], [0], [0], [1], [0, 0, 1, 1], [], []>} : vector<16x2xf32>, vector<2x2xf32>, vector<16x2xf32> -> vector<16x2xf32>
    %320 = tpu.reciprocal %319 {approx = true} : vector<16x2xf32> -> vector<16x2xf32>
    %321 = arith.mulf %317, %320 : vector<16x2xf32>
    %cst_154 = arith.constant dense<0.000000e+00> : vector<16x32xf32>
    %322 = tpu.matmul %321, %275, %cst_154 {dimension_numbers = #tpu.dot_dimension_numbers<[1], [1], [0], [0], [0, 0, 1, 0], [], []>} : vector<16x2xf32>, vector<32x2xf32>, vector<16x32xf32> -> vector<16x32xf32>
    %323 = arith.mulf %322, %290 : vector<16x32xf32>
    %cst_155 = arith.constant dense<0.000000e+00> : vector<2x32xf32>
    %324 = tpu.matmul %274, %323, %cst_155 {dimension_numbers = #tpu.dot_dimension_numbers<[1], [0], [0], [1], [0, 0, 1, 1], [], []>} : vector<2x16xf32>, vector<16x32xf32>, vector<2x32xf32> -> vector<2x32xf32>
    %c40 = arith.constant 40 : index
    %c0_156 = arith.constant 0 : index
    %325 = vector.load %arg1[%c40, %c0_156] : memref<1720x128xf32, #tpu.memory_space<vmem>>, vector<2x16xf32>
    %cst_157 = arith.constant dense<0.000000e+00> : vector<2x32xf32>
    %326 = tpu.matmul %325, %272, %cst_157 {dimension_numbers = #tpu.dot_dimension_numbers<[1], [0], [0], [1], [0, 0, 1, 1], [], []>} : vector<2x16xf32>, vector<16x32xf32>, vector<2x32xf32> -> vector<2x32xf32>
    %c664 = arith.constant 664 : index
    %c0_158 = arith.constant 0 : index
    %327 = vector.load %arg1[%c664, %c0_158] : memref<1720x128xf32, #tpu.memory_space<vmem>>, vector<32x32xf32>
    %cst_159 = arith.constant dense<0.000000e+00> : vector<2x32xf32>
    %328 = tpu.matmul %324, %327, %cst_159 {dimension_numbers = #tpu.dot_dimension_numbers<[1], [0], [0], [1], [0, 0, 1, 1], [], []>} : vector<2x32xf32>, vector<32x32xf32>, vector<2x32xf32> -> vector<2x32xf32>
    %c696 = arith.constant 696 : index
    %c0_160 = arith.constant 0 : index
    %329 = vector.load %arg1[%c696, %c0_160] : memref<1720x128xf32, #tpu.memory_space<vmem>>, vector<64x32xf32>
    %cst_161 = arith.constant dense<0.000000e+00> : vector<2x32xf32>
    %330 = tpu.matmul %0, %329, %cst_161 {dimension_numbers = #tpu.dot_dimension_numbers<[1], [0], [0], [1], [0, 0, 1, 1], [], []>} : vector<2x64xf32>, vector<64x32xf32>, vector<2x32xf32> -> vector<2x32xf32>
    %331 = arith.addf %328, %330 : vector<2x32xf32>
    %c760 = arith.constant 760 : index
    %c0_162 = arith.constant 0 : index
    %332 = vector.load %arg1[%c760, %c0_162] : memref<1720x128xf32, #tpu.memory_space<vmem>>, vector<32x32xf32>
    %cst_163 = arith.constant dense<0.000000e+00> : vector<2x32xf32>
    %333 = tpu.matmul %326, %332, %cst_163 {dimension_numbers = #tpu.dot_dimension_numbers<[1], [0], [0], [1], [0, 0, 1, 1], [], []>} : vector<2x32xf32>, vector<32x32xf32>, vector<2x32xf32> -> vector<2x32xf32>
    %334 = arith.addf %331, %333 : vector<2x32xf32>
    %c376 = arith.constant 376 : index
    %c0_164 = arith.constant 0 : index
    %335 = vector.load %arg1[%c376, %c0_164] : memref<1720x128xf32, #tpu.memory_space<vmem>>, vector<1x32xf32>
    %336 = vector.broadcast %335 : vector<1x32xf32> to vector<2x32xf32>
    %337 = arith.addf %334, %336 : vector<2x32xf32>
    %cst_165 = arith.constant dense<0.000000e+00> : vector<2xf32>
    %338 = vector.multi_reduction <add>, %337, %cst_165 [1] : vector<2x32xf32> to vector<2xf32>
    %339 = vector.shape_cast %338 : vector<2xf32> to vector<2x1xf32>
    %cst_166 = arith.constant 3.200000e+01 : f32
    %340 = vector.broadcast %cst_166 : f32 to vector<2x1xf32>
    %341 = arith.divf %339, %340 : vector<2x1xf32>
    %342 = vector.broadcast %341 : vector<2x1xf32> to vector<2x32xf32>
    %343 = arith.subf %337, %342 : vector<2x32xf32>
    %344 = arith.mulf %343, %343 : vector<2x32xf32>
    %cst_167 = arith.constant dense<0.000000e+00> : vector<2xf32>
    %345 = vector.multi_reduction <add>, %344, %cst_167 [1] : vector<2x32xf32> to vector<2xf32>
    %346 = vector.shape_cast %345 : vector<2xf32> to vector<2x1xf32>
    %cst_168 = arith.constant 3.200000e+01 : f32
    %347 = vector.broadcast %cst_168 : f32 to vector<2x1xf32>
    %348 = arith.divf %346, %347 : vector<2x1xf32>
    %349 = vector.broadcast %341 : vector<2x1xf32> to vector<2x32xf32>
    %350 = arith.subf %337, %349 : vector<2x32xf32>
    %cst_169 = arith.constant 9.99999974E-6 : f32
    %351 = vector.broadcast %cst_169 : f32 to vector<2x1xf32>
    %352 = arith.addf %348, %351 : vector<2x1xf32>
    %353 = math.rsqrt %352 : vector<2x1xf32>
    %354 = vector.broadcast %353 : vector<2x1xf32> to vector<2x32xf32>
    %355 = arith.mulf %350, %354 : vector<2x32xf32>
    %c584 = arith.constant 584 : index
    %c0_170 = arith.constant 0 : index
    %356 = vector.load %arg1[%c584, %c0_170] : memref<1720x128xf32, #tpu.memory_space<vmem>>, vector<1x32xf32>
    %357 = vector.broadcast %356 : vector<1x32xf32> to vector<2x32xf32>
    %358 = arith.mulf %355, %357 : vector<2x32xf32>
    %c576 = arith.constant 576 : index
    %c0_171 = arith.constant 0 : index
    %359 = vector.load %arg1[%c576, %c0_171] : memref<1720x128xf32, #tpu.memory_space<vmem>>, vector<1x32xf32>
    %360 = vector.broadcast %359 : vector<1x32xf32> to vector<2x32xf32>
    %361 = arith.addf %358, %360 : vector<2x32xf32>
    %cst_172 = arith.constant 5.000000e-01 : f32
    %362 = vector.broadcast %cst_172 : f32 to vector<2x32xf32>
    %363 = arith.mulf %362, %361 : vector<2x32xf32>
    %364 = arith.mulf %361, %361 : vector<2x32xf32>
    %365 = arith.mulf %361, %364 : vector<2x32xf32>
    %cst_173 = arith.constant 4.471500e-02 : f32
    %366 = vector.broadcast %cst_173 : f32 to vector<2x32xf32>
    %367 = arith.mulf %366, %365 : vector<2x32xf32>
    %368 = arith.addf %361, %367 : vector<2x32xf32>
    %cst_174 = arith.constant 0.797884583 : f32
    %369 = vector.broadcast %cst_174 : f32 to vector<2x32xf32>
    %370 = arith.mulf %369, %368 : vector<2x32xf32>
    %371 = math.tanh %370 : vector<2x32xf32>
    %cst_175 = arith.constant 1.000000e+00 : f32
    %372 = vector.broadcast %cst_175 : f32 to vector<2x32xf32>
    %373 = arith.addf %372, %371 : vector<2x32xf32>
    %374 = arith.mulf %363, %373 : vector<2x32xf32>
    %c792 = arith.constant 792 : index
    %c0_176 = arith.constant 0 : index
    %375 = vector.load %arg1[%c792, %c0_176] : memref<1720x128xf32, #tpu.memory_space<vmem>>, vector<32x1xf32>
    %cst_177 = arith.constant dense<0.000000e+00> : vector<2x1xf32>
    %376 = tpu.matmul %374, %375, %cst_177 {dimension_numbers = #tpu.dot_dimension_numbers<[1], [0], [0], [1], [0, 0, 1, 1], [], []>} : vector<2x32xf32>, vector<32x1xf32>, vector<2x1xf32> -> vector<2x1xf32>
    %c384 = arith.constant 384 : index
    %c0_178 = arith.constant 0 : index
    %377 = vector.load %arg1[%c384, %c0_178] : memref<1720x128xf32, #tpu.memory_space<vmem>>, vector<1x1xf32>
    %378 = vector.broadcast %377 : vector<1x1xf32> to vector<2x1xf32>
    %379 = arith.addf %376, %378 : vector<2x1xf32>
    %cst_179 = arith.constant 0.000000e+00 : f32
    %380 = vector.broadcast %cst_179 : f32 to vector<2x1xf32>
    %381 = arith.subf %380, %379 : vector<2x1xf32>
    %382 = math.exp %381 : vector<2x1xf32>
    %cst_180 = arith.constant 1.000000e+00 : f32
    %383 = vector.broadcast %cst_180 : f32 to vector<2x1xf32>
    %384 = arith.addf %383, %382 : vector<2x1xf32>
    %385 = tpu.reciprocal %384 {approx = true} : vector<2x1xf32> -> vector<2x1xf32>
    %cst_181 = arith.constant 0.000000e+00 : f32
    %386 = vector.broadcast %cst_181 : f32 to vector<2x127xf32>
    %387 = tpu.concatenate %385, %386 in 1 : vector<2x1xf32>, vector<2x127xf32> -> vector<2x128xf32>
    %cst_182 = arith.constant 0.000000e+00 : f32
    %388 = vector.broadcast %cst_182 : f32 to vector<6x128xf32>
    %389 = tpu.concatenate %387, %388 in 0 : vector<2x128xf32>, vector<6x128xf32> -> vector<8x128xf32>
    %cst_183 = arith.constant 0.000000e+00 : f32
    %390 = vector.broadcast %cst_183 : f32 to vector<16x126xf32>
    %391 = tpu.concatenate %321, %390 in 1 : vector<16x2xf32>, vector<16x126xf32> -> vector<16x128xf32>
    %cst_184 = arith.constant 0.000000e+00 : f32
    %392 = vector.broadcast %cst_184 : f32 to vector<40x124xf32>
    %393 = tpu.concatenate %126, %392 in 1 : vector<40x4xf32>, vector<40x124xf32> -> vector<40x128xf32>
    %cst_185 = arith.constant 0.000000e+00 : f32
    %394 = vector.broadcast %cst_185 : f32 to vector<40x124xf32>
    %395 = tpu.concatenate %221, %394 in 1 : vector<40x4xf32>, vector<40x124xf32> -> vector<40x128xf32>
    %396 = tpu.concatenate %389, %391, %393, %395 in 0 : vector<8x128xf32>, vector<16x128xf32>, vector<40x128xf32>, vector<40x128xf32> -> vector<104x128xf32>
    %c0_186 = arith.constant 0 : index
    %c0_187 = arith.constant 0 : index
    %397 = vector.load %arg2[%c0_186, %c0_187] : memref<104x128xf32, #tpu.memory_space<vmem>>, vector<104x128xf32>
    tpu.vector_store %arg2[%c0_186, %c0_187], %396 {strides = array<i32>} : memref<104x128xf32, #tpu.memory_space<vmem>>, vector<104x128xf32>,
    return
  }
  func.func @transform_0(%arg0: i32) -> (i32, i32) {
    %c0_i32 = arith.constant 0 : i32
    %c0_i32_0 = arith.constant 0 : i32
    %c0_i32_1 = arith.constant 0 : i32
    return %c0_i32, %c0_i32_0 : i32, i32
  }
  func.func @transform_1(%arg0: i32) -> (i32, i32) {
    %c0_i32 = arith.constant 0 : i32
    %c0_i32_0 = arith.constant 0 : i32
    %c0_i32_1 = arith.constant 0 : i32
    return %c0_i32, %c0_i32_0 : i32, i32
  }
}

</mosaic_0001>

<bundles_post_ra>
// kernel: eq.1
= control target key start
LH: loop header
LB: loop body
LE: loop exit
PB: predicated region body
PF: predicated region fallthrough
CT: control target
= control target key end

     0   :  { %vm7_vm0 = vcmask 64512   ;;  %vm13_vm1 = vcmask 130112   ;;  %s39_s0 = inlined_call_operand.vmem [shape: s32[2,8], index: 0, kind: input, shape index: {}]   ;;  %s40_s1 = inlined_call_operand.vmem [shape: s32[16], index: 1, kind: output, shape index: {}]  }
   0x1   :  { %v4_v0 = vld [vmem:[%s39_s0] sm:$0x3]  ;;  %s22_s0 = smov 8  }
   0x2   :  { %5 = vst [vmem:[#allocation1] sm:$0x3] %v4_v0 }
   0x9   :  { %v10_v1 = vld [vmem:[#allocation1 + $0x1] sm:$0x1]   ;;  %v6_v2 = vld [vmem:[#allocation1] sm:$0x1]  }
   0xa   :  { %11 = vrot.lane.b32.xlu0 %v10_v1, %s22_s0  ;;  %8 = vst.msk [vmem:[#allocation0] sm:$0x1] %vm7_vm0, %v6_v2  }
  0x7c   :  { %v12_v3 = vpop.permute.xlu0 %11  }
  0x7d   :  { %14 = vst.msk [vmem:[#allocation0] sm:$0x1] %vm13_vm1, %v12_v3  }
  0x84   :  { %v17_v4 = vld [vmem:[#allocation0] sm:$0x1] }
  0x85   :  { %20 = vst [vmem:[%s40_s1] sm:$0x1] %v17_v4 }

// kernel: neg.1
= control target key start
LH: loop header
LB: loop body
LE: loop exit
PB: predicated region body
PF: predicated region fallthrough
CT: control target
= control target key end

     0   :  { %s40_s0 = inlined_call_operand.vmem [shape: f32[2,8,1], index: 0, kind: input, shape index: {}]   ;;  %s41_s1 = inlined_call_operand.vmem [shape: f32[2,8,1], index: 1, kind: output, shape index: {}]  }
   0x1   :  { %v2_v0 = vld [vmem:[%s40_s0] sm:$0x1]  ;;  %v16_v1 = vld [vmem:[%s40_s0 + $0x1] sm:$0x1] }
   0x2   :  { %v5_v2 = vxor.u32 2147483648, %v2_v0  ;;  %v12_v3 = vxor.u32 2147483648, %v16_v1 }
   0x4   :  { %7 = vst [vmem:[%s41_s1] sm:$0x1] %v5_v2 }
   0x5   :  { %17 = vst [vmem:[%s41_s1 + $0x1] sm:$0x1] %v12_v3 }

// kernel: qagnn_forward.1
= control target key start
LH: loop header
LB: loop body
LE: loop exit
PB: predicated region body
PF: predicated region fallthrough
CT: control target
= control target key end

     0   :  { %vm202_vm0 = vcmask 1045504   ;;  %vm186_vm1 = vcmask 113664   ;;  %vm132_vm2 = vcmask 1043456   ;;  %vm47_vm3 = vcmask 523264   ;;  %s4563_s0 = inlined_call_operand.vmem [shape: f32[1720,128], index: 0, kind: input, shape index: {}]   ;;  %s4564_s1 = inlined_call_operand.vmem [shape: f32[104,128], index: 1, kind: output, shape index: {}]  }
   0x1   :  { %v44_v0 = vld [vmem:[%s4563_s0 + $0x3d0] sm:$0xff]  ;;  %v43_v1 = vld [vmem:[%s4563_s0 + $0x3c8] sm:$0xff]  ;;  %v42_v2 = vld [vmem:[%s4563_s0 + $0x3c0] sm:$0xff]  ;;  %vm125_vm4 = vcmask 162816   ;;  %vm91_vm5 = vcmask 1041408   ;;  %vm84_vm6 = vcmask 15360  }
   0x2   :  { %59 = vmatpush.msra.mxu0 %v44_v0  ;;  %v183_v3 = vld [vmem:[%s4563_s0 + $0x258] sm:$0x3f]  ;;  %v182_v4 = vld [vmem:[%s4563_s0 + $0x250] sm:$0xff]  ;;  %v39_v8 = vld [vmem:[%s4563_s0 + $0x3a8] sm:$0xff]  ;;  %vm249_vm7 = vcmask 261120   ;;  %vm414_vm8 = vcmask 130048  }
   0x3   :  { %v41_v5 = vld [vmem:[%s4563_s0 + $0x3b8] sm:$0xff]  ;;  %2809 = vmatpush.msk.msra.mxu3 %vm202_vm0, %v183_v3  ;;  %v40_v7 = vld [vmem:[%s4563_s0 + $0x3b0] sm:$0xff]  ;;  %v121_v10 = vld [vmem:[%s4563_s0 + $0x288] sm:$0xff]  ;;  %vm923_vm9 = vcmask 1040384   ;;  %vm926_vm10 = vcmask 1042432   ;;  %vm978_vm11 = vcmask 326656  }
   0x4   :  { %60 = vmatpush.msra.mxu0 %v43_v1  ;;  %v177_v6 = vld [vmem:[%s4563_s0 + $0x58] sm:$0xff]  ;;  %v122_v9 = vld [vmem:[%s4563_s0 + $0x290] sm:$0xf]  ;;  %v38_v11 = vld [vmem:[%s4563_s0 + $0x3a0] sm:$0xff]  ;;  %vm1050_vm12 = vcmask 31744  }
   0x5   :  { %221 = vmatpush.msra.mxu3 %v182_v4  ;;  %2806 = vmatpush.msk.msra.mxu2 %vm132_vm2, %v122_v9  ;;  %v120_v12 = vld [vmem:[%s4563_s0 + $0x280] sm:$0xff]  ;;  %v118_v13 = vld [vmem:[%s4563_s0 + $0x48] sm:$0xff]  ;;  %v37_v14 = vld [vmem:[%s4563_s0 + $0x398] sm:$0xff] }
   0x6   :  { %61 = vmatpush.msra.mxu0 %v42_v2  ;;  %2810 = vmatmul.msk.f32.vlgmr.msra.gmra.mxu3 %vm186_vm1, %v177_v6  ;;  %v178_v15 = vld [vmem:[%s4563_s0 + $0x60] sm:$0xff]  ;;  %v119_v17 = vld [vmem:[%s4563_s0 + $0x50] sm:$0xff]  ;;  %v179_v18 = vld [vmem:[%s4563_s0 + $0x68] sm:$0xff] }
   0x7   :  { %150 = vmatpush.msra.mxu2 %v121_v10  ;;  %v8_v16 = vld [vmem:[%s4563_s0] sm:$0x3]  ;;  %v180_v19 = vld [vmem:[%s4563_s0 + $0x70] sm:$0xff]  ;;  %v181_v20 = vld [vmem:[%s4563_s0 + $0x78] sm:$0xff] }
   0x8   :  { %62 = vmatpush.msra.mxu0 %v41_v5  ;;  %v3037_v21 = vld [vmem:[%s4563_s0 + $0x198] ss:$0 sm:$0xff]  ;;  %v245_v36 = vld [vmem:[%s4563_s0 + $0x270] sm:$0xff]  ;;  %v244_v37 = vld [vmem:[%s4563_s0 + $0x268] sm:$0xff] }
   0x9   :  { %151 = vmatpush.msra.mxu2 %v120_v12  ;;  %v80_v33 = vld [vmem:[%s4563_s0 + $0x18] sm:$0xff]  ;;  %v3261_v38 = vld [vmem:[%s4563_s0 + $0x160] ss:$0 sm:$0xff]  ;;  %v3039_v45 = vld [vmem:[%s4563_s0 + $0x170] ss:$0 sm:$0xff] }
   0xa   :  { %63 = vmatpush.msra.mxu0 %v40_v7  ;;  %2807 = vmatmul.msk.f32.vlgmr.msra.gmra.mxu2 %vm125_vm4, %v118_v13  ;;  %v246_v35 = vld [vmem:[%s4563_s0 + $0x278] sm:$0xff]  ;;  %v243_v39 = vld [vmem:[%s4563_s0 + $0x260] sm:$0xff]  ;;  %v304_v47 = vld [vmem:[%s4563_s0 + $0x490] sm:$0xff] }
   0xb   :  { %v81_v40 = vld [vmem:[%s4563_s0 + $0x20] sm:$0xff]  ;;  %v476_v48 = vld [vmem:[%s4563_s0 + $0x5d0] sm:$0xff]  ;;  %323 = vmatpush.msrb.mxu2 %v304_v47  ;;  %v303_v50 = vld [vmem:[%s4563_s0 + $0x488] sm:$0xff] }
   0xc   :  { %64 = vmatpush.msra.mxu0 %v39_v8  ;;  %489 = vmatpush.msrb.mxu3 %v476_v48  ;;  %v475_v51 = vld [vmem:[%s4563_s0 + $0x5c8] sm:$0xff]  ;;  %v302_v53 = vld [vmem:[%s4563_s0 + $0x480] sm:$0xff]  ;;  %v300_v55 = vld [vmem:[%s4563_s0 + $0x4d0] sm:$0xff] }
   0xd   :  { %v474_v54 = vld [vmem:[%s4563_s0 + $0x5c0] sm:$0xff]  ;;  %324 = vmatpush.msrb.mxu2 %v303_v50  ;;  %v472_v56 = vld [vmem:[%s4563_s0 + $0x610] sm:$0xff]  ;;  %v299_v57 = vld [vmem:[%s4563_s0 + $0x4c8] sm:$0xff] }
   0xe   :  { %65 = vmatpush.msra.mxu0 %v38_v11  ;;  %2811 = vmatmul.msk.f32.gmra.mxu3 %vm186_vm1, %v178_v15  ;;  %v301_v60 = vld [vmem:[%s4563_s0 + $0x478] sm:$0xff]  ;;  %v471_v62 = vld [vmem:[%s4563_s0 + $0x608] sm:$0xff] }
   0xf   :  { %490 = vmatpush.msrb.mxu3 %v475_v51  ;;  %v473_v61 = vld [vmem:[%s4563_s0 + $0x5b8] sm:$0xff]  ;;  %325 = vmatpush.msrb.mxu2 %v302_v53 }
  0x10   :  { %66 = vmatpush.msra.mxu0 %v37_v14 }
  0x11   :  { %2802 = vmatmul.msk.f32.vlgmr.msra.gmra.mxu0 %vm47_vm3, %v8_v16  ;;  %491 = vmatpush.msrb.mxu3 %v474_v54 }
  0x12   :  { %2808 = vmatmul.msk.f32.gmra.mxu2 %vm125_vm4, %v119_v17  ;;  %352 = vmatpush.msrb.mxu0 %v300_v55  ;;  %v526_v55 = vld [vmem:[%s4563_s0 + $0x590] sm:$0xff] }
  0x13   :  { %326 = vmatpush.msrb.mxu2 %v301_v60  ;;  %492 = vmatpush.msrb.mxu3 %v473_v61 }
  0x14   :  { %353 = vmatpush.msrb.mxu0 %v299_v57  ;;  %v524_v57 = vld [vmem:[%s4563_s0 + $0x580] sm:$0xff] }
  0x15   :  { %539 = vmatpush.msra.mxu3 %v526_v55 }
  0x16   :  { %2812 = vmatmul.msk.f32.gmra.mxu3 %vm186_vm1, %v179_v18 }
  0x1e   :  { %2813 = vmatmul.msk.f32.gmra.mxu3 %vm186_vm1, %v180_v19 }
  0x26   :  { %2814 = vmatmul.msk.f32.gmra.mxu3 %vm186_vm1, %v181_v20  ;;  %vm2691_vm1 = vcmask 254976  }
  0x89   :  { %v223_v34 = vpop.f32.mrf.mxu3 }
  0x8a   :  { %v224_v42 = vadd.f32 %v3261_v38, %v223_v34  ;;  %v82_v34 = vld [vmem:[%s4563_s0 + $0x8] sm:$0xff] }
  0x8c   :  { %v238_v43 = vmax.f32 %v224_v42, 0.0 }
  0x8d   :  { %v153_v46 = vpop.f32.mrf.mxu2 }
  0x8e   :  { %v68_v22 = vpop.f32.mrf.mxu0  ;;  %v154_v52 = vadd.f32 %v3039_v45, %v153_v46  ;;  %v617_v46 = vld [vmem:[%s4563_s0 + $0x638] sm:$0xff] }
  0x8f   :  { %v69_v23 = vadd.f32 %v3037_v21, %v68_v22 }
  0x90   :  { %v161_v59 = vmul.f32 %v154_v52, %v154_v52  ;;  %v159_v13 = vmul.f32 0.5, %v154_v52 }
  0x91   :  { %v72_v24 = vmul.f32 %v69_v23, %v69_v23  ;;  %v71_v30 = vmul.f32 0.5, %v69_v23  ;;  %v226_v41 = vpop.f32.mrf.mxu3 }
  0x92   :  { %v227_v44 = vadd.f32 %v3261_v38, %v226_v41  ;;  %v163_v63 = vmul.f32 %v161_v59, %v154_v52 }
  0x93   :  { %v73_v25 = vmul.f32 %v72_v24, %v69_v23 }
  0x94   :  { %v239_v58 = vmax.f32 %v227_v44, 0.0  ;;  %v165_v1 = vmul.f32 0.044715, %v163_v63  ;;  %v619_v44 = vld [vmem:[%s4563_s0 + $0x648] sm:$0xff] }
  0x95   :  { %v74_v26 = vmul.f32 0.044715, %v73_v25  ;;  %v156_v2 = vpop.f32.mrf.mxu2 }
  0x96   :  { %v157_v3 = vadd.f32 %v3039_v45, %v156_v2  ;;  %v167_v4 = vadd.f32 %v165_v1, %v154_v52  ;;  %v618_v45 = vld [vmem:[%s4563_s0 + $0x640] sm:$0xff] }
  0x97   :  { %v75_v27 = vadd.f32 %v74_v26, %v69_v23  ;;  %v298_v26 = vld [vmem:[%s4563_s0 + $0x4c0] sm:$0xff] }
  0x98   :  { %v162_v6 = vmul.f32 %v157_v3, %v157_v3  ;;  %v169_v8 = vmul.f32 0.7978846, %v167_v4  ;;  %v160_v21 = vmul.f32 0.5, %v157_v3  ;;  %354 = vmatpush.msrb.mxu0 %v298_v26 }
  0x99   :  { %v76_v28 = vmul.f32 0.7978846, %v75_v27  ;;  %v229_v49 = vpop.f32.mrf.mxu3  ;;  %v470_v27 = vld [vmem:[%s4563_s0 + $0x600] sm:$0xff] }
  0x9a   :  { %v230_v0 = vadd.f32 %v3261_v38, %v229_v49  ;;  %v164_v9 = vmul.f32 %v162_v6, %v157_v3 }
  0x9b   :  { %3059 = vtanh.f32 %v76_v28  ;;  %v297_v28 = vld [vmem:[%s4563_s0 + $0x4b8] sm:$0xff] }
  0x9c   :  { %v240_v7 = vmax.f32 %v230_v0, 0.0  ;;  %3061 = vtanh.f32 %v169_v8  ;;  %v166_v10 = vmul.f32 0.044715, %v164_v9  ;;  %355 = vmatpush.msrb.mxu0 %v297_v28  ;;  %v3440_v8 = vld [vmem:[%s4563_s0 + $0x80] sm:$0xff]  ;;  %v616_v9 = vld [vmem:[%s4563_s0 + $0x690] sm:$0xff] }
  0x9e   :  { %v168_v12 = vadd.f32 %v166_v10, %v157_v3  ;;  %v615_v10 = vld [vmem:[%s4563_s0 + $0x688] sm:$0xff] }
  0xa0   :  { %v170_v14 = vmul.f32 0.7978846, %v168_v12  ;;  %v613_v12 = vld [vmem:[%s4563_s0 + $0x678] sm:$0xff] }
  0xa1   :  { %v3060_v29 = vpop.eup %3059  ;;  %v232_v5 = vpop.f32.mrf.mxu3 }
  0xa2   :  { %v78_v31 = vadd.f32 1.0, %v3060_v29  ;;  %v233_v11 = vadd.f32 %v3261_v38, %v232_v5  ;;  %v3062_v15 = vpop.eup %3061  ;;  %3063 = vtanh.f32 %v170_v14  ;;  %v469_v29 = vld [vmem:[%s4563_s0 + $0x5f8] sm:$0xff]  ;;  %v3463_v14 = vld [vmem:[%s4563_s0 + $0x88] sm:$0xff] }
  0xa3   :  { %v173_v18 = vadd.f32 1.0, %v3062_v15  ;;  %v18_v15 = vld [vmem:[%s4563_s0 + $0xc8] sm:$0xff] }
  0xa4   :  { %v79_v32 = vmul.f32 %v78_v31, %v71_v30  ;;  %v241_v16 = vmax.f32 %v233_v11, 0.0  ;;  %v366_v30 = vld [vmem:[%s4563_s0 + $0x450] sm:$0xff]  ;;  %v365_v31 = vld [vmem:[%s4563_s0 + $0x448] sm:$0xff]  ;;  %v614_v11 = vld [vmem:[%s4563_s0 + $0x680] sm:$0xff] }
  0xa5   :  { %v3316_v19 = vmul.f32 %v173_v18, %v159_v13  ;;  %394 = vmatpush.msra.mxu2 %v366_v30  ;;  %v17_v13 = vld [vmem:[%s4563_s0 + $0xc0] sm:$0xff]  ;;  %v3485_v18 = vld [vmem:[%s4563_s0 + $0x98] sm:$0xff] }
  0xa6   :  { %2803 = vmatpush.msk.msra.mxu1 %vm91_vm5, %v79_v32  ;;  %v364_v32 = vld [vmem:[%s4563_s0 + $0x440] sm:$0xff] }
  0xa7   :  { %2804 = vmatmul.msk.f32.vlgmr.msra.gmra.mxu1 %vm84_vm6, %v80_v33  ;;  %2820 = vmatmul.msk.f32.vlgmr.msrb.gmra.mxu2 %vm249_vm7, %v3316_v19  ;;  %v363_v33 = vld [vmem:[%s4563_s0 + $0x438] sm:$0xff] }
  0xa8   :  { %277 = vmatpush.msrb.mxu1 %v246_v35  ;;  %2834 = vmatmul.msk.f32.vlgmr.msrb.gmra.mxu3 %vm249_vm7, %v3316_v19  ;;  %v3064_v22 = vpop.eup %3063 }
  0xa9   :  { %v235_v17 = vpop.f32.mrf.mxu3  ;;  %v174_v24 = vadd.f32 1.0, %v3064_v22  ;;  %395 = vmatpush.msra.mxu2 %v365_v31 }
  0xaa   :  { %278 = vmatpush.msrb.mxu1 %v245_v36  ;;  %v236_v20 = vadd.f32 %v3261_v38, %v235_v17  ;;  %v19_v17 = vld [vmem:[%s4563_s0 + $0xd0] sm:$0xff] }
  0xab   :  { %v3324_v25 = vmul.f32 %v174_v24, %v160_v21  ;;  %396 = vmatpush.msra.mxu2 %v364_v32  ;;  %v3496_v21 = vld [vmem:[%s4563_s0 + $0xa0] sm:$0xff] }
  0xac   :  { %279 = vmatpush.msrb.mxu1 %v244_v37  ;;  %v242_v23 = vmax.f32 %v236_v20, 0.0  ;;  %v83_v37 = vld [vmem:[%s4563_s0 + $0x10] sm:$0xff]  ;;  %v20_v20 = vld [vmem:[%s4563_s0 + $0xd8] sm:$0xff] }
  0xad   :  { %397 = vmatpush.msra.mxu2 %v363_v33 }
  0xae   :  { %280 = vmatpush.msrb.mxu1 %v243_v39 }
  0xaf   :  { %2805 = vmatmul.msk.f32.gmra.mxu1 %vm84_vm6, %v81_v40  ;;  %2821 = vmatmul.msk.f32.gmra.mxu2 %vm249_vm7, %v3324_v25  ;;  %v3040_v40 = vld [vmem:[%s4563_s0 + $0x168] ss:$0 sm:$0xff] }
  0xb0   :  { %512 = vmatpush.msra.mxu1 %v472_v56  ;;  %2835 = vmatmul.msk.f32.gmra.mxu3 %vm249_vm7, %v3324_v25  ;;  %v525_v56 = vld [vmem:[%s4563_s0 + $0x588] sm:$0xff] }
  0xb1   :  { %540 = vmatpush.msra.mxu3 %v525_v56 }
  0xb2   :  { %513 = vmatpush.msra.mxu1 %v471_v62 }
  0xb3   :  { %541 = vmatpush.msra.mxu3 %v524_v57 }
  0xb4   :  { %514 = vmatpush.msra.mxu1 %v470_v27 }
  0xb6   :  { %515 = vmatpush.msra.mxu1 %v469_v29 }
  0xb7   :  { %2815 = vmatmul.msk.f32.vlgmr.msrb.gmra.mxu1 %vm249_vm7, %v238_v43  ;;  %v620_v43 = vld [vmem:[%s4563_s0 + $0x650] sm:$0xff] }
  0xb8   :  { %633 = vmatpush.msrb.mxu2 %v620_v43  ;;  %v3524_v43 = vld [vmem:[%s4563_s0 + $0x210] sm:$0xff] }
  0xba   :  { %634 = vmatpush.msrb.mxu2 %v619_v44  ;;  %v3530_v44 = vld [vmem:[%s4563_s0 + $0x208] sm:$0xff] }
  0xbc   :  { %635 = vmatpush.msrb.mxu2 %v618_v45  ;;  %v3536_v45 = vld [vmem:[%s4563_s0 + $0x200] sm:$0xff] }
  0xbe   :  { %636 = vmatpush.msrb.mxu2 %v617_v46  ;;  %v3043_v46 = vld [vmem:[%s4563_s0 + $0x1f0] ss:$0 sm:$0xff] }
  0xbf   :  { %2816 = vmatmul.msk.f32.gmra.mxu1 %vm249_vm7, %v239_v58  ;;  %v523_v58 = vld [vmem:[%s4563_s0 + $0x578] sm:$0xff] }
  0xc0   :  { %542 = vmatpush.msra.mxu3 %v523_v58 }
  0xc7   :  { %2817 = vmatmul.msk.f32.gmra.mxu1 %vm249_vm7, %v240_v7  ;;  %v16_v7 = vld [vmem:[%s4563_s0 + $0xb8] sm:$0xff] }
  0xcf   :  { %2818 = vmatmul.msk.f32.gmra.mxu1 %vm249_vm7, %v241_v16  ;;  %v3474_v16 = vld [vmem:[%s4563_s0 + $0x90] sm:$0xff] }
  0xd7   :  { %2819 = vmatmul.msk.f32.gmra.mxu1 %vm249_vm7, %v242_v23 }
 0x124   :  { %v112_v35 = vpop.f32.mrf.mxu1 }
 0x125   :  { %v3358_v36 = vadd.f32 %v112_v35, %v82_v34 }
 0x127   :  { %2822 = vmatmul.msk.f32.vlgmr.msrb.gmra.mxu0 %vm249_vm7, %v3358_v36  ;;  %2836 = vmatmul.msk.f32.vlgmr.msra.gmra.mxu1 %vm249_vm7, %v3358_v36 }
 0x12a   :  { %v328_v59 = vpop.f32.mrf.mxu2 }
 0x12b   :  { %v494_v60 = vpop.f32.mrf.mxu3 }
 0x12c   :  { %v115_v38 = vpop.f32.mrf.mxu1 }
 0x12d   :  { %v3367_v39 = vadd.f32 %v115_v38, %v83_v37 }
 0x12f   :  { %2823 = vmatmul.msk.f32.gmra.mxu0 %vm249_vm7, %v3367_v39  ;;  %2837 = vmatmul.msk.f32.gmra.mxu1 %vm249_vm7, %v3367_v39 }
 0x132   :  { %v331_v63 = vpop.f32.mrf.mxu2 }
 0x133   :  { %v497_v0 = vpop.f32.mrf.mxu3 }
 0x134   :  { %v282_v41 = vpop.f32.mrf.mxu1 }
 0x135   :  { %v3376_v42 = vadd.f32 %v3040_v40, %v282_v41  ;;  %v3518_v41 = vld [vmem:[%s4563_s0 + $0x218] sm:$0xff] }
 0x137   :  { %2824 = vmatmul.msk.f32.vlgmr.msra.gmra.mxu2 %vm249_vm7, %v3376_v42  ;;  %2838 = vmatmul.msk.f32.vlgmr.msra.gmra.mxu3 %vm249_vm7, %v3376_v42 }
 0x13c   :  { %v285_v47 = vpop.f32.mrf.mxu1 }
 0x13d   :  { %v3392_v48 = vadd.f32 %v3040_v40, %v285_v47 }
 0x13f   :  { %2825 = vmatmul.msk.f32.gmra.mxu2 %vm249_vm7, %v3392_v48  ;;  %2839 = vmatmul.msk.f32.gmra.mxu3 %vm249_vm7, %v3392_v48 }
 0x144   :  { %v288_v49 = vpop.f32.mrf.mxu1 }
 0x145   :  { %v3396_v50 = vadd.f32 %v3040_v40, %v288_v49  ;;  %v3041_v49 = vld [vmem:[%s4563_s0 + $0x1b0] ss:$0 sm:$0xff] }
 0x147   :  { %2826 = vmatmul.msk.f32.gmra.mxu2 %vm249_vm7, %v3396_v50  ;;  %2840 = vmatmul.msk.f32.gmra.mxu3 %vm249_vm7, %v3396_v50 }
 0x14c   :  { %v291_v51 = vpop.f32.mrf.mxu1 }
 0x14d   :  { %v3400_v52 = vadd.f32 %v3040_v40, %v291_v51 }
 0x14f   :  { %2827 = vmatmul.msk.f32.gmra.mxu2 %vm249_vm7, %v3400_v52  ;;  %2841 = vmatmul.msk.f32.gmra.mxu3 %vm249_vm7, %v3400_v52 }
 0x154   :  { %v294_v53 = vpop.f32.mrf.mxu1 }
 0x155   :  { %v3404_v54 = vadd.f32 %v3040_v40, %v294_v53 }
 0x157   :  { %2828 = vmatmul.msk.f32.gmra.mxu2 %vm249_vm7, %v3404_v54  ;;  %2842 = vmatmul.msk.f32.gmra.mxu3 %vm249_vm7, %v3404_v54 }
 0x15f   :  { %2848 = vmatmul.msk.f32.vlgmr.msrb.gmra.mxu2 %vm249_vm7, %v3316_v19 }
 0x167   :  { %2849 = vmatmul.msk.f32.gmra.mxu2 %vm249_vm7, %v3324_v25 }
 0x1a4   :  { %v357_v61 = vpop.f32.mrf.mxu0  ;;  %v517_v62 = vpop.f32.mrf.mxu1 }
 0x1a5   :  { %v358_v5 = vadd.f32 %v357_v61, %v328_v59  ;;  %v518_v6 = vadd.f32 %v517_v62, %v494_v60  ;;  %v3157_v60 = vmov 2   ;;  %v3158_v61 = vmov 1  }
 0x1a6   :  { %3000 = vset.pattern.permute.xlu2 %v3157_v60  ;;  %2999 = vset.pattern.permute.xlu1 %v3158_v61 }
 0x1ac   :  { %v360_v1 = vpop.f32.mrf.mxu0  ;;  %v520_v2 = vpop.f32.mrf.mxu1 }
 0x1ad   :  { %v361_v3 = vadd.f32 %v360_v1, %v331_v63  ;;  %v521_v4 = vadd.f32 %v520_v2, %v497_v0  ;;  %v4565_v63 = vmov 0  }
 0x1ae   :  { %2998 = vset.pattern.permute.xlu0 %v4565_v63 }
 0x1af   :  { %444 = vmatpush.msra.mxu0 %v361_v3  ;;  %588 = vmatpush.msrb.mxu1 %v521_v4 }
 0x1b1   :  { %445 = vmatpush.msra.mxu0 %v358_v5  ;;  %589 = vmatpush.msrb.mxu1 %v518_v6 }
 0x1b2   :  { %2829 = vmatmul.msk.f32.vlgmr.msra.gmra.mxu0 %vm414_vm8, %v16_v7  ;;  %2843 = vmatmul.msk.f32.vlgmr.msrb.gmra.mxu1 %vm414_vm8, %v3440_v8 }
 0x1b3   :  { %656 = vmatpush.msrb.mxu0 %v616_v9 }
 0x1b5   :  { %657 = vmatpush.msrb.mxu0 %v615_v10 }
 0x1b7   :  { %658 = vmatpush.msrb.mxu0 %v614_v11 }
 0x1b9   :  { %659 = vmatpush.msrb.mxu0 %v613_v12 }
 0x1ba   :  { %2830 = vmatmul.msk.f32.gmra.mxu0 %vm414_vm8, %v17_v13  ;;  %2844 = vmatmul.msk.f32.gmra.mxu1 %vm414_vm8, %v3463_v14  ;;  %v399_v22 = vpop.f32.mrf.mxu2 }
 0x1bb   :  { %738 = vmatpush.msra.mxu0 %v3518_v41 }
 0x1bd   :  { %739 = vmatpush.msra.mxu0 %v3524_v43 }
 0x1bf   :  { %740 = vmatpush.msra.mxu0 %v3530_v44 }
 0x1c1   :  { %741 = vmatpush.msra.mxu0 %v3536_v45 }
 0x1c2   :  { %2831 = vmatmul.msk.f32.gmra.mxu0 %vm414_vm8, %v18_v15  ;;  %2845 = vmatmul.msk.f32.gmra.mxu1 %vm414_vm8, %v3474_v16  ;;  %v402_v23 = vpop.f32.mrf.mxu2 }
 0x1ca   :  { %2832 = vmatmul.msk.f32.gmra.mxu0 %vm414_vm8, %v19_v17  ;;  %2846 = vmatmul.msk.f32.gmra.mxu1 %vm414_vm8, %v3485_v18  ;;  %v405_v26 = vpop.f32.mrf.mxu2 }
 0x1d2   :  { %2833 = vmatmul.msk.f32.gmra.mxu0 %vm414_vm8, %v20_v20  ;;  %2847 = vmatmul.msk.f32.gmra.mxu1 %vm414_vm8, %v3496_v21  ;;  %v408_v29 = vpop.f32.mrf.mxu2 }
 0x1da   :  { %2850 = vmatmul.msk.f32.vlgmr.msrb.gmra.mxu0 %vm249_vm7, %v3358_v36  ;;  %v411_v31 = vpop.f32.mrf.mxu2 }
 0x1e2   :  { %2851 = vmatmul.msk.f32.gmra.mxu0 %vm249_vm7, %v3367_v39  ;;  %v638_v33 = vpop.f32.mrf.mxu2 }
 0x1ea   :  { %v641_v35 = vpop.f32.mrf.mxu2 }
 0x22f   :  { %v447_v24 = vpop.f32.mrf.mxu0 }
 0x230   :  { %v448_v47 = vadd.f32 %v447_v24, %v399_v22 }
 0x232   :  { %v464_v55 = vadd.f32 %v3041_v49, %v448_v47 }
 0x237   :  { %v450_v27 = vpop.f32.mrf.mxu0 }
 0x238   :  { %v451_v58 = vadd.f32 %v450_v27, %v402_v23 }
 0x23a   :  { %v465_v0 = vadd.f32 %v3041_v49, %v451_v58  ;;  %v36_v58 = vld [vmem:[%s4563_s0 + $0x148] sm:$0xff] }
 0x23f   :  { %v453_v28 = vpop.f32.mrf.mxu0 }
 0x240   :  { %v454_v3 = vadd.f32 %v453_v28, %v405_v26 }
 0x242   :  { %v466_v6 = vadd.f32 %v3041_v49, %v454_v3 }
 0x247   :  { %v456_v30 = vpop.f32.mrf.mxu0 }
 0x248   :  { %v457_v10 = vadd.f32 %v456_v30, %v408_v29  ;;  %v3160_v30 = vmov 3  }
 0x24a   :  { %v467_v13 = vadd.f32 %v3041_v49, %v457_v10 }
 0x24f   :  { %v459_v32 = vpop.f32.mrf.mxu0 }
 0x250   :  { %v460_v20 = vadd.f32 %v459_v32, %v411_v31 }
 0x252   :  { %v468_v24 = vadd.f32 %v3041_v49, %v460_v20 }
 0x257   :  { %v661_v34 = vpop.f32.mrf.mxu0 }
 0x258   :  { %v662_v40 = vadd.f32 %v661_v34, %v638_v33 }
 0x25f   :  { %v664_v37 = vpop.f32.mrf.mxu0 }
 0x260   :  { %v665_v38 = vadd.f32 %v664_v37, %v641_v35 }
 0x262   :  { %683 = vmatpush.msra.mxu2 %v665_v38 }
 0x264   :  { %684 = vmatpush.msra.mxu2 %v662_v40 }
 0x265   :  { %2852 = vmatmul.msk.f32.vlgmr.msra.gmra.mxu2 %vm414_vm8, %v3440_v8 }
 0x266   :  { %2875 = vmatpush.xpose.msk.msrb.mxu2 %vm1050_vm12, %v3518_v41 }
 0x26a   :  { %2876 = vmatpush.xpose.msk.msrb.mxu2 %vm1050_vm12, %v3524_v43 }
 0x26d   :  { %2853 = vmatmul.msk.f32.gmra.mxu2 %vm414_vm8, %v3463_v14 }
 0x26e   :  { %2877 = vmatpush.xpose.msk.msrb.mxu2 %vm1050_vm12, %v3530_v44 }
 0x272   :  { %2878 = vmatpush.xpose.msk.msrb.mxu2 %vm1050_vm12, %v3536_v45 }
 0x275   :  { %2854 = vmatmul.msk.f32.gmra.mxu2 %vm414_vm8, %v3474_v16 }
 0x27d   :  { %2855 = vmatmul.msk.f32.gmra.mxu2 %vm414_vm8, %v3485_v18 }
 0x285   :  { %2856 = vmatmul.msk.f32.gmra.mxu2 %vm414_vm8, %v3496_v21 }
 0x2e8   :  { %v686_v51 = vpop.f32.mrf.mxu2 }
 0x2e9   :  { %v687_v53 = vadd.f32 %v3043_v46, %v686_v51 }
 0x2eb   :  { %v701_v56 = vmul.f32 0.35355338, %v687_v53 }
 0x2ed   :  { %v706_v57 = vmul.f32 %v701_v56, %v464_v55 }
 0x2ef   :  { %2857 = vmatmul.msk.f32.vlgmr.msra.gmra.mxu0 %vm249_vm7, %v706_v57 }
 0x2f0   :  { %v689_v59 = vpop.f32.mrf.mxu2 }
 0x2f1   :  { %v690_v62 = vadd.f32 %v3043_v46, %v689_v59  ;;  %v34_v59 = vld [vmem:[%s4563_s0 + $0x138] sm:$0xff] }
 0x2f3   :  { %v702_v1 = vmul.f32 0.35355338, %v690_v62  ;;  %v32_v62 = vld [vmem:[%s4563_s0 + $0x128] sm:$0xff] }
 0x2f5   :  { %v707_v2 = vmul.f32 %v702_v1, %v465_v0  ;;  %v35_v0 = vld [vmem:[%s4563_s0 + $0x140] sm:$0xff]  ;;  %v33_v1 = vld [vmem:[%s4563_s0 + $0x130] sm:$0xff] }
 0x2f7   :  { %2858 = vmatmul.msk.f32.gmra.mxu0 %vm249_vm7, %v707_v2 }
 0x2f8   :  { %v692_v4 = vpop.f32.mrf.mxu2 }
 0x2f9   :  { %v693_v5 = vadd.f32 %v3043_v46, %v692_v4 }
 0x2fb   :  { %v703_v7 = vmul.f32 0.35355338, %v693_v5 }
 0x2fd   :  { %v708_v9 = vmul.f32 %v703_v7, %v466_v6 }
 0x2ff   :  { %2859 = vmatmul.msk.f32.gmra.mxu0 %vm249_vm7, %v708_v9 }
 0x300   :  { %v695_v11 = vpop.f32.mrf.mxu2 }
 0x301   :  { %v696_v12 = vadd.f32 %v3043_v46, %v695_v11 }
 0x303   :  { %v704_v15 = vmul.f32 0.35355338, %v696_v12 }
 0x305   :  { %v709_v17 = vmul.f32 %v704_v15, %v467_v13 }
 0x307   :  { %2860 = vmatmul.msk.f32.gmra.mxu0 %vm249_vm7, %v709_v17 }
 0x308   :  { %v698_v22 = vpop.f32.mrf.mxu2 }
 0x309   :  { %v699_v23 = vadd.f32 %v3043_v46, %v698_v22 }
 0x30b   :  { %v705_v26 = vmul.f32 0.35355338, %v699_v23 }
 0x30d   :  { %v710_v27 = vmul.f32 %v705_v26, %v468_v24 }
 0x30f   :  { %2861 = vmatmul.msk.f32.gmra.mxu0 %vm249_vm7, %v710_v27 }
 0x36c   :  { %v3553_v28 = vpop.f32.mrf.mxu0 }
 0x36d   :  { %844 = vperm.xlu2 %3000, %v3553_v28   ;;  %804 = vperm.xlu1 %2999, %v3553_v28  }
 0x36e   :  { %760 = vperm.xlu0 %2998, %v3553_v28  }
 0x374   :  { %v3558_v29 = vpop.f32.mrf.mxu0 }
 0x375   :  { %3001 = vset.pattern.permute.xlu1 %v3160_v30  ;;  %3007 = vset.pattern.permute.xlu2 %v4565_v63 }
 0x376   :  { %765 = vperm.xlu0 %2998, %v3558_v29   ;;  %884 = vperm.xlu1 %3001, %v3553_v28  }
 0x37c   :  { %v3564_v31 = vpop.f32.mrf.mxu0 }
 0x37e   :  { %3002 = vset.pattern.permute.xlu0 %v3158_v61  ;;  %3004 = vset.pattern.permute.xlu1 %v4565_v63 }
 0x37f   :  { %808 = vperm.xlu0 %3002, %v3558_v29   ;;  %770 = vperm.xlu1 %3004, %v3564_v31  }
 0x384   :  { %v3570_v32 = vpop.f32.mrf.mxu0 }
 0x385   :  { %775 = vperm.xlu2 %3007, %v3570_v32  }
 0x387   :  { %3003 = vset.pattern.permute.xlu0 %v3157_v60  ;;  %3005 = vset.pattern.permute.xlu1 %v3158_v61 }
 0x388   :  { %848 = vperm.xlu0 %3003, %v3558_v29   ;;  %812 = vperm.xlu1 %3005, %v3564_v31  }
 0x38c   :  { %v3579_v33 = vpop.f32.mrf.mxu0 }
 0x38d   :  { %3008 = vset.pattern.permute.xlu2 %v3158_v61 }
 0x38e   :  { %816 = vperm.xlu2 %3008, %v3570_v32  }
 0x390   :  { %3010 = vset.pattern.permute.xlu0 %v4565_v63  ;;  %3006 = vset.pattern.permute.xlu1 %v3157_v60 }
 0x391   :  { %780 = vperm.xlu0 %3010, %v3579_v33   ;;  %852 = vperm.xlu1 %3006, %v3564_v31  }
 0x396   :  { %3009 = vset.pattern.permute.xlu2 %v3157_v60 }
 0x397   :  { %856 = vperm.xlu2 %3009, %v3570_v32  }
 0x399   :  { %3014 = vset.pattern.permute.xlu0 %v3160_v30  ;;  %3011 = vset.pattern.permute.xlu1 %v3158_v61 }
 0x39a   :  { %896 = vperm.xlu0 %3014, %v3570_v32   ;;  %820 = vperm.xlu1 %3011, %v3579_v33  }
 0x39f   :  { %860 = vperm.xlu2 %3009, %v3579_v33  }
 0x3a2   :  { %3012 = vset.pattern.permute.xlu1 %v3160_v30  ;;  %3017 = vset.pattern.permute.xlu0 %v4565_v63 }
 0x3a3   :  { %888 = vperm.xlu1 %3012, %v3558_v29  }
 0x3a7   :  { %3013 = vset.pattern.permute.xlu2 %v3160_v30 }
 0x3a8   :  { %900 = vperm.xlu2 %3013, %v3579_v33  }
 0x3ab   :  { %3015 = vset.pattern.permute.xlu1 %v4565_v63 }
 0x3b0   :  { %892 = vperm.xlu2 %3013, %v3564_v31  }
 0x3b8   :  { %3016 = vset.pattern.permute.xlu2 %v4565_v63 }
 0x3c7   :  { %v845_v34 = vpop.permute.xlu2 %844 }
 0x3c8   :  { %v863_v5 = vadd.f32 %v845_v34, %v32_v62 }
 0x3ca   :  { %v868_v24 = vsel %vm414_vm8, %v863_v5, -inf }
 0x3df   :  { %v805_v35 = vpop.permute.xlu1 %804  ;;  %v776_v37 = vpop.permute.xlu2 %775 }
 0x3e0   :  { %v761_v38 = vpop.permute.xlu0 %760  ;;  %v786_v9 = vadd.f32 %v776_v37, %v35_v0 }
 0x3e1   :  { %v783_v3 = vadd.f32 %v761_v38, %v32_v62 }
 0x3e2   :  { %v791_v37 = vsel %vm414_vm8, %v786_v9, -inf }
 0x3e3   :  { %v788_v20 = vsel %vm414_vm8, %v783_v3, -inf }
 0x3e8   :  { %v766_v40 = vpop.permute.xlu0 %765  ;;  %v885_v46 = vpop.permute.xlu1 %884 }
 0x3e9   :  { %v817_v47 = vpop.permute.xlu2 %816  ;;  %v784_v10 = vadd.f32 %v766_v40, %v33_v1 }
 0x3eb   :  { %v789_v38 = vsel %vm414_vm8, %v784_v10, -inf }
 0x3f1   :  { %v809_v49 = vpop.permute.xlu0 %808  ;;  %v771_v51 = vpop.permute.xlu1 %770 }
 0x3f2   :  { %v857_v53 = vpop.permute.xlu2 %856  ;;  %v785_v4 = vadd.f32 %v771_v51, %v34_v59 }
 0x3f3   :  { %v866_v13 = vadd.f32 %v857_v53, %v35_v0 }
 0x3f4   :  { %v790_v22 = vsel %vm414_vm8, %v785_v4, -inf }
 0x3f5   :  { %v795_v51 = vmax.f32 %v790_v22, %v791_v37  ;;  %v871_v53 = vsel %vm414_vm8, %v866_v13, -inf }
 0x3fa   :  { %v849_v55 = vpop.permute.xlu0 %848  ;;  %v861_v56 = vpop.permute.xlu2 %860 }
 0x3fb   :  { %v813_v57 = vpop.permute.xlu1 %812  ;;  %v867_v2 = vadd.f32 %v861_v56, %v36_v58  ;;  %v864_v26 = vadd.f32 %v849_v55, %v33_v1 }
 0x3fc   :  { %v825_v5 = vadd.f32 %v813_v57, %v34_v59 }
 0x3fd   :  { %v872_v15 = vsel %vm414_vm8, %v867_v2, -inf  ;;  %v869_v3 = vsel %vm414_vm8, %v864_v26, -inf  ;;  %v903_v26 = vadd.f32 %v885_v46, %v32_v62 }
 0x3fe   :  { %v873_v40 = vmax.f32 %v868_v24, %v872_v15  ;;  %v830_v13 = vsel %vm414_vm8, %v825_v5, -inf }
 0x402   :  { %v901_v17 = vpop.permute.xlu2 %900 }
 0x403   :  { %v781_v6 = vpop.permute.xlu0 %780  ;;  %v853_v7 = vpop.permute.xlu1 %852  ;;  %v907_v22 = vadd.f32 %v901_v17, %v36_v58 }
 0x404   :  { %v787_v11 = vadd.f32 %v781_v6, %v36_v58  ;;  %v865_v12 = vadd.f32 %v853_v7, %v34_v59  ;;  %v823_v6 = vadd.f32 %v805_v35, %v32_v62  ;;  %v874_v7 = vmax.f32 %v873_v40, %v869_v3 }
 0x406   :  { %v792_v23 = vsel %vm414_vm8, %v787_v11, -inf  ;;  %v870_v34 = vsel %vm414_vm8, %v865_v12, -inf  ;;  %v826_v11 = vadd.f32 %v817_v47, %v35_v0  ;;  %v828_v15 = vsel %vm414_vm8, %v823_v6, -inf }
 0x407   :  { %v793_v27 = vmax.f32 %v788_v20, %v792_v23  ;;  %v875_v2 = vmax.f32 %v870_v34, %v871_v53  ;;  %v824_v20 = vadd.f32 %v809_v49, %v33_v1  ;;  %v908_v53 = vsel %vm414_vm8, %v903_v26, -inf }
 0x408   :  { %v831_v35 = vsel %vm414_vm8, %v826_v11, -inf }
 0x409   :  { %v794_v56 = vmax.f32 %v793_v27, %v789_v38  ;;  %v876_v12 = vmax.f32 %v874_v7, %v875_v2  ;;  %v829_v57 = vsel %vm414_vm8, %v824_v20, -inf  ;;  %v835_v37 = vmax.f32 %v830_v13, %v831_v35 }
 0x40a   :  { %v893_v63 = vpop.permute.xlu2 %892 }
 0x40b   :  { %v796_v4 = vmax.f32 %v794_v56, %v795_v51  ;;  %v877_v47 = vrot.slane %v876_v12, 4  ;;  %v905_v49 = vadd.f32 %v893_v63, %v34_v59  ;;  %v912_v51 = vsel %vm414_vm8, %v907_v22, -inf }
 0x40c   :  { %v821_v55 = vpop.permute.xlu1 %820  ;;  %v897_v10 = vpop.permute.xlu0 %896  ;;  %v913_v3 = vmax.f32 %v908_v53, %v912_v51 }
 0x40d   :  { %v827_v23 = vadd.f32 %v821_v55, %v36_v58  ;;  %v797_v9 = vrot.slane %v796_v4, 4  ;;  %v906_v34 = vadd.f32 %v897_v10, %v35_v0  ;;  %v878_v17 = vmax.f32 %v876_v12, %v877_v47 }
 0x40e   :  { %v910_v46 = vsel %vm414_vm8, %v905_v49, -inf }
 0x40f   :  { %v832_v24 = vsel %vm414_vm8, %v827_v23, -inf  ;;  %v798_v38 = vmax.f32 %v796_v4, %v797_v9  ;;  %v911_v62 = vsel %vm414_vm8, %v906_v34, -inf  ;;  %v879_v5 = vrot.slane %v878_v17, 2 }
 0x410   :  { %v833_v27 = vmax.f32 %v828_v15, %v832_v24  ;;  %v915_v59 = vmax.f32 %v910_v46, %v911_v62 }
 0x411   :  { %v799_v6 = vrot.slane %v798_v38, 2  ;;  %v880_v12 = vmax.f32 %v878_v17, %v879_v5 }
 0x412   :  { %v834_v40 = vmax.f32 %v833_v27, %v829_v57 }
 0x413   :  { %v800_v55 = vmax.f32 %v798_v38, %v799_v6  ;;  %v881_v24 = vrot.slane %v880_v12, 1  ;;  %v3649_v38 = vpop.f32.mrf.mxu3 }
 0x414   :  { %v836_v56 = vmax.f32 %v834_v40, %v835_v37 }
 0x415   :  { %v889_v58 = vpop.permute.xlu1 %888  ;;  %v801_v10 = vrot.slane %v800_v55, 1  ;;  %v882_v47 = vmax.f32 %v880_v12, %v881_v24  ;;  %v1327_v24 = vld [vmem:[%s4563_s0 + $0x470] sm:$0xff] }
 0x416   :  { %v904_v2 = vadd.f32 %v889_v58, %v33_v1  ;;  %v837_v7 = vrot.slane %v836_v56, 4 }
 0x417   :  { %v802_v26 = vmax.f32 %v800_v55, %v801_v10 }
 0x418   :  { %v909_v63 = vsel %vm414_vm8, %v904_v2, -inf  ;;  %v838_v0 = vmax.f32 %v836_v56, %v837_v7 }
 0x419   :  { %v914_v4 = vmax.f32 %v913_v3, %v909_v63 }
 0x41a   :  { %v839_v11 = vrot.slane %v838_v0, 2 }
 0x41b   :  { %v916_v20 = vmax.f32 %v914_v4, %v915_v59  ;;  %v3651_v40 = vpop.f32.mrf.mxu3 }
 0x41c   :  { %v840_v23 = vmax.f32 %v838_v0, %v839_v11 }
 0x41d   :  { %v917_v9 = vrot.slane %v916_v20, 4 }
 0x41e   :  { %v841_v15 = vrot.slane %v840_v23, 1 }
 0x41f   :  { %v918_v13 = vmax.f32 %v916_v20, %v917_v9  ;;  %v3684_v9 = vpop.f32.mrf.mxu1 }
 0x420   :  { %v842_v22 = vmax.f32 %v840_v23, %v841_v15  ;;  %v15_v23 = vld [vmem:[%s4563_s0 + $0xb0] sm:$0xff] }
 0x421   :  { %v919_v1 = vrot.slane %v918_v13, 2 }
 0x422   :  { %v924_v57 = vsel %vm923_vm9, %v802_v26, %v842_v22  ;;  %v1326_v26 = vld [vmem:[%s4563_s0 + $0x468] sm:$0xff] }
 0x423   :  { %v920_v35 = vmax.f32 %v918_v13, %v919_v1  ;;  %v925_v34 = vsel %vm91_vm5, %v924_v57, %v882_v47  ;;  %v3653_v51 = vpop.f32.mrf.mxu3  ;;  %v31_v47 = vld [vmem:[%s4563_s0 + $0x120] sm:$0xff] }
 0x424   :  { %1132 = vperm.xlu1 %3015, %v31_v47  }
 0x425   :  { %v921_v27 = vrot.slane %v920_v35, 1 }
 0x427   :  { %v922_v49 = vmax.f32 %v920_v35, %v921_v27  ;;  %v3686_v12 = vpop.f32.mrf.mxu1  ;;  %v1325_v35 = vld [vmem:[%s4563_s0 + $0x460] sm:$0xff]  ;;  %v1324_v27 = vld [vmem:[%s4563_s0 + $0x458] sm:$0xff] }
 0x429   :  { %v927_v37 = vsel %vm926_vm10, %v925_v34, %v922_v49 }
 0x42a   :  { %2862 = vmatpush.xpose.msk.msrb.mxu3 %vm414_vm8, %v927_v37 }
 0x42b   :  { %v3655_v53 = vpop.f32.mrf.mxu3 }
 0x42d   :  { %2863 = vmatmul.msk.f32.vlgmr.msrb.gmra.mxu3 %vm414_vm8, %v3440_v8 }
 0x42f   :  { %v3688_v10 = vpop.f32.mrf.mxu1 }
 0x433   :  { %v3657_v56 = vpop.f32.mrf.mxu3 }
 0x435   :  { %2864 = vmatmul.msk.f32.gmra.mxu3 %vm414_vm8, %v3463_v14 }
 0x437   :  { %v3690_v15 = vpop.f32.mrf.mxu1 }
 0x43d   :  { %2865 = vmatmul.msk.f32.gmra.mxu3 %vm414_vm8, %v3474_v16 }
 0x43f   :  { %v3692_v13 = vpop.f32.mrf.mxu1 }
 0x445   :  { %2866 = vmatmul.msk.f32.gmra.mxu3 %vm414_vm8, %v3485_v18 }
 0x44d   :  { %2867 = vmatmul.msk.f32.gmra.mxu3 %vm414_vm8, %v3496_v21 }
 0x4b0   :  { %v948_v58 = vpop.f32.mrf.mxu3 }
 0x4b1   :  { %v963_v4 = vsub.f32 %v3553_v28, %v948_v58 }
 0x4b3   :  { %v968_v11 = vmul.f32 1.442695, %v963_v4 }
 0x4b8   :  { %v951_v17 = vpop.f32.mrf.mxu3 }
 0x4b9   :  { %v964_v63 = vsub.f32 %v3558_v29, %v951_v17  ;;  %v1406_v17 = vld [vmem:[%s4563_s0 + $0x5f0] sm:$0xff] }
 0x4ba   :  { %1419 = vmatpush.msra.mxu2 %v1406_v17  ;;  %v592_v17 = vadd.f32 %v3684_v9, %v3649_v38  ;;  %v3871_v38 = vld [vmem:[%s4563_s0 + $0xe8] sm:$0xff]  ;;  %v1177_v9 = vld [vmem:[%s4563_s0 + $0x510] sm:$0xff] }
 0x4bb   :  { %v970_v55 = vmul.f32 1.442695, %v964_v63  ;;  %v1403_v63 = vld [vmem:[%s4563_s0 + $0x5d8] sm:$0xff]  ;;  %1198 = vmatpush.msra.mxu3 %v1177_v9 }
 0x4c0   :  { %v954_v46 = vpop.f32.mrf.mxu3 }
 0x4c1   :  { %v965_v6 = vsub.f32 %v3564_v31, %v954_v46  ;;  %v29_v46 = vld [vmem:[%s4563_s0 + $0x110] sm:$0xff] }
 0x4c2   :  { %1122 = vperm.xlu1 %3015, %v29_v46  }
 0x4c3   :  { %v972_v5 = vmul.f32 1.442695, %v965_v6 }
 0x4c8   :  { %v957_v62 = vpop.f32.mrf.mxu3 }
 0x4c9   :  { %v966_v2 = vsub.f32 %v3570_v32, %v957_v62  ;;  %v14_v32 = vld [vmem:[%s4563_s0 + $0xa8] sm:$0xff] }
 0x4ca   :  { %v1405_v62 = vld [vmem:[%s4563_s0 + $0x5e8] sm:$0xff] }
 0x4cb   :  { %v974_v59 = vmul.f32 1.442695, %v966_v2  ;;  %v1404_v2 = vld [vmem:[%s4563_s0 + $0x5e0] sm:$0xff]  ;;  %1420 = vmatpush.msra.mxu2 %v1405_v62 }
 0x4cd   :  { %1421 = vmatpush.msra.mxu2 %v1404_v2 }
 0x4cf   :  { %1422 = vmatpush.msra.mxu2 %v1403_v63  ;;  %v1176_v63 = vld [vmem:[%s4563_s0 + $0x508] sm:$0xff] }
 0x4d0   :  { %v960_v3 = vpop.f32.mrf.mxu3  ;;  %1199 = vmatpush.msra.mxu3 %v1176_v63 }
 0x4d1   :  { %v967_v7 = vsub.f32 %v3579_v33, %v960_v3 }
 0x4d3   :  { %v976_v0 = vmul.f32 1.442695, %v967_v7 }
 0x4d5   :  { %3065 = vpow2.f32 %v976_v0  ;;  %v30_v0 = vld [vmem:[%s4563_s0 + $0x118] sm:$0xff] }
 0x4d6   :  { %3067 = vpow2.f32 %v974_v59  ;;  %1127 = vperm.xlu2 %3016, %v30_v0   ;;  %v1174_v0 = vld [vmem:[%s4563_s0 + $0x4f8] sm:$0xff] }
 0x4d7   :  { %3069 = vpow2.f32 %v972_v5 }
 0x4d8   :  { %3071 = vpow2.f32 %v970_v55 }
 0x4d9   :  { %3073 = vpow2.f32 %v968_v11 }
 0x4db   :  { %v3664_v20 = vpop.eup %3065 }
 0x4dc   :  { %996 = vmatpush.msra.mxu1 %v3664_v20  ;;  %v3667_v31 = vpop.eup %3067 }
 0x4dd   :  { %v3670_v29 = vpop.eup %3069 }
 0x4de   :  { %997 = vmatpush.msra.mxu1 %v3667_v31  ;;  %v3673_v28 = vpop.eup %3071 }
 0x4df   :  { %v3074_v33 = vpop.eup %3073 }
 0x4e0   :  { %998 = vmatpush.msra.mxu1 %v3670_v29 }
 0x4e2   :  { %999 = vmatpush.msra.mxu1 %v3673_v28 }
 0x4e4   :  { %1000 = vmatpush.msra.mxu1 %v3074_v33 }
 0x4e5   :  { %2868 = vmatmul.msk.f32.vlgmr.msra.gmra.mxu1 %vm978_vm11, %v14_v32  ;;  %v1456_v32 = vld [vmem:[%s4563_s0 + $0x5b0] sm:$0xff] }
 0x4ed   :  { %2869 = vmatmul.msk.f32.gmra.mxu1 %vm978_vm11, %v15_v23 }
 0x562   :  { %v1002_v22 = vpop.f32.mrf.mxu1 }
 0x56a   :  { %v1005_v1 = vpop.f32.mrf.mxu1 }
 0x56b   :  { %1022 = vmatpush.msrb.mxu1 %v1005_v1 }
 0x56d   :  { %1023 = vmatpush.msrb.mxu1 %v1002_v22 }
 0x56e   :  { %2870 = vmatmul.msk.f32.vlgmr.msrb.gmra.mxu1 %vm414_vm8, %v3440_v8  ;;  %v1535_v8 = vld [vmem:[%s4563_s0 + $0x670] sm:$0xff] }
 0x56f   :  { %1340 = vmatpush.msra.mxu1 %v1327_v24  ;;  %v1453_v24 = vld [vmem:[%s4563_s0 + $0x598] sm:$0xff] }
 0x571   :  { %1341 = vmatpush.msra.mxu1 %v1326_v26 }
 0x573   :  { %1342 = vmatpush.msra.mxu1 %v1325_v35 }
 0x575   :  { %1343 = vmatpush.msra.mxu1 %v1324_v27 }
 0x576   :  { %2871 = vmatmul.msk.f32.gmra.mxu1 %vm414_vm8, %v3463_v14  ;;  %v1534_v14 = vld [vmem:[%s4563_s0 + $0x668] sm:$0xff] }
 0x577   :  { %1548 = vmatpush.msrb.mxu1 %v1535_v8 }
 0x579   :  { %1549 = vmatpush.msrb.mxu1 %v1534_v14 }
 0x57e   :  { %2872 = vmatmul.msk.f32.gmra.mxu1 %vm414_vm8, %v3474_v16  ;;  %v1533_v16 = vld [vmem:[%s4563_s0 + $0x660] sm:$0xff] }
 0x57f   :  { %1550 = vmatpush.msrb.mxu1 %v1533_v16  ;;  %v3833_v16 = vpop.permute.xlu1 %1132 }
 0x586   :  { %2873 = vmatmul.msk.f32.gmra.mxu1 %vm414_vm8, %v3485_v18  ;;  %v1532_v18 = vld [vmem:[%s4563_s0 + $0x658] sm:$0xff] }
 0x587   :  { %1551 = vmatpush.msrb.mxu1 %v1532_v18  ;;  %v3835_v18 = vpop.permute.xlu2 %1127 }
 0x58e   :  { %2874 = vmatmul.msk.f32.gmra.mxu1 %vm414_vm8, %v3496_v21  ;;  %v27_v21 = vld [vmem:[%s4563_s0 + $0x100] sm:$0xff] }
 0x58f   :  { %1112 = vperm.xlu0 %3017, %v27_v21   ;;  %v3844_v21 = vpop.permute.xlu1 %1122 }
 0x596   :  { %2894 = vmatmul.msk.f32.vlgmr.msra.gmra.mxu1 %vm249_vm7, %v3376_v42 }
 0x597   :  { %3019 = vset.pattern.permute.xlu0 %v3157_v60 }
 0x59e   :  { %2895 = vmatmul.msk.f32.gmra.mxu1 %vm249_vm7, %v3392_v48 }
 0x5a6   :  { %2896 = vmatmul.msk.f32.gmra.mxu1 %vm249_vm7, %v3396_v50 }
 0x5ae   :  { %2897 = vmatmul.msk.f32.gmra.mxu1 %vm249_vm7, %v3400_v52 }
 0x5b6   :  { %2898 = vmatmul.msk.f32.gmra.mxu1 %vm249_vm7, %v3404_v54 }
 0x5be   :  { %2918 = vmatmul.msk.f32.vlgmr.msrb.gmra.mxu1 %vm249_vm7, %v3316_v19 }
 0x5c6   :  { %2919 = vmatmul.msk.f32.gmra.mxu1 %vm249_vm7, %v3324_v25 }
 0x5eb   :  { %v1025_v57 = vpop.f32.mrf.mxu1 }
 0x5ec   :  { %3075 = vrcp.f32 %v1025_v57  ;;  %v598_v57 = vadd.f32 %v3688_v10, %v3653_v51 }
 0x5f2   :  { %v3076_v49 = vpop.eup %3075 }
 0x5f3   :  { %v1045_v34 = vmul.f32 %v3076_v49, %v3074_v33  ;;  %v1028_v37 = vpop.f32.mrf.mxu1  ;;  %v1455_v33 = vld [vmem:[%s4563_s0 + $0x5a8] sm:$0xff] }
 0x5f4   :  { %3077 = vrcp.f32 %v1028_v37 }
 0x5f5   :  { %v2775_v58 = vsel %vm1050_vm12, %v1045_v34, 0.0  ;;  %2879 = vmatmul.msk.f32.vlgmr.msrb.gmra.mxu2 %vm1050_vm12, %v1045_v34 }
 0x5f6   :  { %2788 = vst [vmem:[%s4564_s1 + $0x18] sm:$0xff] %v2775_v58  ;;  %1469 = vmatpush.msrb.mxu2 %v1456_v32 }
 0x5f8   :  { %1470 = vmatpush.msrb.mxu2 %v1455_v33 }
 0x5fa   :  { %v3078_v3 = vpop.eup %3077 }
 0x5fb   :  { %v1031_v6 = vpop.f32.mrf.mxu1  ;;  %v1046_v7 = vmul.f32 %v3078_v3, %v3673_v28  ;;  %v28_v28 = vld [vmem:[%s4563_s0 + $0x108] sm:$0xff] }
 0x5fc   :  { %3079 = vrcp.f32 %v1031_v6  ;;  %1117 = vperm.xlu2 %3016, %v28_v28   ;;  %v1214_v28 = vld [vmem:[%s4563_s0 + $0x550] sm:$0xff] }
 0x5fd   :  { %2880 = vmatmul.msk.f32.gmra.mxu2 %vm1050_vm12, %v1046_v7  ;;  %v2776_v59 = vsel %vm1050_vm12, %v1046_v7, 0.0  ;;  %v3864_v7 = vld [vmem:[%s4563_s0 + $0xe0] sm:$0xff] }
 0x5fe   :  { %2789 = vst [vmem:[%s4564_s1 + $0x20] sm:$0xff] %v2776_v59  ;;  %v1175_v59 = vld [vmem:[%s4563_s0 + $0x500] sm:$0xff] }
 0x5ff   :  { %1200 = vmatpush.msra.mxu3 %v1175_v59 }
 0x601   :  { %1201 = vmatpush.msra.mxu3 %v1174_v0 }
 0x602   :  { %v3080_v4 = vpop.eup %3079 }
 0x603   :  { %v1034_v5 = vpop.f32.mrf.mxu1  ;;  %v1047_v55 = vmul.f32 %v3080_v4, %v3670_v29  ;;  %v1454_v29 = vld [vmem:[%s4563_s0 + $0x5a0] sm:$0xff]  ;;  %v1271_v4 = vld [vmem:[%s4563_s0 + $0x4b0] sm:$0xff] }
 0x604   :  { %3081 = vrcp.f32 %v1034_v5  ;;  %1471 = vmatpush.msrb.mxu2 %v1454_v29  ;;  %v1270_v5 = vld [vmem:[%s4563_s0 + $0x4a8] sm:$0xff]  ;;  %1284 = vmatpush.msrb.mxu3 %v1271_v4 }
 0x605   :  { %2881 = vmatmul.msk.f32.gmra.mxu2 %vm1050_vm12, %v1047_v55  ;;  %v2777_v11 = vsel %vm1050_vm12, %v1047_v55, 0.0  ;;  %v1269_v55 = vld [vmem:[%s4563_s0 + $0x4a0] sm:$0xff]  ;;  %v1213_v29 = vld [vmem:[%s4563_s0 + $0x548] sm:$0xff] }
 0x606   :  { %2790 = vst [vmem:[%s4564_s1 + $0x28] sm:$0xff] %v2777_v11  ;;  %1472 = vmatpush.msrb.mxu2 %v1453_v24  ;;  %1285 = vmatpush.msrb.mxu3 %v1270_v5  ;;  %v1268_v11 = vld [vmem:[%s4563_s0 + $0x498] sm:$0xff] }
 0x608   :  { %1286 = vmatpush.msrb.mxu3 %v1269_v55 }
 0x60a   :  { %v3082_v23 = vpop.eup %3081  ;;  %1287 = vmatpush.msrb.mxu3 %v1268_v11 }
 0x60b   :  { %v1037_v22 = vpop.f32.mrf.mxu1  ;;  %v1048_v1 = vmul.f32 %v3082_v23, %v3667_v31  ;;  %v1212_v23 = vld [vmem:[%s4563_s0 + $0x540] sm:$0xff] }
 0x60c   :  { %3083 = vrcp.f32 %v1037_v22  ;;  %v1211_v22 = vld [vmem:[%s4563_s0 + $0x538] sm:$0xff] }
 0x60d   :  { %2882 = vmatmul.msk.f32.gmra.mxu2 %vm1050_vm12, %v1048_v1  ;;  %v2778_v26 = vsel %vm1050_vm12, %v1048_v1, 0.0 }
 0x60e   :  { %2791 = vst [vmem:[%s4564_s1 + $0x30] sm:$0xff] %v2778_v26 }
 0x612   :  { %v3084_v35 = vpop.eup %3083 }
 0x613   :  { %v1049_v27 = vmul.f32 %v3084_v35, %v3664_v20 }
 0x615   :  { %2883 = vmatmul.msk.f32.gmra.mxu2 %vm1050_vm12, %v1049_v27  ;;  %v2779_v31 = vsel %vm1050_vm12, %v1049_v27, 0.0 }
 0x616   :  { %2792 = vst [vmem:[%s4564_s1 + $0x38] sm:$0xff] %v2779_v31  ;;  %v1267_v31 = vld [vmem:[%s4563_s0 + $0x4f0] sm:$0xff] }
 0x61d   :  { %2904 = vmatmul.msk.f32.vlgmr.msra.gmra.mxu2 %vm249_vm7, %v3316_v19 }
 0x625   :  { %2905 = vmatmul.msk.f32.gmra.mxu2 %vm249_vm7, %v3324_v25 }
 0x62d   :  { %2908 = vmatmul.msk.f32.vlgmr.msrb.gmra.mxu2 %vm249_vm7, %v3376_v42 }
 0x635   :  { %2909 = vmatmul.msk.f32.gmra.mxu2 %vm249_vm7, %v3392_v48  ;;  %v604_v48 = vadd.f32 %v3692_v13, %v3657_v56  ;;  %v595_v56 = vadd.f32 %v3686_v12, %v3651_v40 }
 0x63d   :  { %2910 = vmatmul.msk.f32.gmra.mxu2 %vm249_vm7, %v3396_v50  ;;  %v3042_v50 = vld [vmem:[%s4563_s0 + $0x1c0] ss:$0 sm:$0xff] }
 0x63e   :  { %v612_v47 = vadd.f32 %v3042_v50, %v604_v48  ;;  %v610_v51 = vadd.f32 %v3042_v50, %v598_v57  ;;  %v609_v62 = vadd.f32 %v3042_v50, %v595_v56  ;;  %v608_v40 = vadd.f32 %v3042_v50, %v592_v17  ;;  %v1400_v57 = vld [vmem:[%s4563_s0 + $0x620] sm:$0xff] }
 0x645   :  { %2911 = vmatmul.msk.f32.gmra.mxu2 %vm249_vm7, %v3400_v52  ;;  %v601_v52 = vadd.f32 %v3690_v15, %v3655_v53  ;;  %v3855_v15 = vpop.permute.xlu0 %1112 }
 0x647   :  { %v611_v13 = vadd.f32 %v3042_v50, %v601_v52  ;;  %v1402_v50 = vld [vmem:[%s4563_s0 + $0x630] sm:$0xff]  ;;  %v1401_v52 = vld [vmem:[%s4563_s0 + $0x628] sm:$0xff] }
 0x64d   :  { %2912 = vmatmul.msk.f32.gmra.mxu2 %vm249_vm7, %v3404_v54 }
 0x656   :  { %v3850_v37 = vpop.permute.xlu2 %1117 }
 0x678   :  { %v1095_v20 = vpop.f32.mrf.mxu2 }
 0x679   :  { %v1135_v2 = vmul.f32 %v3855_v15, %v1095_v20  ;;  %v1266_v20 = vld [vmem:[%s4563_s0 + $0x4e8] sm:$0xff] }
 0x67b   :  { %v1140_v6 = vmul.f32 %v1135_v2, %v608_v40 }
 0x680   :  { %v1098_v8 = vpop.f32.mrf.mxu2 }
 0x681   :  { %v1136_v10 = vmul.f32 %v3850_v37, %v1098_v8  ;;  %v1265_v8 = vld [vmem:[%s4563_s0 + $0x4e0] sm:$0xff] }
 0x683   :  { %v1141_v12 = vmul.f32 %v1136_v10, %v609_v62 }
 0x688   :  { %v1101_v14 = vpop.f32.mrf.mxu2 }
 0x689   :  { %v1137_v58 = vmul.f32 %v3844_v21, %v1101_v14  ;;  %v1264_v14 = vld [vmem:[%s4563_s0 + $0x4d8] sm:$0xff] }
 0x68b   :  { %v1142_v3 = vmul.f32 %v1137_v58, %v610_v51 }
 0x690   :  { %v1104_v42 = vpop.f32.mrf.mxu2 }
 0x691   :  { %v1138_v49 = vmul.f32 %v3835_v18, %v1104_v42  ;;  %v3045_v42 = vld [vmem:[%s4563_s0 + $0x1e0] ss:$0 sm:$0xff] }
 0x693   :  { %v1143_v46 = vmul.f32 %v1138_v49, %v611_v13  ;;  %v1399_v49 = vld [vmem:[%s4563_s0 + $0x618] sm:$0xff] }
 0x698   :  { %v1107_v54 = vpop.f32.mrf.mxu2 }
 0x699   :  { %v1139_v34 = vmul.f32 %v3833_v16, %v1107_v54 }
 0x69b   :  { %v1144_v53 = vmul.f32 %v1139_v34, %v612_v47 }
 0x69d   :  { %1162 = vmatpush.msrb.mxu0 %v1144_v53 }
 0x69f   :  { %1163 = vmatpush.msrb.mxu0 %v1143_v46 }
 0x6a1   :  { %1164 = vmatpush.msrb.mxu0 %v1142_v3 }
 0x6a3   :  { %1165 = vmatpush.msrb.mxu0 %v1141_v12 }
 0x6a5   :  { %1166 = vmatpush.msrb.mxu0 %v1140_v6 }
 0x6a6   :  { %2884 = vmatmul.msk.f32.vlgmr.msrb.gmra.mxu0 %vm978_vm11, %v3864_v7 }
 0x6a7   :  { %1235 = vmatpush.msra.mxu0 %v1214_v28 }
 0x6a9   :  { %1236 = vmatpush.msra.mxu0 %v1213_v29  ;;  %v3135_v29 = vld [vmem:[%s4563_s0 + $0xb8] sm:$0xff] }
 0x6ab   :  { %1237 = vmatpush.msra.mxu0 %v1212_v23  ;;  %v1531_v23 = vld [vmem:[%s4563_s0 + $0x6b0] sm:$0xff] }
 0x6ad   :  { %1238 = vmatpush.msra.mxu0 %v1211_v22  ;;  %v1530_v22 = vld [vmem:[%s4563_s0 + $0x6a8] sm:$0xff] }
 0x6ae   :  { %2885 = vmatmul.msk.f32.gmra.mxu0 %vm978_vm11, %v3871_v38 }
 0x6af   :  { %1313 = vmatpush.msrb.mxu0 %v1267_v31 }
 0x6b1   :  { %1314 = vmatpush.msrb.mxu0 %v1266_v20  ;;  %v3137_v20 = vld [vmem:[%s4563_s0 + $0xc8] sm:$0xff] }
 0x6b3   :  { %1315 = vmatpush.msrb.mxu0 %v1265_v8  ;;  %v4006_v8 = vld [vmem:[%s4563_s0 + $0x90] sm:$0xff] }
 0x6b5   :  { %1316 = vmatpush.msrb.mxu0 %v1264_v14  ;;  %v4013_v14 = vld [vmem:[%s4563_s0 + $0x98] sm:$0xff] }
 0x723   :  { %v1168_v32 = vpop.f32.mrf.mxu0 }
 0x724   :  { %2886 = vmatmul.msk.f32.vlgmr.msra.gmra.mxu3 %vm249_vm7, %v1168_v32 }
 0x72b   :  { %v1171_v33 = vpop.f32.mrf.mxu0 }
 0x72c   :  { %2887 = vmatmul.msk.f32.gmra.mxu3 %vm249_vm7, %v1171_v33  ;;  %v1424_v33 = vpop.f32.mrf.mxu2 }
 0x734   :  { %2890 = vmatmul.msk.f32.vlgmr.msrb.gmra.mxu3 %vm249_vm7, %v3316_v19  ;;  %v3044_v19 = vld [vmem:[%s4563_s0 + $0x1d0] ss:$0 sm:$0xff] }
 0x73c   :  { %2891 = vmatmul.msk.f32.gmra.mxu3 %vm249_vm7, %v3324_v25 }
 0x7a7   :  { %v1203_v25 = vpop.f32.mrf.mxu3 }
 0x7a8   :  { %v1204_v1 = vadd.f32 %v3044_v19, %v1203_v25  ;;  %v1529_v25 = vld [vmem:[%s4563_s0 + $0x6a0] sm:$0xff] }
 0x7aa   :  { %v1209_v24 = vmax.f32 %v1204_v1, 0.0  ;;  %v1528_v1 = vld [vmem:[%s4563_s0 + $0x698] sm:$0xff] }
 0x7ac   :  { %2888 = vmatmul.msk.f32.vlgmr.msra.gmra.mxu0 %vm249_vm7, %v1209_v24  ;;  %v3136_v24 = vld [vmem:[%s4563_s0 + $0xc0] sm:$0xff] }
 0x7ad   :  { %1442 = vmatpush.msra.mxu0 %v1402_v50 }
 0x7af   :  { %v1206_v26 = vpop.f32.mrf.mxu3  ;;  %1443 = vmatpush.msra.mxu0 %v1401_v52 }
 0x7b0   :  { %v1207_v35 = vadd.f32 %v3044_v19, %v1206_v26  ;;  %v1427_v26 = vpop.f32.mrf.mxu2 }
 0x7b1   :  { %1444 = vmatpush.msra.mxu0 %v1400_v57 }
 0x7b2   :  { %v1210_v27 = vmax.f32 %v1207_v35, 0.0 }
 0x7b3   :  { %1445 = vmatpush.msra.mxu0 %v1399_v49 }
 0x7b4   :  { %2889 = vmatmul.msk.f32.gmra.mxu0 %vm249_vm7, %v1210_v27 }
 0x7b7   :  { %v1289_v4 = vpop.f32.mrf.mxu3 }
 0x7bf   :  { %v1292_v55 = vpop.f32.mrf.mxu3 }
 0x829   :  { %v1240_v48 = vpop.f32.mrf.mxu0 }
 0x82a   :  { %v1241_v54 = vadd.f32 %v3045_v42, %v1240_v48  ;;  %v1345_v48 = vpop.f32.mrf.mxu1 }
 0x82c   :  { %v1248_v47 = vmul.f32 %v1241_v54, %v1241_v54  ;;  %v1246_v40 = vmul.f32 0.5, %v1241_v54 }
 0x82e   :  { %v1250_v34 = vmul.f32 %v1248_v47, %v1241_v54 }
 0x830   :  { %v1252_v56 = vmul.f32 0.044715, %v1250_v34 }
 0x831   :  { %v1243_v13 = vpop.f32.mrf.mxu0 }
 0x832   :  { %v1254_v58 = vadd.f32 %v1252_v56, %v1241_v54  ;;  %v1244_v53 = vadd.f32 %v3045_v42, %v1243_v13  ;;  %v4021_v42 = vld [vmem:[%s4563_s0 + $0xa0] sm:$0xff]  ;;  %v1348_v50 = vpop.f32.mrf.mxu1 }
 0x834   :  { %v1256_v17 = vmul.f32 0.7978846, %v1254_v58  ;;  %v1249_v51 = vmul.f32 %v1244_v53, %v1244_v53  ;;  %v1247_v63 = vmul.f32 0.5, %v1244_v53 }
 0x836   :  { %3085 = vtanh.f32 %v1256_v17  ;;  %v1251_v10 = vmul.f32 %v1249_v51, %v1244_v53 }
 0x838   :  { %v1253_v46 = vmul.f32 0.044715, %v1251_v10 }
 0x83a   :  { %v1255_v62 = vadd.f32 %v1253_v46, %v1244_v53  ;;  %v1351_v54 = vpop.f32.mrf.mxu1 }
 0x83c   :  { %v3086_v2 = vpop.eup %3085  ;;  %v1257_v3 = vmul.f32 0.7978846, %v1255_v62  ;;  %v3145_v62 = vld [vmem:[%s4563_s0 + $0x218] sm:$0xff] }
 0x83d   :  { %v1260_v12 = vadd.f32 1.0, %v3086_v2  ;;  %v3146_v2 = vld [vmem:[%s4563_s0 + $0x210] sm:$0xff] }
 0x83e   :  { %3087 = vtanh.f32 %v1257_v3  ;;  %v3147_v3 = vld [vmem:[%s4563_s0 + $0x208] sm:$0xff] }
 0x83f   :  { %v1262_v6 = vmul.f32 %v1260_v12, %v1246_v40  ;;  %v3148_v40 = vld [vmem:[%s4563_s0 + $0x200] sm:$0xff]  ;;  %v3048_v12 = vld [vmem:[%s4563_s0 + $0x1f8] ss:$0 sm:$0xff] }
 0x841   :  { %2892 = vmatmul.msk.f32.vlgmr.msrb.gmra.mxu0 %vm249_vm7, %v1262_v6 }
 0x842   :  { %v1354_v49 = vpop.f32.mrf.mxu1 }
 0x844   :  { %v3088_v9 = vpop.eup %3087 }
 0x845   :  { %v1261_v59 = vadd.f32 1.0, %v3088_v9  ;;  %v3046_v9 = vld [vmem:[%s4563_s0 + $0x1b8] ss:$0 sm:$0xff] }
 0x847   :  { %v1263_v0 = vmul.f32 %v1261_v59, %v1247_v63 }
 0x849   :  { %2893 = vmatmul.msk.f32.gmra.mxu0 %vm249_vm7, %v1263_v0 }
 0x84a   :  { %v1357_v56 = vpop.f32.mrf.mxu1 }
 0x851   :  { %2906 = vmatmul.msk.f32.vlgmr.msra.gmra.mxu0 %vm249_vm7, %v1262_v6 }
 0x852   :  { %v1553_v58 = vpop.f32.mrf.mxu1 }
 0x859   :  { %2907 = vmatmul.msk.f32.gmra.mxu0 %vm249_vm7, %v1263_v0 }
 0x85a   :  { %v1556_v17 = vpop.f32.mrf.mxu1 }
 0x8be   :  { %v1318_v5 = vpop.f32.mrf.mxu0 }
 0x8bf   :  { %v1319_v32 = vadd.f32 %v1318_v5, %v1289_v4 }
 0x8c6   :  { %v1321_v11 = vpop.f32.mrf.mxu0 }
 0x8c7   :  { %v1322_v28 = vadd.f32 %v1321_v11, %v1292_v55 }
 0x8c9   :  { %1374 = vmatpush.msra.mxu3 %v1322_v28 }
 0x8cb   :  { %1375 = vmatpush.msra.mxu3 %v1319_v32 }
 0x8cc   :  { %2899 = vmatmul.msk.f32.vlgmr.msra.gmra.mxu3 %vm414_vm8, %v3135_v29 }
 0x8cd   :  { %1571 = vmatpush.msrb.mxu3 %v1531_v23 }
 0x8ce   :  { %v1447_v19 = vpop.f32.mrf.mxu0 }
 0x8cf   :  { %1572 = vmatpush.msrb.mxu3 %v1530_v22  ;;  %v1448_v31 = vadd.f32 %v1447_v19, %v1424_v33 }
 0x8d1   :  { %1573 = vmatpush.msrb.mxu3 %v1529_v25 }
 0x8d3   :  { %1574 = vmatpush.msrb.mxu3 %v1528_v1 }
 0x8d4   :  { %2900 = vmatmul.msk.f32.gmra.mxu3 %vm414_vm8, %v3136_v24 }
 0x8d5   :  { %1653 = vmatpush.msra.mxu3 %v3518_v41  ;;  %v3984_v41 = vld [vmem:[%s4563_s0 + $0x80] sm:$0xff] }
 0x8d6   :  { %v1450_v35 = vpop.f32.mrf.mxu0 }
 0x8d7   :  { %v1451_v27 = vadd.f32 %v1450_v35, %v1427_v26  ;;  %1654 = vmatpush.msra.mxu3 %v3524_v43  ;;  %v3139_v43 = vld [vmem:[%s4563_s0 + $0xd0] sm:$0xff] }
 0x8d9   :  { %1503 = vmatpush.msrb.mxu0 %v1451_v27  ;;  %1655 = vmatpush.msra.mxu3 %v3530_v44  ;;  %v3995_v44 = vld [vmem:[%s4563_s0 + $0x88] sm:$0xff] }
 0x8db   :  { %1504 = vmatpush.msrb.mxu0 %v1448_v31  ;;  %1656 = vmatpush.msra.mxu3 %v3536_v45  ;;  %v3141_v45 = vld [vmem:[%s4563_s0 + $0xd8] sm:$0xff] }
 0x8dc   :  { %2901 = vmatmul.msk.f32.gmra.mxu3 %vm414_vm8, %v3137_v20  ;;  %2913 = vmatmul.msk.f32.vlgmr.msrb.gmra.mxu0 %vm414_vm8, %v3984_v41 }
 0x8e4   :  { %2902 = vmatmul.msk.f32.gmra.mxu3 %vm414_vm8, %v3139_v43  ;;  %2914 = vmatmul.msk.f32.gmra.mxu0 %vm414_vm8, %v3995_v44 }
 0x8ec   :  { %2903 = vmatmul.msk.f32.gmra.mxu3 %vm414_vm8, %v3141_v45  ;;  %2915 = vmatmul.msk.f32.gmra.mxu0 %vm414_vm8, %v4006_v8 }
 0x8f4   :  { %2916 = vmatmul.msk.f32.gmra.mxu0 %vm414_vm8, %v4013_v14  ;;  %2920 = vmatmul.msk.f32.vlgmr.msrb.gmra.mxu3 %vm249_vm7, %v1262_v6 }
 0x8fc   :  { %2917 = vmatmul.msk.f32.gmra.mxu0 %vm414_vm8, %v4021_v42  ;;  %2921 = vmatmul.msk.f32.gmra.mxu3 %vm249_vm7, %v1263_v0 }
 0x94f   :  { %v1377_v52 = vpop.f32.mrf.mxu3 }
 0x950   :  { %v1378_v6 = vadd.f32 %v1377_v52, %v1345_v48 }
 0x952   :  { %v1394_v0 = vadd.f32 %v3046_v9, %v1378_v6  ;;  %v3149_v6 = vld [vmem:[%s4563_s0 + $0x148] sm:$0xff] }
 0x957   :  { %v1380_v57 = vpop.f32.mrf.mxu3 }
 0x958   :  { %v1381_v55 = vadd.f32 %v1380_v57, %v1348_v50 }
 0x95a   :  { %v1395_v32 = vadd.f32 %v3046_v9, %v1381_v55 }
 0x95f   :  { %v1383_v47 = vpop.f32.mrf.mxu3 }
 0x960   :  { %v1384_v23 = vadd.f32 %v1383_v47, %v1351_v54 }
 0x962   :  { %v1396_v25 = vadd.f32 %v3046_v9, %v1384_v23 }
 0x967   :  { %v1386_v34 = vpop.f32.mrf.mxu3 }
 0x968   :  { %v1387_v26 = vadd.f32 %v1386_v34, %v1354_v49 }
 0x96a   :  { %v1397_v31 = vadd.f32 %v3046_v9, %v1387_v26 }
 0x96f   :  { %v1389_v13 = vpop.f32.mrf.mxu3 }
 0x970   :  { %v1390_v45 = vadd.f32 %v1389_v13, %v1357_v56  ;;  %v4567_v13 = vmov 0  }
 0x972   :  { %v1398_v52 = vadd.f32 %v3046_v9, %v1390_v45 }
 0x977   :  { %v1576_v53 = vpop.f32.mrf.mxu3 }
 0x978   :  { %v1577_v46 = vadd.f32 %v1576_v53, %v1553_v58 }
 0x97f   :  { %v1579_v51 = vpop.f32.mrf.mxu3 }
 0x980   :  { %v1580_v10 = vadd.f32 %v1579_v51, %v1556_v17 }
 0x982   :  { %1598 = vmatpush.msra.mxu1 %v1580_v10 }
 0x984   :  { %1599 = vmatpush.msra.mxu1 %v1577_v46 }
 0x985   :  { %2922 = vmatmul.msk.f32.vlgmr.msra.gmra.mxu1 %vm414_vm8, %v3984_v41 }
 0x986   :  { %2945 = vmatpush.xpose.msk.msrb.mxu1 %vm1050_vm12, %v3145_v62 }
 0x98a   :  { %2946 = vmatpush.xpose.msk.msrb.mxu1 %vm1050_vm12, %v3146_v2 }
 0x98d   :  { %2923 = vmatmul.msk.f32.gmra.mxu1 %vm414_vm8, %v3995_v44 }
 0x98e   :  { %2947 = vmatpush.xpose.msk.msrb.mxu1 %vm1050_vm12, %v3147_v3 }
 0x992   :  { %2948 = vmatpush.xpose.msk.msrb.mxu1 %vm1050_vm12, %v3148_v40 }
 0x995   :  { %2924 = vmatmul.msk.f32.gmra.mxu1 %vm414_vm8, %v4006_v8 }
 0x99d   :  { %2925 = vmatmul.msk.f32.gmra.mxu1 %vm414_vm8, %v4013_v14 }
 0x9a5   :  { %2926 = vmatmul.msk.f32.gmra.mxu1 %vm414_vm8, %v4021_v42 }
 0xa02   :  { %v1601_v63 = vpop.f32.mrf.mxu1 }
 0xa03   :  { %v1602_v59 = vadd.f32 %v3048_v12, %v1601_v63 }
 0xa05   :  { %v1616_v4 = vmul.f32 0.35355338, %v1602_v59  ;;  %v3150_v59 = vld [vmem:[%s4563_s0 + $0x128] sm:$0xff] }
 0xa07   :  { %v1621_v5 = vmul.f32 %v1616_v4, %v1394_v0 }
 0xa09   :  { %2927 = vmatmul.msk.f32.vlgmr.msra.gmra.mxu3 %vm249_vm7, %v1621_v5 }
 0xa0a   :  { %v1604_v11 = vpop.f32.mrf.mxu1 }
 0xa0b   :  { %v1605_v28 = vadd.f32 %v3048_v12, %v1604_v11 }
 0xa0d   :  { %v1617_v33 = vmul.f32 0.35355338, %v1605_v28  ;;  %v3151_v28 = vld [vmem:[%s4563_s0 + $0x130] sm:$0xff] }
 0xa0f   :  { %v1622_v29 = vmul.f32 %v1617_v33, %v1395_v32 }
 0xa11   :  { %2928 = vmatmul.msk.f32.gmra.mxu3 %vm249_vm7, %v1622_v29  ;;  %v3152_v29 = vld [vmem:[%s4563_s0 + $0x138] sm:$0xff] }
 0xa12   :  { %v1607_v22 = vpop.f32.mrf.mxu1 }
 0xa13   :  { %v1608_v19 = vadd.f32 %v3048_v12, %v1607_v22 }
 0xa15   :  { %v1618_v1 = vmul.f32 0.35355338, %v1608_v19 }
 0xa17   :  { %v1623_v24 = vmul.f32 %v1618_v1, %v1396_v25  ;;  %v3153_v1 = vld [vmem:[%s4563_s0 + $0x140] sm:$0xff] }
 0xa19   :  { %2929 = vmatmul.msk.f32.gmra.mxu3 %vm249_vm7, %v1623_v24 }
 0xa1a   :  { %v1610_v35 = vpop.f32.mrf.mxu1 }
 0xa1b   :  { %v1611_v27 = vadd.f32 %v3048_v12, %v1610_v35 }
 0xa1d   :  { %v1619_v20 = vmul.f32 0.35355338, %v1611_v27 }
 0xa1f   :  { %v1624_v43 = vmul.f32 %v1619_v20, %v1397_v31 }
 0xa21   :  { %2930 = vmatmul.msk.f32.gmra.mxu3 %vm249_vm7, %v1624_v43 }
 0xa22   :  { %v1613_v48 = vpop.f32.mrf.mxu1 }
 0xa23   :  { %v1614_v50 = vadd.f32 %v3048_v12, %v1613_v48 }
 0xa25   :  { %v1620_v54 = vmul.f32 0.35355338, %v1614_v50 }
 0xa27   :  { %v1625_v57 = vmul.f32 %v1620_v54, %v1398_v52 }
 0xa29   :  { %2931 = vmatmul.msk.f32.gmra.mxu3 %vm249_vm7, %v1625_v57 }
 0xa8c   :  { %v4063_v47 = vpop.f32.mrf.mxu3 }
 0xa8d   :  { %1759 = vperm.xlu0 %3019, %v4063_v47   ;;  %1675 = vperm.xlu1 %3015, %v4063_v47  }
 0xa94   :  { %v4067_v49 = vpop.f32.mrf.mxu3 }
 0xa95   :  { %3021 = vset.pattern.permute.xlu0 %v3158_v61  ;;  %3018 = vset.pattern.permute.xlu1 %v3158_v61 }
 0xa96   :  { %1680 = vperm.xlu2 %3016, %v4067_v49   ;;  %1719 = vperm.xlu1 %3018, %v4063_v47  }
 0xa97   :  { %1723 = vperm.xlu0 %3021, %v4067_v49  }
 0xa9c   :  { %v4074_v34 = vpop.f32.mrf.mxu3 }
 0xa9e   :  { %3020 = vset.pattern.permute.xlu1 %v3160_v30 }
 0xa9f   :  { %3022 = vset.pattern.permute.xlu0 %v3157_v60  ;;  %1799 = vperm.xlu1 %3020, %v4063_v47  }
 0xaa0   :  { %1763 = vperm.xlu0 %3022, %v4067_v49  }
 0xaa4   :  { %v4080_v56 = vpop.f32.mrf.mxu3 }
 0xaa5   :  { %1690 = vperm.xlu2 %3016, %v4080_v56  }
 0xaa7   :  { %3023 = vset.pattern.permute.xlu1 %v4567_v13 }
 0xaa8   :  { %3032 = vset.pattern.permute.xlu0 %v3160_v30  ;;  %1685 = vperm.xlu1 %3023, %v4074_v34  }
 0xaa9   :  { %1811 = vperm.xlu0 %3032, %v4080_v56  }
 0xaac   :  { %v4096_v58 = vpop.f32.mrf.mxu3 }
 0xaad   :  { %3026 = vset.pattern.permute.xlu2 %v3158_v61 }
 0xaae   :  { %1731 = vperm.xlu2 %3026, %v4080_v56  }
 0xab0   :  { %3024 = vset.pattern.permute.xlu1 %v3158_v61 }
 0xab1   :  { %1727 = vperm.xlu1 %3024, %v4074_v34   ;;  %3035 = vset.pattern.permute.xlu0 %v3158_v61 }
 0xab6   :  { %3027 = vset.pattern.permute.xlu2 %v3157_v60 }
 0xab7   :  { %1771 = vperm.xlu2 %3027, %v4080_v56  }
 0xab9   :  { %3025 = vset.pattern.permute.xlu1 %v3157_v60 }
 0xaba   :  { %1767 = vperm.xlu1 %3025, %v4074_v34  }
 0xabf   :  { %3028 = vset.pattern.permute.xlu2 %v4567_v13 }
 0xac0   :  { %1695 = vperm.xlu2 %3028, %v4096_v58  }
 0xac2   :  { %1775 = vperm.xlu1 %3025, %v4096_v58  }
 0xac8   :  { %3029 = vset.pattern.permute.xlu2 %v3158_v61 }
 0xac9   :  { %1735 = vperm.xlu2 %3029, %v4096_v58  }
 0xaca   :  { %3030 = vset.pattern.permute.xlu1 %v3160_v30 }
 0xacb   :  { %1803 = vperm.xlu1 %3030, %v4067_v49  }
 0xad1   :  { %3031 = vset.pattern.permute.xlu2 %v3160_v30 }
 0xad2   :  { %1815 = vperm.xlu2 %3031, %v4096_v58  }
 0xad3   :  { %3033 = vset.pattern.permute.xlu1 %v4567_v13 }
 0xada   :  { %1807 = vperm.xlu2 %3031, %v4074_v34  }
 0xae2   :  { %3034 = vset.pattern.permute.xlu2 %v4567_v13 }
 0xaf0   :  { %v1681_v60 = vpop.permute.xlu2 %1680 }
 0xaf1   :  { %v1699_v19 = vadd.f32 %v3151_v28, %v1681_v60 }
 0xaf3   :  { %v1704_v52 = vsel %vm414_vm8, %v1699_v19, -inf }
 0xaff   :  { %v1676_v53 = vpop.permute.xlu1 %1675  ;;  %v1691_v17 = vpop.permute.xlu2 %1690 }
 0xb00   :  { %v1760_v40 = vpop.permute.xlu0 %1759  ;;  %v1698_v5 = vadd.f32 %v3150_v59, %v1676_v53  ;;  %v1701_v20 = vadd.f32 %v3153_v1, %v1691_v17 }
 0xb02   :  { %v1703_v25 = vsel %vm414_vm8, %v1698_v5, -inf }
 0xb08   :  { %v1720_v51 = vpop.permute.xlu1 %1719  ;;  %v1732_v10 = vpop.permute.xlu2 %1731 }
 0xb09   :  { %v1724_v63 = vpop.permute.xlu0 %1723  ;;  %v1738_v0 = vadd.f32 %v3150_v59, %v1720_v51  ;;  %v1741_v24 = vadd.f32 %v3153_v1, %v1732_v10  ;;  %v1706_v51 = vsel %vm414_vm8, %v1701_v20, -inf  ;;  %v1778_v10 = vadd.f32 %v3150_v59, %v1760_v40 }
 0xb0a   :  { %v1739_v32 = vadd.f32 %v3151_v28, %v1724_v63 }
 0xb0b   :  { %v1743_v11 = vsel %vm414_vm8, %v1738_v0, -inf  ;;  %v1746_v54 = vsel %vm414_vm8, %v1741_v24, -inf }
 0xb0c   :  { %v1744_v43 = vsel %vm414_vm8, %v1739_v32, -inf }
 0xb11   :  { %v1800_v46 = vpop.permute.xlu1 %1799  ;;  %v1772_v62 = vpop.permute.xlu2 %1771 }
 0xb12   :  { %v1764_v48 = vpop.permute.xlu0 %1763  ;;  %v1818_v24 = vadd.f32 %v3150_v59, %v1800_v46 }
 0xb1a   :  { %v1686_v2 = vpop.permute.xlu1 %1685  ;;  %v1696_v3 = vpop.permute.xlu2 %1695 }
 0xb1b   :  { %v1702_v4 = vadd.f32 %v3149_v6, %v1696_v3  ;;  %v1700_v26 = vadd.f32 %v3152_v29, %v1686_v2  ;;  %v1812_v19 = vpop.permute.xlu0 %1811 }
 0xb1c   :  { %v1821_v20 = vadd.f32 %v3153_v1, %v1812_v19 }
 0xb1d   :  { %v1707_v33 = vsel %vm414_vm8, %v1702_v4, -inf  ;;  %v1705_v57 = vsel %vm414_vm8, %v1700_v26, -inf  ;;  %v1783_v4 = vsel %vm414_vm8, %v1778_v10, -inf }
 0xb1e   :  { %v1708_v27 = vmax.f32 %v1703_v25, %v1707_v33  ;;  %v1710_v2 = vmax.f32 %v1705_v57, %v1706_v51  ;;  %v1826_v46 = vsel %vm414_vm8, %v1821_v20, -inf }
 0xb20   :  { %v1709_v60 = vmax.f32 %v1708_v27, %v1704_v52 }
 0xb22   :  { %v1711_v63 = vmax.f32 %v1709_v60, %v1710_v2 }
 0xb23   :  { %v1728_v12 = vpop.permute.xlu1 %1727  ;;  %v1736_v30 = vpop.permute.xlu2 %1735 }
 0xb24   :  { %v1742_v9 = vadd.f32 %v3149_v6, %v1736_v30  ;;  %v1740_v23 = vadd.f32 %v3152_v29, %v1728_v12  ;;  %v1779_v30 = vadd.f32 %v3151_v28, %v1764_v48  ;;  %v1712_v25 = vrot.slane %v1711_v63, 4 }
 0xb26   :  { %v1747_v55 = vsel %vm414_vm8, %v1742_v9, -inf  ;;  %v1745_v45 = vsel %vm414_vm8, %v1740_v23, -inf  ;;  %v1781_v9 = vadd.f32 %v3153_v1, %v1772_v62  ;;  %v1784_v40 = vsel %vm414_vm8, %v1779_v30, -inf }
 0xb27   :  { %v1748_v22 = vmax.f32 %v1743_v11, %v1747_v55  ;;  %v1750_v53 = vmax.f32 %v1745_v45, %v1746_v54  ;;  %v1713_v48 = vmax.f32 %v1711_v63, %v1712_v25  ;;  %v4159_v25 = vpop.f32.mrf.mxu2 }
 0xb29   :  { %v1749_v50 = vmax.f32 %v1748_v22, %v1744_v43  ;;  %v1786_v22 = vsel %vm414_vm8, %v1781_v9, -inf }
 0xb2b   :  { %v1751_v3 = vmax.f32 %v1749_v50, %v1750_v53  ;;  %v1714_v53 = vrot.slane %v1713_v48, 2 }
 0xb2c   :  { %v1768_v35 = vpop.permute.xlu1 %1767  ;;  %v1816_v31 = vpop.permute.xlu2 %1815 }
 0xb2d   :  { %v1780_v17 = vadd.f32 %v3152_v29, %v1768_v35  ;;  %v1752_v5 = vrot.slane %v1751_v3, 4  ;;  %v1822_v33 = vadd.f32 %v3149_v6, %v1816_v31 }
 0xb2f   :  { %v1785_v55 = vsel %vm414_vm8, %v1780_v17, -inf  ;;  %v1753_v27 = vmax.f32 %v1751_v3, %v1752_v5  ;;  %v1827_v43 = vsel %vm414_vm8, %v1822_v33, -inf }
 0xb30   :  { %v1790_v62 = vmax.f32 %v1785_v55, %v1786_v22 }
 0xb31   :  { %v1754_v57 = vrot.slane %v1753_v27, 2 }
 0xb33   :  { %v1755_v2 = vmax.f32 %v1753_v27, %v1754_v57 }
 0xb34   :  { %v1776_v12 = vpop.permute.xlu1 %1775  ;;  %v1808_v32 = vpop.permute.xlu2 %1807 }
 0xb35   :  { %v1782_v0 = vadd.f32 %v3149_v6, %v1776_v12  ;;  %v1820_v35 = vadd.f32 %v3152_v29, %v1808_v32  ;;  %v1823_v6 = vsel %vm414_vm8, %v1818_v24, -inf  ;;  %v1715_v12 = vmax.f32 %v1713_v48, %v1714_v53  ;;  %v4161_v24 = vpop.f32.mrf.mxu2 }
 0xb36   :  { %v1828_v60 = vmax.f32 %v1823_v6, %v1827_v43  ;;  %v1756_v9 = vrot.slane %v1755_v2, 1 }
 0xb37   :  { %v1787_v11 = vsel %vm414_vm8, %v1782_v0, -inf  ;;  %v1825_v52 = vsel %vm414_vm8, %v1820_v35, -inf }
 0xb38   :  { %v1788_v23 = vmax.f32 %v1783_v4, %v1787_v11  ;;  %v1830_v1 = vmax.f32 %v1825_v52, %v1826_v46  ;;  %v1757_v5 = vmax.f32 %v1755_v2, %v1756_v9  ;;  %v2129_v9 = vld [vmem:[%s4563_s0 + $0x3f0] sm:$0xff] }
 0xb3a   :  { %v1789_v26 = vmax.f32 %v1788_v23, %v1784_v40 }
 0xb3c   :  { %v1791_v45 = vmax.f32 %v1789_v26, %v1790_v62 }
 0xb3d   :  { %v1804_v50 = vpop.permute.xlu1 %1803  ;;  %v4163_v62 = vpop.f32.mrf.mxu2 }
 0xb3e   :  { %v1792_v31 = vrot.slane %v1791_v45, 4  ;;  %v1819_v54 = vadd.f32 %v3151_v28, %v1804_v50  ;;  %v1716_v28 = vrot.slane %v1715_v12, 1 }
 0xb40   :  { %v1793_v59 = vmax.f32 %v1791_v45, %v1792_v31  ;;  %v1824_v29 = vsel %vm414_vm8, %v1819_v54, -inf  ;;  %v1717_v32 = vmax.f32 %v1715_v12, %v1716_v28  ;;  %v2126_v28 = vld [vmem:[%s4563_s0 + $0x3d8] sm:$0xff] }
 0xb41   :  { %v1829_v51 = vmax.f32 %v1828_v60, %v1824_v29 }
 0xb42   :  { %v1794_v10 = vrot.slane %v1793_v59, 2  ;;  %v1838_v40 = vsel %vm923_vm9, %v1717_v32, %v1757_v5 }
 0xb43   :  { %v1831_v3 = vmax.f32 %v1829_v51, %v1830_v1  ;;  %v3155_v1 = vld [vmem:[%s4563_s0 + $0xb0] sm:$0xff]  ;;  %v4185_v51 = vpop.f32.mrf.mxu0 }
 0xb44   :  { %v1795_v17 = vmax.f32 %v1793_v59, %v1794_v10 }
 0xb45   :  { %v1832_v30 = vrot.slane %v1831_v3, 4  ;;  %v4165_v26 = vpop.f32.mrf.mxu2 }
 0xb46   :  { %v1796_v0 = vrot.slane %v1795_v17, 1 }
 0xb47   :  { %v1833_v63 = vmax.f32 %v1831_v3, %v1832_v30 }
 0xb48   :  { %v1797_v11 = vmax.f32 %v1795_v17, %v1796_v0  ;;  %v2127_v0 = vld [vmem:[%s4563_s0 + $0x3e0] sm:$0xff] }
 0xb49   :  { %v1834_v4 = vrot.slane %v1833_v63, 2 }
 0xb4a   :  { %v1839_v22 = vsel %vm91_vm5, %v1838_v40, %v1797_v11 }
 0xb4b   :  { %v1835_v55 = vmax.f32 %v1833_v63, %v1834_v4  ;;  %v4187_v10 = vpop.f32.mrf.mxu0  ;;  %v2128_v63 = vld [vmem:[%s4563_s0 + $0x3e8] sm:$0xff] }
 0xb4d   :  { %v1836_v33 = vrot.slane %v1835_v55, 1  ;;  %v4167_v35 = vpop.f32.mrf.mxu2 }
 0xb4f   :  { %v1837_v23 = vmax.f32 %v1835_v55, %v1836_v33 }
 0xb51   :  { %v1840_v19 = vsel %vm926_vm10, %v1839_v22, %v1837_v23 }
 0xb52   :  { %2932 = vmatpush.xpose.msk.msra.mxu2 %vm414_vm8, %v1840_v19 }
 0xb53   :  { %v4189_v2 = vpop.f32.mrf.mxu0 }
 0xb55   :  { %2933 = vmatmul.msk.f32.vlgmr.msra.gmra.mxu2 %vm414_vm8, %v3984_v41 }
 0xb5b   :  { %v4191_v3 = vpop.f32.mrf.mxu0 }
 0xb5d   :  { %2934 = vmatmul.msk.f32.gmra.mxu2 %vm414_vm8, %v3995_v44 }
 0xb63   :  { %v4193_v17 = vpop.f32.mrf.mxu0 }
 0xb65   :  { %2935 = vmatmul.msk.f32.gmra.mxu2 %vm414_vm8, %v4006_v8 }
 0xb6d   :  { %2936 = vmatmul.msk.f32.gmra.mxu2 %vm414_vm8, %v4013_v14 }
 0xb75   :  { %2937 = vmatmul.msk.f32.gmra.mxu2 %vm414_vm8, %v4021_v42 }
 0xbd8   :  { %v1861_v27 = vpop.f32.mrf.mxu2 }
 0xbd9   :  { %v1876_v60 = vsub.f32 %v4063_v47, %v1861_v27  ;;  %v3154_v47 = vld [vmem:[%s4563_s0 + $0xa8] sm:$0xff] }
 0xbdb   :  { %v1881_v29 = vmul.f32 1.442695, %v1876_v60  ;;  %v3047_v60 = vld [vmem:[%s4563_s0 + $0x1c8] ss:$0 sm:$0xff] }
 0xbe0   :  { %v1864_v20 = vpop.f32.mrf.mxu2 }
 0xbe1   :  { %v1877_v52 = vsub.f32 %v4067_v49, %v1864_v20 }
 0xbe3   :  { %v1883_v59 = vmul.f32 1.442695, %v1877_v52 }
 0xbe8   :  { %v1867_v43 = vpop.f32.mrf.mxu2 }
 0xbe9   :  { %v1878_v6 = vsub.f32 %v4074_v34, %v1867_v43 }
 0xbeb   :  { %v1885_v46 = vmul.f32 1.442695, %v1878_v6  ;;  %v2039_v6 = vld [vmem:[%s4563_s0 + $0x530] sm:$0xff] }
 0xbec   :  { %2060 = vmatpush.msrb.mxu2 %v2039_v6  ;;  %v2215_v6 = vld [vmem:[%s4563_s0 + $0x358] sm:$0xff] }
 0xbf0   :  { %v1870_v45 = vpop.f32.mrf.mxu2 }
 0xbf1   :  { %v1879_v48 = vsub.f32 %v4080_v56, %v1870_v45 }
 0xbf3   :  { %v1887_v54 = vmul.f32 1.442695, %v1879_v48 }
 0xbf8   :  { %v1873_v50 = vpop.f32.mrf.mxu2 }
 0xbf9   :  { %v1880_v31 = vsub.f32 %v4096_v58, %v1873_v50 }
 0xbfb   :  { %v1889_v57 = vmul.f32 1.442695, %v1880_v31  ;;  %v2038_v31 = vld [vmem:[%s4563_s0 + $0x528] sm:$0xff] }
 0xbfc   :  { %2061 = vmatpush.msrb.mxu2 %v2038_v31 }
 0xbfd   :  { %3089 = vpow2.f32 %v1889_v57  ;;  %v1519_v57 = vadd.f32 %v4193_v17, %v4167_v35 }
 0xbfe   :  { %3091 = vpow2.f32 %v1887_v54  ;;  %v2037_v54 = vld [vmem:[%s4563_s0 + $0x520] sm:$0xff] }
 0xbff   :  { %3093 = vpow2.f32 %v1885_v46  ;;  %2062 = vmatpush.msrb.mxu2 %v2037_v54  ;;  %v1516_v46 = vadd.f32 %v4191_v3, %v4165_v26  ;;  %v4342_v54 = vld [vmem:[%s4563_s0] sm:$0x3] }
 0xc00   :  { %3095 = vpow2.f32 %v1883_v59 }
 0xc01   :  { %3097 = vpow2.f32 %v1881_v29  ;;  %v1513_v29 = vadd.f32 %v4189_v2, %v4163_v62  ;;  %v1526_v35 = vadd.f32 %v3047_v60, %v1516_v46 }
 0xc03   :  { %v4174_v53 = vpop.eup %3089  ;;  %v1525_v26 = vadd.f32 %v3047_v60, %v1513_v29 }
 0xc04   :  { %1902 = vmatpush.msra.mxu0 %v4174_v53  ;;  %v3092_v34 = vpop.eup %3091 }
 0xc05   :  { %v3094_v56 = vpop.eup %3093 }
 0xc06   :  { %1903 = vmatpush.msra.mxu0 %v3092_v34  ;;  %v3096_v49 = vpop.eup %3095 }
 0xc07   :  { %v3098_v58 = vpop.eup %3097 }
 0xc08   :  { %1904 = vmatpush.msra.mxu0 %v3094_v56 }
 0xc0a   :  { %1905 = vmatpush.msra.mxu0 %v3096_v49 }
 0xc0c   :  { %1906 = vmatpush.msra.mxu0 %v3098_v58 }
 0xc0d   :  { %2938 = vmatmul.msk.f32.vlgmr.msra.gmra.mxu0 %vm978_vm11, %v3154_v47 }
 0xc15   :  { %2939 = vmatmul.msk.f32.gmra.mxu0 %vm978_vm11, %v3155_v1  ;;  %v1507_v1 = vadd.f32 %v4185_v51, %v4159_v25  ;;  %v2073_v51 = vld [vmem:[%s4563_s0 + $0x558] sm:$0xff] }
 0xc8a   :  { %v1908_v12 = vpop.f32.mrf.mxu0 }
 0xc92   :  { %v1911_v30 = vpop.f32.mrf.mxu0 }
 0xc93   :  { %1928 = vmatpush.msrb.mxu0 %v1911_v30 }
 0xc95   :  { %1929 = vmatpush.msrb.mxu0 %v1908_v12 }
 0xc96   :  { %2940 = vmatmul.msk.f32.vlgmr.msrb.gmra.mxu0 %vm414_vm8, %v3984_v41 }
 0xc97   :  { %2175 = vmatpush.msra.mxu0 %v2129_v9 }
 0xc99   :  { %2176 = vmatpush.msra.mxu0 %v2128_v63 }
 0xc9b   :  { %2177 = vmatpush.msra.mxu0 %v2127_v0 }
 0xc9d   :  { %2178 = vmatpush.msra.mxu0 %v2126_v28 }
 0xc9e   :  { %2941 = vmatmul.msk.f32.gmra.mxu0 %vm414_vm8, %v3995_v44 }
 0xca6   :  { %2942 = vmatmul.msk.f32.gmra.mxu0 %vm414_vm8, %v4006_v8 }
 0xcae   :  { %2943 = vmatmul.msk.f32.gmra.mxu0 %vm414_vm8, %v4013_v14 }
 0xcb6   :  { %2944 = vmatmul.msk.f32.gmra.mxu0 %vm414_vm8, %v4021_v42 }
 0xcbe   :  { %2962 = vmatmul.msk.f32.vlgmr.msra.gmra.mxu0 %vm249_vm7, %v3358_v36 }
 0xcc6   :  { %2963 = vmatmul.msk.f32.gmra.mxu0 %vm249_vm7, %v3367_v39 }
 0xd13   :  { %v1931_v41 = vpop.f32.mrf.mxu0 }
 0xd14   :  { %3099 = vrcp.f32 %v1931_v41 }
 0xd1a   :  { %v3100_v4 = vpop.eup %3099 }
 0xd1b   :  { %v1951_v5 = vmul.f32 %v3100_v4, %v3098_v58  ;;  %v1934_v44 = vpop.f32.mrf.mxu0  ;;  %v2133_v4 = vld [vmem:[%s4563_s0 + $0x430] sm:$0xff] }
 0xd1c   :  { %3101 = vrcp.f32 %v1934_v44  ;;  %v2131_v44 = vld [vmem:[%s4563_s0 + $0x420] sm:$0xff] }
 0xd1d   :  { %v2780_v8 = vsel %vm1050_vm12, %v1951_v5, 0.0  ;;  %2949 = vmatmul.msk.f32.vlgmr.msrb.gmra.mxu1 %vm1050_vm12, %v1951_v5  ;;  %v2132_v5 = vld [vmem:[%s4563_s0 + $0x428] sm:$0xff] }
 0xd1e   :  { %2793 = vst [vmem:[%s4564_s1 + $0x40] sm:$0xff] %v2780_v8  ;;  %v2130_v8 = vld [vmem:[%s4563_s0 + $0x418] sm:$0xff] }
 0xd22   :  { %v3102_v14 = vpop.eup %3101 }
 0xd23   :  { %v1937_v42 = vpop.f32.mrf.mxu0  ;;  %v1952_v36 = vmul.f32 %v3102_v14, %v3096_v49  ;;  %v1510_v49 = vadd.f32 %v4187_v10, %v4161_v24  ;;  %v3049_v10 = vld [vmem:[%s4563_s0 + $0x1d8] ss:$0 sm:$0xff]  ;;  %v3050_v14 = vld [vmem:[%s4563_s0 + $0x1e8] ss:$0 sm:$0xff] }
 0xd24   :  { %3103 = vrcp.f32 %v1937_v42 }
 0xd25   :  { %2950 = vmatmul.msk.f32.gmra.mxu1 %vm1050_vm12, %v1952_v36  ;;  %v2781_v39 = vsel %vm1050_vm12, %v1952_v36, 0.0  ;;  %v1524_v62 = vadd.f32 %v3047_v60, %v1510_v49  ;;  %v2222_v36 = vld [vmem:[%s4563_s0 + $0x390] sm:$0xff] }
 0xd26   :  { %2794 = vst [vmem:[%s4564_s1 + $0x48] sm:$0xff] %v2781_v39  ;;  %v2221_v39 = vld [vmem:[%s4563_s0 + $0x388] sm:$0xff] }
 0xd2a   :  { %v3104_v55 = vpop.eup %3103 }
 0xd2b   :  { %v1940_v11 = vpop.f32.mrf.mxu0  ;;  %v1953_v32 = vmul.f32 %v3104_v55, %v3094_v56 }
 0xd2c   :  { %3105 = vrcp.f32 %v1940_v11  ;;  %v2220_v11 = vld [vmem:[%s4563_s0 + $0x380] sm:$0xff] }
 0xd2d   :  { %2951 = vmatmul.msk.f32.gmra.mxu1 %vm1050_vm12, %v1953_v32  ;;  %v2782_v33 = vsel %vm1050_vm12, %v1953_v32, 0.0 }
 0xd2e   :  { %2795 = vst [vmem:[%s4564_s1 + $0x50] sm:$0xff] %v2782_v33  ;;  %v2219_v33 = vld [vmem:[%s4563_s0 + $0x378] sm:$0xff] }
 0xd32   :  { %v3106_v23 = vpop.eup %3105 }
 0xd33   :  { %v1943_v40 = vpop.f32.mrf.mxu0  ;;  %v1954_v22 = vmul.f32 %v3106_v23, %v3092_v34 }
 0xd34   :  { %3107 = vrcp.f32 %v1943_v40  ;;  %v2218_v40 = vld [vmem:[%s4563_s0 + $0x370] sm:$0xff] }
 0xd35   :  { %2952 = vmatmul.msk.f32.gmra.mxu1 %vm1050_vm12, %v1954_v22  ;;  %v2783_v19 = vsel %vm1050_vm12, %v1954_v22, 0.0 }
 0xd36   :  { %2796 = vst [vmem:[%s4564_s1 + $0x58] sm:$0xff] %v2783_v19 }
 0xd3a   :  { %v3108_v27 = vpop.eup %3107 }
 0xd3b   :  { %v1955_v20 = vmul.f32 %v3108_v27, %v4174_v53  ;;  %v1527_v53 = vadd.f32 %v3047_v60, %v1519_v57  ;;  %v2217_v27 = vld [vmem:[%s4563_s0 + $0x368] sm:$0xff] }
 0xd3d   :  { %2953 = vmatmul.msk.f32.gmra.mxu1 %vm1050_vm12, %v1955_v20  ;;  %v2784_v43 = vsel %vm1050_vm12, %v1955_v20, 0.0 }
 0xd3e   :  { %2797 = vst [vmem:[%s4564_s1 + $0x60] sm:$0xff] %v2784_v43 }
 0xd9a   :  { %v1988_v45 = vpop.f32.mrf.mxu1 }
 0xda2   :  { %v1991_v48 = vpop.f32.mrf.mxu1 }
 0xda3   :  { %v2004_v3 = vmul.f32 %v1991_v48, %v3850_v37  ;;  %v2076_v37 = vld [vmem:[%s4563_s0 + $0x570] sm:$0xff] }
 0xda5   :  { %v2009_v12 = vmul.f32 %v2004_v3, %v1524_v62  ;;  %v2246_v3 = vld [vmem:[%s4563_s0 + $0x340] sm:$0xff]  ;;  %v3052_v62 = vld [vmem:[%s4563_s0 + $0x190] ss:$0 sm:$0xff] }
 0xdaa   :  { %v1994_v50 = vpop.f32.mrf.mxu1 }
 0xdab   :  { %v2005_v58 = vmul.f32 %v1994_v50, %v3844_v21  ;;  %v2036_v21 = vld [vmem:[%s4563_s0 + $0x518] sm:$0xff] }
 0xdac   :  { %2063 = vmatpush.msrb.mxu2 %v2036_v21  ;;  %v2180_v21 = vpop.f32.mrf.mxu0 }
 0xdad   :  { %v2010_v2 = vmul.f32 %v2005_v58, %v1525_v26  ;;  %v2248_v58 = vld [vmem:[%s4563_s0 + $0x350] sm:$0xff]  ;;  %v2282_v26 = vld [vmem:[%s4563_s0 + $0x408] sm:$0xff] }
 0xdae   :  { %2152 = vmatpush.msra.mxu2 %v2133_v4 }
 0xdb0   :  { %2153 = vmatpush.msra.mxu2 %v2132_v5 }
 0xdb2   :  { %v1997_v52 = vpop.f32.mrf.mxu1  ;;  %2154 = vmatpush.msra.mxu2 %v2131_v44 }
 0xdb3   :  { %v2006_v34 = vmul.f32 %v1997_v52, %v3835_v18  ;;  %v2003_v18 = vmul.f32 %v1988_v45, %v3855_v15  ;;  %v2216_v45 = vld [vmem:[%s4563_s0 + $0x360] sm:$0xff] }
 0xdb4   :  { %2155 = vmatpush.msra.mxu2 %v2130_v8 }
 0xdb5   :  { %v2011_v17 = vmul.f32 %v2006_v34, %v1526_v35 }
 0xdba   :  { %v2000_v59 = vpop.f32.mrf.mxu1 }
 0xdbb   :  { %v2007_v56 = vmul.f32 %v2000_v59, %v3833_v16  ;;  %v1523_v16 = vadd.f32 %v3047_v60, %v1507_v1  ;;  %v2247_v1 = vld [vmem:[%s4563_s0 + $0x348] sm:$0xff] }
 0xdbd   :  { %v2012_v47 = vmul.f32 %v2007_v56, %v1527_v53  ;;  %v2008_v24 = vmul.f32 %v2003_v18, %v1523_v16  ;;  %v2280_v16 = vld [vmem:[%s4563_s0 + $0x3f8] sm:$0xff] }
 0xdbf   :  { %2024 = vmatpush.msrb.mxu3 %v2012_v47  ;;  %v2283_v47 = vld [vmem:[%s4563_s0 + $0x410] sm:$0xff] }
 0xdc0   :  { %2298 = vmatpush.msra.mxu1 %v2283_v47 }
 0xdc1   :  { %2025 = vmatpush.msrb.mxu3 %v2011_v17  ;;  %v2281_v17 = vld [vmem:[%s4563_s0 + $0x400] sm:$0xff] }
 0xdc2   :  { %2299 = vmatpush.msra.mxu1 %v2282_v26  ;;  %v2391_v26 = vld [vmem:[%s4563_s0 + $0x158] sm:$0xff] }
 0xdc3   :  { %2026 = vmatpush.msrb.mxu3 %v2010_v2  ;;  %v2245_v2 = vld [vmem:[%s4563_s0 + $0x338] sm:$0xff] }
 0xdc4   :  { %2300 = vmatpush.msra.mxu1 %v2281_v17  ;;  %v2390_v17 = vld [vmem:[%s4563_s0 + $0x150] sm:$0xff] }
 0xdc5   :  { %2027 = vmatpush.msrb.mxu3 %v2009_v12 }
 0xdc6   :  { %2301 = vmatpush.msra.mxu1 %v2280_v16 }
 0xdc7   :  { %2028 = vmatpush.msrb.mxu3 %v2008_v24  ;;  %v4378_v24 = vld [vmem:[%s4563_s0 + $0x30] sm:$0xff] }
 0xdc8   :  { %2954 = vmatmul.msk.f32.vlgmr.msrb.gmra.mxu3 %vm978_vm11, %v3864_v7  ;;  %v2075_v7 = vld [vmem:[%s4563_s0 + $0x568] sm:$0xff] }
 0xdc9   :  { %2097 = vmatpush.msra.mxu3 %v2076_v37  ;;  %v3051_v37 = vld [vmem:[%s4563_s0 + $0x1a0] ss:$0 sm:$0xff] }
 0xdcb   :  { %2098 = vmatpush.msra.mxu3 %v2075_v7  ;;  %v4389_v7 = vld [vmem:[%s4563_s0 + $0x38] sm:$0xff] }
 0xdd0   :  { %2955 = vmatmul.msk.f32.gmra.mxu3 %vm978_vm11, %v3871_v38  ;;  %v2074_v38 = vld [vmem:[%s4563_s0 + $0x560] sm:$0xff] }
 0xdd1   :  { %2099 = vmatpush.msra.mxu3 %v2074_v38 }
 0xdd3   :  { %2100 = vmatpush.msra.mxu3 %v2073_v51 }
 0xdd5   :  { %2233 = vmatpush.msrb.mxu3 %v2222_v36 }
 0xdd7   :  { %2234 = vmatpush.msrb.mxu3 %v2221_v39 }
 0xdd9   :  { %2235 = vmatpush.msrb.mxu3 %v2220_v11 }
 0xddb   :  { %2236 = vmatpush.msrb.mxu3 %v2219_v33 }
 0xddd   :  { %2237 = vmatpush.msrb.mxu3 %v2218_v40 }
 0xddf   :  { %2238 = vmatpush.msrb.mxu3 %v2217_v27  ;;  %v2212_v27 = vld [vmem:[%s4563_s0 + $0x228] sm:$0xff] }
 0xde1   :  { %2239 = vmatpush.msrb.mxu3 %v2216_v45  ;;  %v2375_v45 = vld [vmem:[%s4563_s0 + $0xf8] sm:$0xff] }
 0xde2   :  { %vm2377_vm14 = vcmp.gt.f32.partialorder %v2375_v45, 0.0 }
 0xde3   :  { %2240 = vmatpush.msrb.mxu3 %v2215_v6  ;;  %v3054_v6 = vld [vmem:[%s4563_s0 + $0x188] ss:$0 sm:$0xff] }
 0xe4b   :  { %v2030_v15 = vpop.f32.mrf.mxu3 }
 0xe4c   :  { %2956 = vmatmul.msk.f32.vlgmr.msrb.gmra.mxu2 %vm249_vm7, %v2030_v15 }
 0xe4d   :  { %2269 = vmatpush.msrb.mxu2 %v2248_v58 }
 0xe4f   :  { %2270 = vmatpush.msrb.mxu2 %v2247_v1 }
 0xe51   :  { %2271 = vmatpush.msrb.mxu2 %v2246_v3 }
 0xe53   :  { %v2033_v25 = vpop.f32.mrf.mxu3  ;;  %2272 = vmatpush.msrb.mxu2 %v2245_v2 }
 0xe54   :  { %2957 = vmatmul.msk.f32.gmra.mxu2 %vm249_vm7, %v2033_v25 }
 0xecf   :  { %v2065_v30 = vpop.f32.mrf.mxu2 }
 0xed0   :  { %v2066_v9 = vadd.f32 %v3049_v10, %v2065_v30  ;;  %v2183_v30 = vpop.f32.mrf.mxu0 }
 0xed2   :  { %v2071_v63 = vmax.f32 %v2066_v9, 0.0 }
 0xed4   :  { %2958 = vmatmul.msk.f32.vlgmr.msra.gmra.mxu3 %vm249_vm7, %v2071_v63 }
 0xed7   :  { %v2068_v0 = vpop.f32.mrf.mxu2 }
 0xed8   :  { %v2069_v28 = vadd.f32 %v3049_v10, %v2068_v0 }
 0xeda   :  { %v2072_v41 = vmax.f32 %v2069_v28, 0.0 }
 0xedc   :  { %2959 = vmatmul.msk.f32.gmra.mxu3 %vm249_vm7, %v2072_v41 }
 0xee4   :  { %2964 = vmatmul.msk.f32.vlgmr.msrb.gmra.mxu3 %vm47_vm3, %v4342_v54 }
 0xf57   :  { %v2102_v42 = vpop.f32.mrf.mxu3 }
 0xf58   :  { %v2103_v55 = vadd.f32 %v3050_v14, %v2102_v42 }
 0xf5a   :  { %v2110_v32 = vmul.f32 %v2103_v55, %v2103_v55  ;;  %v2108_v59 = vmul.f32 0.5, %v2103_v55 }
 0xf5c   :  { %v2112_v23 = vmul.f32 %v2110_v32, %v2103_v55 }
 0xf5e   :  { %v2114_v22 = vmul.f32 0.044715, %v2112_v23 }
 0xf5f   :  { %v2105_v19 = vpop.f32.mrf.mxu3 }
 0xf60   :  { %v2116_v20 = vadd.f32 %v2114_v22, %v2103_v55  ;;  %v2106_v43 = vadd.f32 %v3050_v14, %v2105_v19  ;;  %v2214_v22 = vld [vmem:[%s4563_s0 + $0x238] sm:$0xff]  ;;  %v2213_v19 = vld [vmem:[%s4563_s0 + $0x230] sm:$0xff] }
 0xf61   :  { %2361 = vmatpush.msrb.mxu0 %v2214_v22 }
 0xf62   :  { %v2118_v48 = vmul.f32 0.7978846, %v2116_v20  ;;  %v2111_v50 = vmul.f32 %v2106_v43, %v2106_v43  ;;  %v2109_v56 = vmul.f32 0.5, %v2106_v43  ;;  %v2211_v20 = vld [vmem:[%s4563_s0 + $0x220] sm:$0xff] }
 0xf63   :  { %2362 = vmatpush.msrb.mxu0 %v2213_v19 }
 0xf64   :  { %3109 = vtanh.f32 %v2118_v48  ;;  %v2113_v31 = vmul.f32 %v2111_v50, %v2106_v43  ;;  %v2379_v50 = vsel %vm2377_vm14, 1, %v4567_v13 }
 0xf65   :  { %2363 = vmatpush.msrb.mxu0 %v2212_v27  ;;  %2384 = vperm.xlu2 %3034, %v2379_v50  }
 0xf66   :  { %v2115_v52 = vmul.f32 0.044715, %v2113_v31 }
 0xf67   :  { %v2242_v18 = vpop.f32.mrf.mxu3  ;;  %2364 = vmatpush.msrb.mxu0 %v2211_v20 }
 0xf68   :  { %v2117_v57 = vadd.f32 %v2115_v52, %v2106_v43  ;;  %v2243_v12 = vadd.f32 %v3052_v62, %v2242_v18  ;;  %v2374_v43 = vld [vmem:[%s4563_s0 + $0xf0] sm:$0xff] }
 0xf69   :  { %2981 = vmatpush.xpose.msk.msra.mxu0 %vm84_vm6, %v2214_v22  ;;  %vm2376_vm13 = vcmp.gt.f32.partialorder %v2374_v43, 0.0 }
 0xf6a   :  { %v3110_v60 = vpop.eup %3109  ;;  %v2119_v46 = vmul.f32 0.7978846, %v2117_v57  ;;  %2969 = vmatpush.msk.msra.mxu3 %vm91_vm5, %v2243_v12  ;;  %v2378_v48 = vsel %vm2376_vm13, 1, %v4567_v13 }
 0xf6b   :  { %v2122_v29 = vadd.f32 1.0, %v3110_v60  ;;  %2970 = vmatmul.msk.f32.vlgmr.msra.gmra.mxu3 %vm84_vm6, %v4378_v24  ;;  %2381 = vperm.xlu1 %3033, %v2378_v48  }
 0xf6c   :  { %3111 = vtanh.f32 %v2119_v46 }
 0xf6d   :  { %v2124_v53 = vmul.f32 %v2122_v29, %v2108_v59  ;;  %2982 = vmatpush.xpose.msk.msra.mxu0 %vm84_vm6, %v2213_v19 }
 0xf6f   :  { %2960 = vmatmul.msk.f32.vlgmr.msra.gmra.mxu2 %vm249_vm7, %v2124_v53 }
 0xf71   :  { %2983 = vmatpush.xpose.msk.msra.mxu0 %vm84_vm6, %v2212_v27 }
 0xf72   :  { %v3112_v34 = vpop.eup %3111 }
 0xf73   :  { %v2123_v49 = vadd.f32 1.0, %v3112_v34  ;;  %2971 = vmatmul.msk.f32.gmra.mxu3 %vm84_vm6, %v4389_v7 }
 0xf75   :  { %v2125_v35 = vmul.f32 %v2123_v49, %v2109_v56  ;;  %2984 = vmatpush.xpose.msk.msra.mxu0 %vm84_vm6, %v2211_v20 }
 0xf77   :  { %2961 = vmatmul.msk.f32.gmra.mxu2 %vm249_vm7, %v2125_v35 }
 0xfbf   :  { %v2385_v35 = vpop.permute.xlu2 %2384 }
 0xfc0   :  { %vm2387_vm0 = vcmp.eq.s32.totalorder %v2385_v35, 1  ;;  %v2610_v35 = vld [vmem:[%s4563_s0 + $0x2c0] sm:$0xff] }
 0xfdd   :  { %v2382_v13 = vpop.permute.xlu1 %2381 }
 0xfde   :  { %vm2386_vm15 = vcmp.eq.s32.totalorder %v2382_v13, 1  ;;  %v2613_v13 = vld [vmem:[%s4563_s0 + $0x2d8] sm:$0xff] }
 0xfee   :  { %v2335_v31 = vpop.f32.mrf.mxu3 }
 0xff2   :  { %v2157_v15 = vpop.f32.mrf.mxu2 }
 0xff3   :  { %v2181_v25 = vadd.f32 %v2180_v21, %v2157_v15 }
 0xff5   :  { %v2188_v38 = vadd.f32 %v3051_v37, %v2181_v25 }
 0xff6   :  { %v2338_v59 = vpop.f32.mrf.mxu3 }
 0xff7   :  { %v2192_v51 = vmul.f32 %v2188_v38, %v2188_v38  ;;  %v2190_v39 = vmul.f32 0.5, %v2188_v38 }
 0xff9   :  { %v2194_v10 = vmul.f32 %v2192_v51, %v2188_v38 }
 0xffa   :  { %v2160_v9 = vpop.f32.mrf.mxu2 }
 0xffb   :  { %v2196_v63 = vmul.f32 0.044715, %v2194_v10  ;;  %v2184_v0 = vadd.f32 %v2183_v30, %v2160_v9 }
 0xffd   :  { %v2198_v28 = vadd.f32 %v2196_v63, %v2188_v38  ;;  %v2189_v41 = vadd.f32 %v3051_v37, %v2184_v0 }
 0xfff   :  { %v2200_v4 = vmul.f32 0.7978846, %v2198_v28  ;;  %v2193_v5 = vmul.f32 %v2189_v41, %v2189_v41  ;;  %v2191_v33 = vmul.f32 0.5, %v2189_v41 }
0x1001   :  { %3113 = vtanh.f32 %v2200_v4  ;;  %v2195_v44 = vmul.f32 %v2193_v5, %v2189_v41 }
0x1003   :  { %v2197_v8 = vmul.f32 0.044715, %v2195_v44 }
0x1005   :  { %v2199_v14 = vadd.f32 %v2197_v8, %v2189_v41 }
0x1007   :  { %v3114_v42 = vpop.eup %3113  ;;  %v2201_v36 = vmul.f32 0.7978846, %v2199_v14 }
0x1008   :  { %v2204_v55 = vadd.f32 1.0, %v3114_v42 }
0x1009   :  { %3115 = vtanh.f32 %v2201_v36 }
0x100a   :  { %v4393_v11 = vmul.f32 %v2204_v55, %v2190_v39 }
0x100c   :  { %2965 = vmatmul.msk.f32.vlgmr.msrb.gmra.mxu2 %vm249_vm7, %v4393_v11  ;;  %2967 = vmatmul.msk.f32.vlgmr.msra.gmra.mxu1 %vm249_vm7, %v4393_v11 }
0x100f   :  { %v3116_v32 = vpop.eup %3115 }
0x1010   :  { %v2205_v23 = vadd.f32 1.0, %v3116_v32 }
0x1012   :  { %v4399_v40 = vmul.f32 %v2205_v23, %v2191_v33 }
0x1014   :  { %2966 = vmatmul.msk.f32.gmra.mxu2 %vm249_vm7, %v4399_v40  ;;  %2968 = vmatmul.msk.f32.gmra.mxu1 %vm249_vm7, %v4399_v40 }
0x108f   :  { %v2274_v52 = vpop.f32.mrf.mxu2 }
0x1090   :  { %v2275_v57 = vadd.f32 %v3054_v6, %v2274_v52 }
0x1092   :  { %v2341_v60 = vmul.f32 %v2335_v31, %v2275_v57 }
0x1094   :  { %2972 = vmatmul.msk.f32.vlgmr.msrb.gmra.mxu0 %vm249_vm7, %v2341_v60  ;;  %v2616_v60 = vld [vmem:[%s4563_s0 + $0x2f0] sm:$0xff] }
0x1097   :  { %v2277_v46 = vpop.f32.mrf.mxu2 }
0x1098   :  { %v2278_v29 = vadd.f32 %v3054_v6, %v2277_v46  ;;  %v2615_v46 = vld [vmem:[%s4563_s0 + $0x2e8] sm:$0xff] }
0x109a   :  { %v2342_v53 = vmul.f32 %v2338_v59, %v2278_v29  ;;  %v2614_v59 = vld [vmem:[%s4563_s0 + $0x2e0] sm:$0xff]  ;;  %v2663_v29 = vld [vmem:[%s4563_s0 + $0x310] sm:$0xff] }
0x109c   :  { %2973 = vmatmul.msk.f32.gmra.mxu0 %vm249_vm7, %v2342_v53  ;;  %v2662_v53 = vld [vmem:[%s4563_s0 + $0x308] sm:$0xff] }
0x1111   :  { %v2366_v34 = vpop.f32.mrf.mxu0 }
0x1112   :  { %v2372_v56 = vmul.f32 0.25, %v2366_v34  ;;  %v2661_v34 = vld [vmem:[%s4563_s0 + $0x300] sm:$0xff] }
0x1114   :  { %v2388_v49 = vsel %vm2386_vm15, -1e+30, %v2372_v56  ;;  %v2612_v56 = vld [vmem:[%s4563_s0 + $0x2d0] sm:$0xff] }
0x1115   :  { %2414 = vperm.xlu0 %3035, %v2388_v49   ;;  %2394 = vperm.xlu1 %3033, %v2388_v49  }
0x1119   :  { %v2369_v58 = vpop.f32.mrf.mxu0 }
0x111a   :  { %v2373_v47 = vmul.f32 0.25, %v2369_v58  ;;  %v2609_v58 = vld [vmem:[%s4563_s0 + $0x2b8] sm:$0xff] }
0x111c   :  { %v2389_v1 = vsel %vm2387_vm0, -1e+30, %v2373_v47 }
0x111d   :  { %3036 = vset.pattern.permute.xlu1 %v3158_v61  ;;  %2399 = vperm.xlu2 %3034, %v2389_v1  }
0x111e   :  { %2418 = vperm.xlu1 %3036, %v2389_v1  }
0x1177   :  { %v2400_v3 = vpop.permute.xlu2 %2399 }
0x1178   :  { %v2403_v62 = vadd.f32 %v2400_v3, %v2391_v26 }
0x117a   :  { %v2405_v16 = vsel %vm84_vm6, %v2403_v62, -inf }
0x1187   :  { %v2395_v18 = vpop.permute.xlu1 %2394  ;;  %v2415_v61 = vpop.permute.xlu0 %2414 }
0x1188   :  { %v2402_v2 = vadd.f32 %v2395_v18, %v2390_v17  ;;  %v2421_v15 = vadd.f32 %v2415_v61, %v2390_v17  ;;  %v2605_v61 = vld [vmem:[%s4563_s0 + $0x298] sm:$0xff] }
0x118a   :  { %v2404_v12 = vsel %vm84_vm6, %v2402_v2, -inf  ;;  %v2423_v10 = vsel %vm84_vm6, %v2421_v15, -inf  ;;  %v2608_v2 = vld [vmem:[%s4563_s0 + $0x2b0] sm:$0xff] }
0x118b   :  { %v2406_v21 = vmax.f32 %v2404_v12, %v2405_v16  ;;  %v2660_v16 = vld [vmem:[%s4563_s0 + $0x2f8] sm:$0xff]  ;;  %v2606_v12 = vld [vmem:[%s4563_s0 + $0x2a0] sm:$0xff] }
0x118d   :  { %v2407_v37 = vrot.slane %v2406_v21, 4 }
0x118f   :  { %v2408_v25 = vmax.f32 %v2406_v21, %v2407_v37 }
0x1190   :  { %v2419_v38 = vpop.permute.xlu1 %2418 }
0x1191   :  { %v2422_v51 = vadd.f32 %v2419_v38, %v2391_v26  ;;  %v2409_v9 = vrot.slane %v2408_v25, 2 }
0x1193   :  { %v2424_v30 = vsel %vm84_vm6, %v2422_v51, -inf  ;;  %v2410_v28 = vmax.f32 %v2408_v25, %v2409_v9 }
0x1194   :  { %v2425_v63 = vmax.f32 %v2423_v10, %v2424_v30  ;;  %v3055_v10 = vld [vmem:[%s4563_s0 + $0x178] ss:$0 sm:$0xff] }
0x1195   :  { %v2411_v5 = vrot.slane %v2410_v28, 1 }
0x1196   :  { %v2426_v0 = vrot.slane %v2425_v63, 4 }
0x1197   :  { %v2412_v14 = vmax.f32 %v2410_v28, %v2411_v5 }
0x1198   :  { %v2427_v41 = vmax.f32 %v2425_v63, %v2426_v0  ;;  %v3161_v0 = vmov 32.0  }
0x119a   :  { %v2428_v4 = vrot.slane %v2427_v41, 2 }
0x119c   :  { %v2429_v44 = vmax.f32 %v2427_v41, %v2428_v4 }
0x119e   :  { %v2430_v8 = vrot.slane %v2429_v44, 1 }
0x11a0   :  { %v2431_v42 = vmax.f32 %v2429_v44, %v2430_v8 }
0x11a2   :  { %v2432_v36 = vsel %vm923_vm9, %v2412_v14, %v2431_v42 }
0x11a3   :  { %2974 = vmatpush.xpose.msk.msra.mxu2 %vm84_vm6, %v2432_v36 }
0x11a6   :  { %2975 = vmatmul.msk.f32.vlgmr.msra.gmra.mxu2 %vm84_vm6, %v4378_v24 }
0x11a7   :  { %2599 = vmatpush.msrb.mxu2 %v4399_v40  ;;  %v2210_v40 = vld [vmem:[%s4563_s0 + $0x40] sm:$0x3] }
0x11a9   :  { %2600 = vmatpush.msrb.mxu2 %v4393_v11  ;;  %v2303_v11 = vpop.f32.mrf.mxu1 }
0x11ab   :  { %2679 = vmatpush.msra.mxu2 %v2663_v29 }
0x11ad   :  { %2680 = vmatpush.msra.mxu2 %v2662_v53 }
0x11ae   :  { %2976 = vmatmul.msk.f32.gmra.mxu2 %vm84_vm6, %v4389_v7 }
0x11af   :  { %2681 = vmatpush.msra.mxu2 %v2661_v34 }
0x11b1   :  { %v2306_v20 = vpop.f32.mrf.mxu1  ;;  %2682 = vmatpush.msra.mxu2 %v2660_v16 }
0x1229   :  { %v2453_v39 = vpop.f32.mrf.mxu2 }
0x122a   :  { %v2459_v55 = vsub.f32 %v2388_v49, %v2453_v39  ;;  %v2611_v49 = vld [vmem:[%s4563_s0 + $0x2c8] sm:$0xff] }
0x122c   :  { %v2461_v23 = vmul.f32 1.442695, %v2459_v55 }
0x1231   :  { %v2456_v32 = vpop.f32.mrf.mxu2 }
0x1232   :  { %v2460_v33 = vsub.f32 %v2389_v1, %v2456_v32  ;;  %v3053_v1 = vld [vmem:[%s4563_s0 + $0x1a8] ss:$0 sm:$0xff] }
0x1233   :  { %v2307_v26 = vadd.f32 %v3053_v1, %v2306_v20  ;;  %v2304_v17 = vadd.f32 %v3053_v1, %v2303_v11 }
0x1234   :  { %v2463_v22 = vmul.f32 1.442695, %v2460_v33 }
0x1236   :  { %3117 = vpow2.f32 %v2463_v22  ;;  %v2739_v22 = vld [vmem:[%s4563_s0 + $0x330] sm:$0xff] }
0x1237   :  { %3119 = vpow2.f32 %v2461_v23  ;;  %2757 = vmatpush.msrb.mxu0 %v2739_v22 }
0x123c   :  { %v3118_v19 = vpop.eup %3117 }
0x123d   :  { %2482 = vmatpush.msrb.mxu1 %v3118_v19  ;;  %v3120_v27 = vpop.eup %3119 }
0x123f   :  { %2483 = vmatpush.msrb.mxu1 %v3120_v27 }
0x1240   :  { %2977 = vmatmul.msk.f32.vlgmr.msrb.gmra.mxu1 %vm414_vm8, %v2210_v40 }
0x12bd   :  { %v2485_v43 = vpop.f32.mrf.mxu1 }
0x12be   :  { %2978 = vmatpush.msk.msrb.mxu3 %vm91_vm5, %v2485_v43 }
0x12bf   :  { %2979 = vmatmul.msk.f32.vlgmr.msrb.gmra.mxu3 %vm84_vm6, %v4378_v24 }
0x12c0   :  { %2625 = vmatpush.msra.mxu3 %v2616_v60 }
0x12c2   :  { %2626 = vmatpush.msra.mxu3 %v2615_v46 }
0x12c4   :  { %2627 = vmatpush.msra.mxu3 %v2614_v59 }
0x12c6   :  { %2628 = vmatpush.msra.mxu3 %v2613_v13 }
0x12c7   :  { %2980 = vmatmul.msk.f32.gmra.mxu3 %vm84_vm6, %v4389_v7  ;;  %v2581_v7 = vld [vmem:[%s4563_s0 + $0x28] sm:$0x3] }
0x12c8   :  { %2988 = vmatmul.msk.f32.vlgmr.msrb.gmra.mxu2 %vm414_vm8, %v2581_v7  ;;  %2629 = vmatpush.msra.mxu3 %v2612_v56 }
0x12ca   :  { %2630 = vmatpush.msra.mxu3 %v2611_v49 }
0x12cc   :  { %2631 = vmatpush.msra.mxu3 %v2610_v35  ;;  %v3058_v35 = vld [vmem:[%s4563_s0 + $0x180] ss:$0 sm:$0xff] }
0x12ce   :  { %2632 = vmatpush.msra.mxu3 %v2609_v58 }
0x12cf   :  { %2989 = vmatmul.msk.f32.vlgmr.msra.gmra.mxu3 %vm47_vm3, %v4342_v54  ;;  %v2607_v54 = vld [vmem:[%s4563_s0 + $0x2a8] sm:$0xff] }
0x1342   :  { %v2508_v45 = vpop.f32.mrf.mxu3 }
0x1343   :  { %3121 = vrcp.f32 %v2508_v45 }
0x1349   :  { %v3122_v48 = vpop.eup %3121 }
0x134a   :  { %v2516_v50 = vmul.f32 %v3122_v48, %v3120_v27  ;;  %v2511_v6 = vpop.f32.mrf.mxu3  ;;  %v2736_v27 = vld [vmem:[%s4563_s0 + $0x318] sm:$0xff] }
0x134b   :  { %3123 = vrcp.f32 %v2511_v6  ;;  %v2602_v21 = vpop.f32.mrf.mxu2  ;;  %v3056_v6 = vld [vmem:[%s4563_s0 + $0x248] ss:$0 sm:$0xff] }
0x134c   :  { %v2773_v31 = vsel %vm84_vm6, %v2516_v50, 0.0  ;;  %2985 = vmatmul.msk.f32.vlgmr.msra.gmra.mxu0 %vm84_vm6, %v2516_v50  ;;  %2991 = vmatmul.msk.f32.vlgmr.msra.gmra.mxu2 %vm249_vm7, %v2602_v21  ;;  %3125 = vrcp.f32 %v3161_v0 }
0x134d   :  { %2786 = vst [vmem:[%s4564_s1 + $0x8] sm:$0xff] %v2773_v31 }
0x1351   :  { %v3124_v52 = vpop.eup %3123 }
0x1352   :  { %v2517_v57 = vmul.f32 %v3124_v52, %v3118_v19  ;;  %v2634_v15 = vpop.f32.mrf.mxu3  ;;  %v3126_v28 = vpop.eup %3125  ;;  %v2738_v19 = vld [vmem:[%s4563_s0 + $0x328] sm:$0xff]  ;;  %v3057_v52 = vld [vmem:[%s4563_s0 + $0x240] ss:$0 sm:$0xff] }
0x1353   :  { %v2696_v41 = vmul.f32 32.0, %v3126_v28  ;;  %vm2700_vm2 = vweird.f32 %v3126_v28  ;;  %2758 = vmatpush.msrb.mxu0 %v2738_v19 }
0x1354   :  { %2986 = vmatmul.msk.f32.gmra.mxu0 %vm84_vm6, %v2517_v57  ;;  %v2774_v24 = vsel %vm84_vm6, %v2517_v57, 0.0 }
0x1355   :  { %2787 = vst [vmem:[%s4564_s1 + $0x10] sm:$0xff] %v2774_v24  ;;  %v2697_v4 = vsub.f32 1.0, %v2696_v41 }
0x1357   :  { %v2698_v5 = vmul.f32 %v3126_v28, %v2697_v4 }
0x1359   :  { %v2699_v44 = vadd.f32 %v3126_v28, %v2698_v5 }
0x135b   :  { %v2701_v8 = vsel %vm2700_vm2, %v3126_v28, %v2699_v44 }
0x13c9   :  { %v2553_v47 = vpop.f32.mrf.mxu0 }
0x13ca   :  { %v2559_v18 = vmul.f32 %v2553_v47, %v2304_v17 }
0x13cf   :  { %v2684_v38 = vpop.f32.mrf.mxu2 }
0x13d1   :  { %v2556_v3 = vpop.f32.mrf.mxu0 }
0x13d2   :  { %v2560_v62 = vmul.f32 %v2556_v3, %v2307_v26 }
0x13d4   :  { %2575 = vmatpush.msra.mxu1 %v2560_v62 }
0x13d6   :  { %2576 = vmatpush.msra.mxu1 %v2559_v18 }
0x13d7   :  { %2987 = vmatmul.msk.f32.vlgmr.msra.gmra.mxu1 %vm414_vm8, %v2210_v40  ;;  %v2737_v40 = vld [vmem:[%s4563_s0 + $0x320] sm:$0xff]  ;;  %vm2770_vm8 = vcmask 7168  }
0x13d8   :  { %2652 = vmatpush.msrb.mxu1 %v2608_v2  ;;  %2759 = vmatpush.msrb.mxu0 %v2737_v40 }
0x13da   :  { %2653 = vmatpush.msrb.mxu1 %v2607_v54  ;;  %2760 = vmatpush.msrb.mxu0 %v2736_v27 }
0x13dc   :  { %2654 = vmatpush.msrb.mxu1 %v2606_v12 }
0x13de   :  { %2655 = vmatpush.msrb.mxu1 %v2605_v61 }
0x1454   :  { %v2578_v37 = vpop.f32.mrf.mxu1 }
0x1455   :  { %2990 = vmatmul.msk.f32.vlgmr.msrb.gmra.mxu1 %vm249_vm7, %v2578_v37 }
0x14d2   :  { %v2657_v25 = vpop.f32.mrf.mxu1 }
0x14d3   :  { %v2658_v51 = vadd.f32 %v2657_v25, %v2634_v15 }
0x14d5   :  { %v2687_v30 = vadd.f32 %v2684_v38, %v2658_v51 }
0x14d7   :  { %v2690_v9 = vadd.f32 %v3055_v10, %v2687_v30 }
0x14d9   :  { %v2692_v63 = vsel %vm2691_vm1, %v2690_v9, 0.0 }
0x14da   :  { %2693 = vadd.xlane.f32.xlu2 %v2692_v63 }
0x154d   :  { %v2694_v14 = vpop.xlane.xlu2 %2693 }
0x154e   :  { %v2702_v42 = vmul.f32 %v2701_v8, %v2694_v14 }
0x1550   :  { %v2703_v36 = vsub.f32 %v2690_v9, %v2702_v42 }
0x1552   :  { %v2704_v39 = vmul.f32 %v2703_v36, %v2703_v36 }
0x1554   :  { %v2705_v55 = vsel %vm2691_vm1, %v2704_v39, 0.0 }
0x1555   :  { %2706 = vadd.xlane.f32.xlu1 %v2705_v55 }
0x15c8   :  { %v2707_v32 = vpop.xlane.xlu1 %2706 }
0x15c9   :  { %v2708_v33 = vmul.f32 %v2707_v32, %v2701_v8 }
0x15cb   :  { %v2709_v23 = vadd.f32 1e-05, %v2708_v33 }
0x15cd   :  { %3127 = vrsqrt.f32 %v2709_v23  ;;  %vm2716_vm4 = vweird.f32 %v2709_v23 }
0x15d3   :  { %v3128_v11 = vpop.eup %3127 }
0x15d4   :  { %v2711_v20 = vmul.f32 %v3128_v11, %v2709_v23  ;;  %vm2717_vm3 = vweird.f32 %v3128_v11 }
0x15d5   :  { %vm2718_vm6 = vmor %vm2716_vm4, %vm2717_vm3 }
0x15d6   :  { %v2712_v43 = vmul.f32 %v3128_v11, %v2711_v20 }
0x15d8   :  { %v2713_v45 = vmul.f32 0.5, %v2712_v43 }
0x15da   :  { %v2714_v48 = vsub.f32 1.5, %v2713_v45 }
0x15dc   :  { %v2715_v50 = vmul.f32 %v3128_v11, %v2714_v48 }
0x15de   :  { %v2719_v31 = vsel %vm2718_vm6, %v3128_v11, %v2715_v50 }
0x15df   :  { %v2720_v57 = vmul.f32 %v2719_v31, %v2703_v36 }
0x15e1   :  { %v2723_v24 = vmul.f32 %v3056_v6, %v2720_v57 }
0x15e3   :  { %v2726_v7 = vadd.f32 %v3057_v52, %v2723_v24 }
0x15e5   :  { %v2728_v60 = vmul.f32 %v2726_v7, %v2726_v7  ;;  %v2727_v34 = vmul.f32 0.5, %v2726_v7 }
0x15e7   :  { %v2729_v46 = vmul.f32 %v2728_v60, %v2726_v7 }
0x15e9   :  { %v2730_v59 = vmul.f32 0.044715, %v2729_v46 }
0x15eb   :  { %v2731_v29 = vadd.f32 %v2730_v59, %v2726_v7 }
0x15ed   :  { %v2732_v53 = vmul.f32 0.7978846, %v2731_v29 }
0x15ef   :  { %3129 = vtanh.f32 %v2732_v53 }
0x15f5   :  { %v3130_v13 = vpop.eup %3129 }
0x15f6   :  { %v2734_v56 = vadd.f32 1.0, %v3130_v13 }
0x15f8   :  { %v2735_v49 = vmul.f32 %v2734_v56, %v2727_v34 }
0x15fa   :  { %2992 = vmatmul.msk.f32.vlgmr.msrb.gmra.mxu0 %vm249_vm7, %v2735_v49 }
0x1677   :  { %v2762_v58 = vpop.f32.mrf.mxu0 }
0x1678   :  { %v2763_v47 = vadd.f32 %v3058_v35, %v2762_v58 }
0x167a   :  { %v2765_v1 = vsub.f32 0.0, %v2763_v47 }
0x167c   :  { %v2766_v26 = vmul.f32 1.442695, %v2765_v1 }
0x167e   :  { %3131 = vpow2.f32 %v2766_v26 }
0x1684   :  { %v3132_v3 = vpop.eup %3131 }
0x1685   :  { %v2768_v17 = vadd.f32 1.0, %v3132_v3 }
0x1687   :  { %3133 = vrcp.f32 %v2768_v17 }
0x168d   :  { %v3134_v62 = vpop.eup %3133 }
0x168e   :  { %v2771_v18 = vsel %vm2770_vm8, %v3134_v62, 0.0 }
0x168f   :  { %v2772_v2 = vsel %vm91_vm5, %v2771_v18, 0.0 }
0x1690   :  { %2785 = vst [vmem:[%s4564_s1] sm:$0xff] %v2772_v2 }

</bundles_post_ra>
